<compile_context>
chip_gen: v6e
topology: v6e:2x2x1
jax: 0.10.0
libtpu: 0.0.40
codegen_flags: <defaults>
</compile_context>

<pallas_src>
import math
import functools

import jax
import jax.numpy as jnp
from jax.experimental import pallas as pl
from jax.experimental.pallas import tpu as pltpu

EPS = 1e-6        # LayerNorm eps (added to std, matching the PyTorch module)
NEG_INF = -1e9    # masked value used by the reference attention

OP_NAMES = (
    "ln_a", "ln_b",
    "wq_s", "bq_s", "wkv_s", "bkv_s", "wo_s", "bo_s",   # self-attention
    "wq_x", "bq_x", "wkv_x", "bkv_x", "wo_x", "bo_x",   # src-attention
    "w1", "b1", "w2", "b2",                             # feed-forward
)
# Weights consumed at every query-tile step; the fused K/V projections are
# only read inside the once-per-batch hoist block.
TILE_OP_NAMES = tuple(n for n in OP_NAMES if not n.startswith(("wkv", "bkv")))


def _layer_norm(v, a, b, eps):
    """Matches the PyTorch LayerNorm: a*(x-mean)/(std+eps)+b with
    torch.Tensor.std() semantics (unbiased, divide by N-1)."""
    d = v.shape[-1]
    mean = jnp.mean(v, axis=-1, keepdims=True)
    var = jnp.sum((v - mean) ** 2, axis=-1, keepdims=True) / (d - 1)
    std = jnp.sqrt(var)
    return a * (v - mean) / (std + eps) + b


def _project_kv(rows, w_kv, b_kv, n_heads):
    """Fused K/V projection -> head-major (H, Tk, d_k) bf16 pair.
    rows:(Tk,D).  Head split = static 128-aligned lane slices + a leading-axis
    stack (cheap vreg regrouping; no lane/sublane transpose)."""
    d_model = w_kv.shape[0]
    d_k = d_model // n_heads
    kv = jnp.dot(rows.astype(jnp.bfloat16), w_kv,
                 preferred_element_type=jnp.float32) + b_kv
    k_h = jnp.stack([kv[:, h * d_k:(h + 1) * d_k]
                     for h in range(n_heads)], axis=0).astype(jnp.bfloat16)
    v_h = jnp.stack([kv[:, d_model + h * d_k:d_model + (h + 1) * d_k]
                     for h in range(n_heads)], axis=0).astype(jnp.bfloat16)
    return k_h, v_h


def _mha_heads(q_rows, k_h, v_h, bias, w_q, b_q, w_o, b_o, n_heads, recip):
    """Head-batched multi-headed attention.
    q_rows:(Tq,D) f32, k_h/v_h:(H,Tk,d_k) bf16, bias:(Tq|1,Tk) additive f32
    (0 where attended, -1e9 where masked).
    QK^T and P·V are single head-batched dot_generals; the output projection
    is one dense (Tq,D)@(D,D) matmul; softmax normalization is deferred to a
    reciprocal applied to the (H,Tq,d_k) context."""
    d_model = q_rows.shape[-1]
    d_k = d_model // n_heads
    scale = 1.0 / math.sqrt(d_k)
    q = jnp.dot(q_rows.astype(jnp.bfloat16), w_q,
                preferred_element_type=jnp.float32) + b_q
    q = (q * scale).astype(jnp.bfloat16)
    q_h = jnp.stack([q[:, h * d_k:(h + 1) * d_k] for h in range(n_heads)], axis=0)
    # (H,Tq,d_k) x (H,Tk,d_k) -> (H,Tq,Tk)
    s = jax.lax.dot_general(q_h, k_h, (((2,), (2,)), ((0,), (0,))),
                            preferred_element_type=jnp.float32)
    s = s + bias[None]
    s = s - jnp.max(s, axis=-1, keepdims=True)
    p = jnp.exp(s)
    denom = jnp.sum(p, axis=-1, keepdims=True)           # (H,Tq,1)
    # (H,Tq,Tk) x (H,Tk,d_k) -> (H,Tq,d_k); normalization deferred.
    ctx = jax.lax.dot_general(p.astype(jnp.bfloat16), v_h,
                              (((2,), (1,)), ((0,), (0,))),
                              preferred_element_type=jnp.float32)
    ctx = ctx * recip(denom)
    # Back to (Tq, D) via lane-concat of leading-axis slices, then one dense Wo.
    ctx = jnp.concatenate([ctx[h] for h in range(n_heads)], axis=-1)
    return jnp.dot(ctx.astype(jnp.bfloat16), w_o,
                   preferred_element_type=jnp.float32) + b_o


def _decoder_tile_math(x, k_self, v_self, k_src, v_src,
                       causal_bias, src_bias, w, n_heads, recip):
    """Per-query-tile math shared by the kernel body and the JAX reference.
    x:(Tq,D) residual/query rows; k_*/v_*:(H,*,d_k) precomputed K/V heads."""
    # sublayer[0]: x + self_attn(norm(x), norm(x_full), norm(x_full), tgt_mask)
    h0 = _layer_norm(x, w["ln_a"][0:1], w["ln_b"][0:1], EPS)
    x1 = x + _mha_heads(h0, k_self, v_self, causal_bias,
                        w["wq_s"], w["bq_s"], w["wo_s"], w["bo_s"], n_heads, recip)
    # sublayer[1]: x + src_attn(norm(x), memory, memory, src_mask)
    h1 = _layer_norm(x1, w["ln_a"][1:2], w["ln_b"][1:2], EPS)
    x2 = x1 + _mha_heads(h1, k_src, v_src, src_bias,
                         w["wq_x"], w["bq_x"], w["wo_x"], w["bo_x"], n_heads, recip)
    # sublayer[2]: x + feed_forward(norm(x))
    h2 = _layer_norm(x2, w["ln_a"][2:3], w["ln_b"][2:3], EPS)
    ff = jnp.maximum(jnp.dot(h2.astype(jnp.bfloat16), w["w1"],
                             preferred_element_type=jnp.float32) + w["b1"], 0.0)
    ff = jnp.dot(ff.astype(jnp.bfloat16), w["w2"],
                 preferred_element_type=jnp.float32) + w["b2"]
    return x2 + ff


def decoder_layer_kernel(n_heads, src_len_ref, x_ref, xfull_ref, mem_ref, *refs):
    nw = len(OP_NAMES)
    w_refs = dict(zip(OP_NAMES, refs[:nw]))
    o_ref = refs[nw]
    k_self, v_self, k_src, v_src = refs[nw + 1:]

    b = pl.program_id(0)
    qt = pl.program_id(1)
    tq = x_ref.shape[1]
    t_full = xfull_ref.shape[1]
    s_len = mem_ref.shape[1]

    # ---- per-batch hoist: full-sequence LN + fused K/V projections computed
    # once per batch (first query tile) into head-major VMEM scratch and
    # reused across the inner "arbitrary" query-tile axis. ----
    @pl.when(qt == 0)
    def _():
        h_kv = _layer_norm(xfull_ref[0].astype(jnp.float32),
                           w_refs["ln_a"][0:1], w_refs["ln_b"][0:1], EPS)
        ks, vs = _project_kv(h_kv, w_refs["wkv_s"][...], w_refs["bkv_s"][...],
                             n_heads)
        k_self[...] = ks
        v_self[...] = vs
        kx, vx = _project_kv(mem_ref[0], w_refs["wkv_x"][...], w_refs["bkv_x"][...],
                             n_heads)
        k_src[...] = kx
        v_src[...] = vx

    # ---- masks generated in-kernel (no dense f32 mask DMA) ----
    # TODO(synk): arbitrary dense tgt/src masks (e.g. target padding) would
    # need a dense-mask input path; causal + per-batch source-length masks
    # cover the module's standard decoding usage.
    # TODO(synk): key-axis flash tiling (online softmax) would skip fully
    # masked causal key tiles and bound VMEM independently of T/S.
    row = qt * tq + jax.lax.broadcasted_iota(jnp.int32, (tq, t_full), 0)
    col = jax.lax.broadcasted_iota(jnp.int32, (tq, t_full), 1)
    causal_bias = jnp.where(row >= col, 0.0, NEG_INF).astype(jnp.float32)
    scol = jax.lax.broadcasted_iota(jnp.int32, (1, s_len), 1)
    src_bias = jnp.where(scol < src_len_ref[b], 0.0, NEG_INF).astype(jnp.float32)

    w_tile = {n: w_refs[n][...] for n in TILE_OP_NAMES}
    out = _decoder_tile_math(
        x_ref[0], k_self[...], v_self[...], k_src[...], v_src[...],
        causal_bias, src_bias, w_tile, n_heads,
        lambda d: pl.reciprocal(d, approx=True))
    o_ref[0] = out.astype(o_ref.dtype)


def pack_params(params):
    """Fuse / cast the module parameters for the kernel: K & V projections
    fused into (D, 2D) matmuls; matmul weights stored as bf16 in HBM."""
    bf16, f32 = jnp.bfloat16, jnp.float32

    def attn(w, b, tag):
        return {
            "wq_" + tag: w[0].astype(bf16),
            "bq_" + tag: b[0:1].astype(f32),
            "wkv_" + tag: jnp.concatenate([w[1], w[2]], axis=1).astype(bf16),
            "bkv_" + tag: jnp.concatenate([b[1:2], b[2:3]], axis=1).astype(f32),
            "wo_" + tag: w[3].astype(bf16),
            "bo_" + tag: b[3:4].astype(f32),
        }

    ops = {"ln_a": params["ln_a"].astype(f32), "ln_b": params["ln_b"].astype(f32),
           "w1": params["w1"].astype(bf16), "b1": params["b1"].astype(f32),
           "w2": params["w2"].astype(bf16), "b2": params["b2"].astype(f32)}
    ops.update(attn(params["w_self"], params["b_self"], "s"))
    ops.update(attn(params["w_src"], params["b_src"], "x"))
    return ops


def _const_spec(shape):
    # Grid-invariant block: constant index_map keeps the weight resident
    # across grid steps (no per-step re-DMA).
    # TODO(synk): pipeline_mode=pl.Buffered(1) would guarantee single
    # buffering of these grid-invariant weight blocks on v7x.
    n = len(shape)
    return pl.BlockSpec(shape, lambda b, q, sl, n=n: (0,) * n)


def _vmem_limit_bytes():
    # Generation-aware budget: ~3/4 of physical VMEM (96 MiB on v5e/v6e's
    # 128 MiB, 48 MiB on v7x's 64 MiB), capped at 112 MiB.
    cap = 64 * 1024 * 1024
    try:
        cap = int(getattr(pltpu.get_tpu_info(), "vmem_capacity_bytes", cap) or cap)
    except Exception:
        pass
    return int(min(cap * 3 // 4, 112 * 1024 * 1024))


def decoder_layer(x, memory, src_len, params, n_heads, tq=None):
    """x:(B,T,D) memory:(B,S,D) src_len:(B,) int32 valid source lengths."""
    B, T, D = x.shape
    S = memory.shape[1]
    F = params["w1"].shape[1]
    assert D % n_heads == 0
    d_k = D // n_heads
    if tq is None:
        tq = T if T <= 128 else 128
    assert T % tq == 0, "target length must be a multiple of the query tile"
    n_qt = T // tq

    ops = pack_params(params)
    op_args = [ops[name] for name in OP_NAMES]

    in_specs = [
        # f32 query tile: residual stream / query rows (residual precision
        # kept f32 even though the K/V-side activations below are bf16).
        pl.BlockSpec((1, tq, D), lambda b, q, sl: (b, q, 0)),
        # bf16 full target rows / encoder memory: only consumed by the
        # once-per-batch K/V projections (bf16 halves VMEM + DMA bytes).
        pl.BlockSpec((1, T, D), lambda b, q, sl: (b, 0, 0)),
        pl.BlockSpec((1, S, D), lambda b, q, sl: (b, 0, 0)),
    ] + [_const_spec(a.shape) for a in op_args]                 # resident weights
    out_spec = pl.BlockSpec((1, tq, D), lambda b, q, sl: (b, q, 0))

    scratch_shapes = [
        pltpu.VMEM((n_heads, T, d_k), jnp.bfloat16),   # self-attn K heads
        pltpu.VMEM((n_heads, T, d_k), jnp.bfloat16),   # self-attn V heads
        pltpu.VMEM((n_heads, S, d_k), jnp.bfloat16),   # cross-attn K heads
        pltpu.VMEM((n_heads, S, d_k), jnp.bfloat16),   # cross-attn V heads
    ]

    # Advisory cost hint so XLA can schedule around this fused custom call.
    flops = B * ((8 * T * D * D + 4 * T * T * D)
                 + (4 * T * D * D + 4 * S * D * D + 4 * T * S * D)
                 + 4 * T * D * F)
    transcendentals = B * n_heads * (T * T + T * S)
    bytes_accessed = (4 * 2 * B * T * D                 # f32 query tiles + output
                      + 2 * (B * T * D + B * S * D)     # bf16 K/V-side activations
                      + 2 * (8 * D * D + 2 * D * F)     # bf16 matmul weights
                      + 4 * (14 * D + 2 * F))           # f32 biases / LN params

    return pl.pallas_call(
        functools.partial(decoder_layer_kernel, n_heads),
        out_shape=jax.ShapeDtypeStruct((B, T, D), jnp.float32),
        grid_spec=pltpu.PrefetchScalarGridSpec(
            num_scalar_prefetch=1,                 # src_len lands in SMEM
            grid=(B, n_qt),
            in_specs=in_specs,
            out_specs=out_spec,
            scratch_shapes=scratch_shapes,
        ),
        compiler_params=pltpu.CompilerParams(
            # B stays "parallel" (megacore / v7x second TC); qt must be
            # "arbitrary" because the K/V scratch is carried across tiles.
            # TODO(synk): for B == 1, split qt into an outer-parallel /
            # inner-arbitrary pair so a second TensorCore still gets work.
            dimension_semantics=("parallel", "arbitrary"),
            vmem_limit_bytes=_vmem_limit_bytes(),
        ),
        cost_estimate=pl.CostEstimate(flops=int(flops),
                                      transcendentals=int(transcendentals),
                                      bytes_accessed=int(bytes_accessed)),
    )(src_len.astype(jnp.int32),
      x.astype(jnp.float32),
      x.astype(jnp.bfloat16),
      memory.astype(jnp.bfloat16),
      *op_args)


def decoder_layer_ref(x, memory, src_len, params, n_heads):
    """Pure-JAX reference replicating the kernel's mixed bf16/f32 math
    (exact reciprocal instead of the kernel's approx EUP reciprocal)."""
    ops = pack_params(params)
    B, T, _ = x.shape
    S = memory.shape[1]
    xfull = x.astype(jnp.bfloat16)
    mem = memory.astype(jnp.bfloat16)
    row = jnp.arange(T)[:, None]
    col = jnp.arange(T)[None, :]
    causal_bias = jnp.where(row >= col, 0.0, NEG_INF).astype(jnp.float32)
    recip = lambda d: 1.0 / d
    outs = []
    for b in range(B):
        scol = jnp.arange(S)[None, :]
        src_bias = jnp.where(scol < src_len[b], 0.0, NEG_INF).astype(jnp.float32)
        h_kv = _layer_norm(xfull[b].astype(jnp.float32),
                           ops["ln_a"][0:1], ops["ln_b"][0:1], EPS)
        ks, vs = _project_kv(h_kv, ops["wkv_s"], ops["bkv_s"], n_heads)
        kx, vx = _project_kv(mem[b], ops["wkv_x"], ops["bkv_x"], n_heads)
        outs.append(_decoder_tile_math(x[b], ks, vs, kx, vx,
                                       causal_bias, src_bias, ops, n_heads, recip))
    return jnp.stack(outs)


def decoder_layer_ref_f32(x, memory, src_len, params, n_heads):
    """Full-f32 reference mirroring the PyTorch module exactly (dense masks,
    unfused projections, masked_fill) — validates module semantics."""
    B, T, D = x.shape
    S = memory.shape[1]
    d_k = D // n_heads
    tgt_mask = jnp.tril(jnp.ones((T, T), jnp.float32))

    def ln(v, a, bb):
        mean = v.mean(-1, keepdims=True)
        var = jnp.sum((v - mean) ** 2, -1, keepdims=True) / (D - 1)
        return a * (v - mean) / (jnp.sqrt(var) + EPS) + bb

    def attn(q_in, kv_in, mask, W, Bv):
        q = q_in @ W[0] + Bv[0]
        k = kv_in @ W[1] + Bv[1]
        v = kv_in @ W[2] + Bv[2]
        heads = []
        for h in range(n_heads):
            lo, hi = h * d_k, (h + 1) * d_k
            s = (q[:, lo:hi] @ k[:, lo:hi].T) / math.sqrt(d_k)
            s = jnp.where(mask > 0, s, NEG_INF)
            heads.append(jax.nn.softmax(s, axis=-1) @ v[:, lo:hi])
        return jnp.concatenate(heads, axis=-1) @ W[3] + Bv[3]

    outs = []
    for b in range(B):
        src_mask = (jnp.arange(S) < src_len[b]).astype(jnp.float32)[None, :]
        xb, mb = x[b], memory[b]
        h0 = ln(xb, params["ln_a"][0], params["ln_b"][0])
        x1 = xb + attn(h0, h0, tgt_mask, params["w_self"], params["b_self"])
        h1 = ln(x1, params["ln_a"][1], params["ln_b"][1])
        x2 = x1 + attn(h1, mb, src_mask, params["w_src"], params["b_src"])
        h2 = ln(x2, params["ln_a"][2], params["ln_b"][2])
        ff = jnp.maximum(h2 @ params["w1"] + params["b1"], 0.0) @ params["w2"] + params["b2"]
        outs.append(x2 + ff)
    return jnp.stack(outs)


if __name__ == "__main__":
    # d_model=256 with 2 heads -> d_k=128: lane-dense head slices and output
    # stores.  T=16 with tq=8 exercises the per-batch K/V scratch reuse
    # across two query-tile steps of the inner "arbitrary" grid axis.
    B, T, S, D, H, F = 2, 16, 8, 256, 2, 512

    key = jax.random.PRNGKey(0)
    ks = jax.random.split(key, 10)

    x = jax.random.normal(ks[0], (B, T, D), jnp.float32)
    memory = jax.random.normal(ks[1], (B, S, D), jnp.float32)
    # tgt_mask is causal (generated in-kernel); src_mask comes from valid
    # source lengths: batch 1 has its last 2 source positions masked out.
    src_len = jnp.array([S, S - 2], jnp.int32)

    w_scale = 1.0 / math.sqrt(D)
    params = {
        # LayerNorm params initialized as in the module (ones / zeros).
        "ln_a": jnp.ones((3, D), jnp.float32),
        "ln_b": jnp.zeros((3, D), jnp.float32),
        # Attention / FFN weights: deterministic synthetic init (no checkpoint).
        "w_self": jax.random.normal(ks[2], (4, D, D), jnp.float32) * w_scale,
        "b_self": jax.random.normal(ks[3], (4, D), jnp.float32) * 0.02,
        "w_src":  jax.random.normal(ks[4], (4, D, D), jnp.float32) * w_scale,
        "b_src":  jax.random.normal(ks[5], (4, D), jnp.float32) * 0.02,
        "w1": jax.random.normal(ks[6], (D, F), jnp.float32) * w_scale,
        "b1": jax.random.normal(ks[7], (1, F), jnp.float32) * 0.02,
        "w2": jax.random.normal(ks[8], (F, D), jnp.float32) * (1.0 / math.sqrt(F)),
        "b2": jax.random.normal(ks[9], (1, D), jnp.float32) * 0.02,
    }

    out = decoder_layer(x, memory, src_len, params, H, tq=8)
    out = jax.block_until_ready(out)
    assert out.shape == (B, T, D)

    # 1) Same mixed-precision math, pure JAX: tight tolerance (the only
    #    algorithmic difference is approx vs exact softmax reciprocal).
    ref = decoder_layer_ref(x, memory, src_len, params, H)
    err = float(jnp.max(jnp.abs(out - ref)))
    assert jnp.allclose(out, ref, atol=2e-2, rtol=2e-2), f"bf16-ref max abs err = {err}"

    # 2) Full-f32 module-exact reference: loose tolerance absorbs bf16
    #    rounding (inputs, weights) and the approx reciprocal.
    ref32 = decoder_layer_ref_f32(x, memory, src_len, params, H)
    err32 = float(jnp.max(jnp.abs(out - ref32)))
    assert jnp.allclose(out, ref32, atol=2e-1, rtol=2e-1), f"f32-ref max abs err = {err32}"

    print("KERNEL_OK")
</pallas_src>

<mosaic_0001>
module attributes {stable_mosaic.version = 11 : i64} {
  func.func @decoder_layer_kernel(%arg0: i32, %arg1: i32, %arg2: memref<2xi32, #tpu.memory_space<smem>>, %arg3: memref<1x8x256xf32, #tpu.memory_space<vmem>>, %arg4: memref<1x16x256xbf16, #tpu.memory_space<vmem>>, %arg5: memref<1x8x256xbf16, #tpu.memory_space<vmem>>, %arg6: memref<3x256xf32, #tpu.memory_space<vmem>>, %arg7: memref<3x256xf32, #tpu.memory_space<vmem>>, %arg8: memref<256x256xbf16, #tpu.memory_space<vmem>>, %arg9: memref<1x256xf32, #tpu.memory_space<vmem>>, %arg10: memref<256x512xbf16, #tpu.memory_space<vmem>>, %arg11: memref<1x512xf32, #tpu.memory_space<vmem>>, %arg12: memref<256x256xbf16, #tpu.memory_space<vmem>>, %arg13: memref<1x256xf32, #tpu.memory_space<vmem>>, %arg14: memref<256x256xbf16, #tpu.memory_space<vmem>>, %arg15: memref<1x256xf32, #tpu.memory_space<vmem>>, %arg16: memref<256x512xbf16, #tpu.memory_space<vmem>>, %arg17: memref<1x512xf32, #tpu.memory_space<vmem>>, %arg18: memref<256x256xbf16, #tpu.memory_space<vmem>>, %arg19: memref<1x256xf32, #tpu.memory_space<vmem>>, %arg20: memref<256x512xbf16, #tpu.memory_space<vmem>>, %arg21: memref<1x512xf32, #tpu.memory_space<vmem>>, %arg22: memref<512x256xbf16, #tpu.memory_space<vmem>>, %arg23: memref<1x256xf32, #tpu.memory_space<vmem>>, %arg24: memref<1x8x256xf32, #tpu.memory_space<vmem>>, %arg25: memref<2x16x128xbf16, #tpu.memory_space<vmem>>, %arg26: memref<2x16x128xbf16, #tpu.memory_space<vmem>>, %arg27: memref<2x8x128xbf16, #tpu.memory_space<vmem>>, %arg28: memref<2x8x128xbf16, #tpu.memory_space<vmem>>) attributes {dimension_semantics = [#tpu.dimension_semantics<parallel>, #tpu.dimension_semantics<arbitrary>], iteration_bounds = array<i64: 2, 2>, scalar_prefetch = 1 : i64, scratch_operands = 4 : i64, tpu.core_type = #tpu.core_type<tc>, window_params = [{transform_indices = @transform_0, window_bounds = array<i64: 1, 8, 256>}, {transform_indices = @transform_1, window_bounds = array<i64: 1, 16, 256>}, {transform_indices = @transform_2, window_bounds = array<i64: 1, 8, 256>}, {pipeline_mode = #tpu.pipeline_mode<synchronous>, transform_indices = @transform_3, window_bounds = array<i64: 3, 256>}, {pipeline_mode = #tpu.pipeline_mode<synchronous>, transform_indices = @transform_4, window_bounds = array<i64: 3, 256>}, {pipeline_mode = #tpu.pipeline_mode<synchronous>, transform_indices = @transform_5, window_bounds = array<i64: 256, 256>}, {pipeline_mode = #tpu.pipeline_mode<synchronous>, transform_indices = @transform_6, window_bounds = array<i64: 1, 256>}, {pipeline_mode = #tpu.pipeline_mode<synchronous>, transform_indices = @transform_7, window_bounds = array<i64: 256, 512>}, {pipeline_mode = #tpu.pipeline_mode<synchronous>, transform_indices = @transform_8, window_bounds = array<i64: 1, 512>}, {pipeline_mode = #tpu.pipeline_mode<synchronous>, transform_indices = @transform_9, window_bounds = array<i64: 256, 256>}, {pipeline_mode = #tpu.pipeline_mode<synchronous>, transform_indices = @transform_10, window_bounds = array<i64: 1, 256>}, {pipeline_mode = #tpu.pipeline_mode<synchronous>, transform_indices = @transform_11, window_bounds = array<i64: 256, 256>}, {pipeline_mode = #tpu.pipeline_mode<synchronous>, transform_indices = @transform_12, window_bounds = array<i64: 1, 256>}, {pipeline_mode = #tpu.pipeline_mode<synchronous>, transform_indices = @transform_13, window_bounds = array<i64: 256, 512>}, {pipeline_mode = #tpu.pipeline_mode<synchronous>, transform_indices = @transform_14, window_bounds = array<i64: 1, 512>}, {pipeline_mode = #tpu.pipeline_mode<synchronous>, transform_indices = @transform_15, window_bounds = array<i64: 256, 256>}, {pipeline_mode = #tpu.pipeline_mode<synchronous>, transform_indices = @transform_16, window_bounds = array<i64: 1, 256>}, {pipeline_mode = #tpu.pipeline_mode<synchronous>, transform_indices = @transform_17, window_bounds = array<i64: 256, 512>}, {pipeline_mode = #tpu.pipeline_mode<synchronous>, transform_indices = @transform_18, window_bounds = array<i64: 1, 512>}, {pipeline_mode = #tpu.pipeline_mode<synchronous>, transform_indices = @transform_19, window_bounds = array<i64: 512, 256>}, {pipeline_mode = #tpu.pipeline_mode<synchronous>, transform_indices = @transform_20, window_bounds = array<i64: 1, 256>}, {transform_indices = @transform_21, window_bounds = array<i64: 1, 8, 256>}]} {
    %c0_i32 = arith.constant 0 : i32
    %0 = arith.cmpi eq, %arg1, %c0_i32 : i32
    %1 = arith.extui %0 : i1 to i32
    %c0_i32_0 = arith.constant 0 : i32
    %2 = arith.cmpi ne, %1, %c0_i32_0 : i32
    scf.if %2 {
      %c0_81 = arith.constant 0 : index
      %c0_82 = arith.constant 0 : index
      %c0_83 = arith.constant 0 : index
      %202 = vector.load %arg4[%c0_81, %c0_82, %c0_83] : memref<1x16x256xbf16, #tpu.memory_space<vmem>>, vector<1x16x256xbf16>
      %203 = vector.shape_cast %202 : vector<1x16x256xbf16> to vector<16x256xbf16>
      %204 = arith.extf %203 : vector<16x256xbf16> to vector<16x256xf32>
      %c0_84 = arith.constant 0 : index
      %c0_85 = arith.constant 0 : index
      %205 = vector.load %arg6[%c0_84, %c0_85] : memref<3x256xf32, #tpu.memory_space<vmem>>, vector<1x256xf32>
      %c0_86 = arith.constant 0 : index
      %c0_87 = arith.constant 0 : index
      %206 = vector.load %arg7[%c0_86, %c0_87] : memref<3x256xf32, #tpu.memory_space<vmem>>, vector<1x256xf32>
      %cst_88 = arith.constant dense<0.000000e+00> : vector<16xf32>
      %207 = vector.multi_reduction <add>, %204, %cst_88 [1] : vector<16x256xf32> to vector<16xf32>
      %208 = vector.shape_cast %207 : vector<16xf32> to vector<16x1xf32>
      %cst_89 = arith.constant 2.560000e+02 : f32
      %209 = vector.broadcast %cst_89 : f32 to vector<16x1xf32>
      %210 = arith.divf %208, %209 : vector<16x1xf32>
      %211 = vector.broadcast %210 : vector<16x1xf32> to vector<16x256xf32>
      %212 = arith.subf %204, %211 : vector<16x256xf32>
      %213 = arith.mulf %212, %212 : vector<16x256xf32>
      %cst_90 = arith.constant dense<0.000000e+00> : vector<16xf32>
      %214 = vector.multi_reduction <add>, %213, %cst_90 [1] : vector<16x256xf32> to vector<16xf32>
      %215 = vector.shape_cast %214 : vector<16xf32> to vector<16x1xf32>
      %cst_91 = arith.constant 2.550000e+02 : f32
      %216 = vector.broadcast %cst_91 : f32 to vector<16x1xf32>
      %217 = arith.divf %215, %216 : vector<16x1xf32>
      %218 = math.sqrt %217 : vector<16x1xf32>
      %219 = vector.broadcast %210 : vector<16x1xf32> to vector<16x256xf32>
      %220 = arith.subf %204, %219 : vector<16x256xf32>
      %221 = vector.broadcast %205 : vector<1x256xf32> to vector<16x256xf32>
      %222 = arith.mulf %221, %220 : vector<16x256xf32>
      %cst_92 = arith.constant 9.99999997E-7 : f32
      %223 = vector.broadcast %cst_92 : f32 to vector<16x1xf32>
      %224 = arith.addf %218, %223 : vector<16x1xf32>
      %225 = vector.broadcast %224 : vector<16x1xf32> to vector<16x256xf32>
      %226 = arith.divf %222, %225 : vector<16x256xf32>
      %227 = vector.broadcast %206 : vector<1x256xf32> to vector<16x256xf32>
      %228 = arith.addf %226, %227 : vector<16x256xf32>
      %c0_93 = arith.constant 0 : index
      %c0_94 = arith.constant 0 : index
      %229 = vector.load %arg10[%c0_93, %c0_94] : memref<256x512xbf16, #tpu.memory_space<vmem>>, vector<256x512xbf16>
      %c0_95 = arith.constant 0 : index
      %c0_96 = arith.constant 0 : index
      %230 = vector.load %arg11[%c0_95, %c0_96] : memref<1x512xf32, #tpu.memory_space<vmem>>, vector<1x512xf32>
      %231 = arith.truncf %228 : vector<16x256xf32> to vector<16x256xbf16>
      %cst_97 = arith.constant dense<0.000000e+00> : vector<16x512xf32>
      %232 = tpu.matmul %231, %229, %cst_97 {dimension_numbers = #tpu.dot_dimension_numbers<[1], [0], [0], [1], [0, 0, 1, 1], [], []>} : vector<16x256xbf16>, vector<256x512xbf16>, vector<16x512xf32> -> vector<16x512xf32>
      %233 = vector.broadcast %230 : vector<1x512xf32> to vector<16x512xf32>
      %234 = arith.addf %232, %233 : vector<16x512xf32>
      %235 = vector.extract_strided_slice %234 {offsets = [0, 0], sizes = [16, 128], strides = [1, 1]} : vector<16x512xf32> to vector<16x128xf32>
      %236 = vector.extract_strided_slice %234 {offsets = [0, 128], sizes = [16, 128], strides = [1, 1]} : vector<16x512xf32> to vector<16x128xf32>
      %237 = vector.shape_cast %235 : vector<16x128xf32> to vector<1x16x128xf32>
      %238 = vector.shape_cast %236 : vector<16x128xf32> to vector<1x16x128xf32>
      %239 = tpu.concatenate %237, %238 in 0 : vector<1x16x128xf32>, vector<1x16x128xf32> -> vector<2x16x128xf32>
      %240 = arith.truncf %239 : vector<2x16x128xf32> to vector<2x16x128xbf16>
      %241 = vector.extract_strided_slice %234 {offsets = [0, 256], sizes = [16, 128], strides = [1, 1]} : vector<16x512xf32> to vector<16x128xf32>
      %242 = vector.extract_strided_slice %234 {offsets = [0, 384], sizes = [16, 128], strides = [1, 1]} : vector<16x512xf32> to vector<16x128xf32>
      %243 = vector.shape_cast %241 : vector<16x128xf32> to vector<1x16x128xf32>
      %244 = vector.shape_cast %242 : vector<16x128xf32> to vector<1x16x128xf32>
      %245 = tpu.concatenate %243, %244 in 0 : vector<1x16x128xf32>, vector<1x16x128xf32> -> vector<2x16x128xf32>
      %246 = arith.truncf %245 : vector<2x16x128xf32> to vector<2x16x128xbf16>
      %c0_98 = arith.constant 0 : index
      %c0_99 = arith.constant 0 : index
      %c0_100 = arith.constant 0 : index
      %247 = vector.load %arg25[%c0_98, %c0_99, %c0_100] : memref<2x16x128xbf16, #tpu.memory_space<vmem>>, vector<2x16x128xbf16>
      tpu.vector_store %arg25[%c0_98, %c0_99, %c0_100], %240 {strides = array<i32>} : memref<2x16x128xbf16, #tpu.memory_space<vmem>>, vector<2x16x128xbf16>,
      %c0_101 = arith.constant 0 : index
      %c0_102 = arith.constant 0 : index
      %c0_103 = arith.constant 0 : index
      %248 = vector.load %arg26[%c0_101, %c0_102, %c0_103] : memref<2x16x128xbf16, #tpu.memory_space<vmem>>, vector<2x16x128xbf16>
      tpu.vector_store %arg26[%c0_101, %c0_102, %c0_103], %246 {strides = array<i32>} : memref<2x16x128xbf16, #tpu.memory_space<vmem>>, vector<2x16x128xbf16>,
      %c0_104 = arith.constant 0 : index
      %c0_105 = arith.constant 0 : index
      %c0_106 = arith.constant 0 : index
      %249 = vector.load %arg5[%c0_104, %c0_105, %c0_106] : memref<1x8x256xbf16, #tpu.memory_space<vmem>>, vector<1x8x256xbf16>
      %250 = vector.shape_cast %249 : vector<1x8x256xbf16> to vector<8x256xbf16>
      %c0_107 = arith.constant 0 : index
      %c0_108 = arith.constant 0 : index
      %251 = vector.load %arg16[%c0_107, %c0_108] : memref<256x512xbf16, #tpu.memory_space<vmem>>, vector<256x512xbf16>
      %c0_109 = arith.constant 0 : index
      %c0_110 = arith.constant 0 : index
      %252 = vector.load %arg17[%c0_109, %c0_110] : memref<1x512xf32, #tpu.memory_space<vmem>>, vector<1x512xf32>
      %cst_111 = arith.constant dense<0.000000e+00> : vector<8x512xf32>
      %253 = tpu.matmul %250, %251, %cst_111 {dimension_numbers = #tpu.dot_dimension_numbers<[1], [0], [0], [1], [0, 0, 1, 1], [], []>} : vector<8x256xbf16>, vector<256x512xbf16>, vector<8x512xf32> -> vector<8x512xf32>
      %254 = vector.broadcast %252 : vector<1x512xf32> to vector<8x512xf32>
      %255 = arith.addf %253, %254 : vector<8x512xf32>
      %256 = vector.extract_strided_slice %255 {offsets = [0, 0], sizes = [8, 128], strides = [1, 1]} : vector<8x512xf32> to vector<8x128xf32>
      %257 = vector.extract_strided_slice %255 {offsets = [0, 128], sizes = [8, 128], strides = [1, 1]} : vector<8x512xf32> to vector<8x128xf32>
      %258 = vector.shape_cast %256 : vector<8x128xf32> to vector<1x8x128xf32>
      %259 = vector.shape_cast %257 : vector<8x128xf32> to vector<1x8x128xf32>
      %260 = tpu.concatenate %258, %259 in 0 : vector<1x8x128xf32>, vector<1x8x128xf32> -> vector<2x8x128xf32>
      %261 = arith.truncf %260 : vector<2x8x128xf32> to vector<2x8x128xbf16>
      %262 = vector.extract_strided_slice %255 {offsets = [0, 256], sizes = [8, 128], strides = [1, 1]} : vector<8x512xf32> to vector<8x128xf32>
      %263 = vector.extract_strided_slice %255 {offsets = [0, 384], sizes = [8, 128], strides = [1, 1]} : vector<8x512xf32> to vector<8x128xf32>
      %264 = vector.shape_cast %262 : vector<8x128xf32> to vector<1x8x128xf32>
      %265 = vector.shape_cast %263 : vector<8x128xf32> to vector<1x8x128xf32>
      %266 = tpu.concatenate %264, %265 in 0 : vector<1x8x128xf32>, vector<1x8x128xf32> -> vector<2x8x128xf32>
      %267 = arith.truncf %266 : vector<2x8x128xf32> to vector<2x8x128xbf16>
      %c0_112 = arith.constant 0 : index
      %c0_113 = arith.constant 0 : index
      %c0_114 = arith.constant 0 : index
      %268 = vector.load %arg27[%c0_112, %c0_113, %c0_114] : memref<2x8x128xbf16, #tpu.memory_space<vmem>>, vector<2x8x128xbf16>
      tpu.vector_store %arg27[%c0_112, %c0_113, %c0_114], %261 {strides = array<i32>} : memref<2x8x128xbf16, #tpu.memory_space<vmem>>, vector<2x8x128xbf16>,
      %c0_115 = arith.constant 0 : index
      %c0_116 = arith.constant 0 : index
      %c0_117 = arith.constant 0 : index
      %269 = vector.load %arg28[%c0_115, %c0_116, %c0_117] : memref<2x8x128xbf16, #tpu.memory_space<vmem>>, vector<2x8x128xbf16>
      tpu.vector_store %arg28[%c0_115, %c0_116, %c0_117], %267 {strides = array<i32>} : memref<2x8x128xbf16, #tpu.memory_space<vmem>>, vector<2x8x128xbf16>,
    } else {
    }
    %c8_i32 = arith.constant 8 : i32
    %3 = arith.muli %arg1, %c8_i32 : i32
    %4 = tpu.iota {dimensions = array<i32: 0>} : vector<8x16xi32>
    %5 = vector.broadcast %3 : i32 to vector<8x16xi32>
    %6 = arith.addi %5, %4 : vector<8x16xi32>
    %7 = tpu.iota {dimensions = array<i32: 1>} : vector<8x16xi32>
    %8 = arith.cmpi sge, %6, %7 : vector<8x16xi32>
    %cst = arith.constant 0.000000e+00 : f32
    %cst_1 = arith.constant -1.000000e+09 : f32
    %9 = vector.broadcast %cst : f32 to vector<8x16xf32>
    %10 = vector.broadcast %cst_1 : f32 to vector<8x16xf32>
    %11 = arith.select %8, %9, %10 : vector<8x16xi1>, vector<8x16xf32>
    %12 = tpu.iota {dimensions = array<i32: 1>} : vector<1x8xi32>
    %13 = arith.index_cast %arg0 : i32 to index
    %14 = memref.load %arg2[%13] : memref<2xi32, #tpu.memory_space<smem>>
    %15 = vector.broadcast %14 : i32 to vector<1x8xi32>
    %16 = arith.cmpi slt, %12, %15 : vector<1x8xi32>
    %cst_2 = arith.constant 0.000000e+00 : f32
    %cst_3 = arith.constant -1.000000e+09 : f32
    %17 = vector.broadcast %cst_2 : f32 to vector<1x8xf32>
    %18 = vector.broadcast %cst_3 : f32 to vector<1x8xf32>
    %19 = arith.select %16, %17, %18 : vector<1x8xi1>, vector<1x8xf32>
    %c0 = arith.constant 0 : index
    %c0_4 = arith.constant 0 : index
    %20 = vector.load %arg6[%c0, %c0_4] : memref<3x256xf32, #tpu.memory_space<vmem>>, vector<3x256xf32>
    %c0_5 = arith.constant 0 : index
    %c0_6 = arith.constant 0 : index
    %21 = vector.load %arg7[%c0_5, %c0_6] : memref<3x256xf32, #tpu.memory_space<vmem>>, vector<3x256xf32>
    %c0_7 = arith.constant 0 : index
    %c0_8 = arith.constant 0 : index
    %22 = vector.load %arg8[%c0_7, %c0_8] : memref<256x256xbf16, #tpu.memory_space<vmem>>, vector<256x256xbf16>
    %c0_9 = arith.constant 0 : index
    %c0_10 = arith.constant 0 : index
    %23 = vector.load %arg9[%c0_9, %c0_10] : memref<1x256xf32, #tpu.memory_space<vmem>>, vector<1x256xf32>
    %c0_11 = arith.constant 0 : index
    %c0_12 = arith.constant 0 : index
    %24 = vector.load %arg12[%c0_11, %c0_12] : memref<256x256xbf16, #tpu.memory_space<vmem>>, vector<256x256xbf16>
    %c0_13 = arith.constant 0 : index
    %c0_14 = arith.constant 0 : index
    %25 = vector.load %arg13[%c0_13, %c0_14] : memref<1x256xf32, #tpu.memory_space<vmem>>, vector<1x256xf32>
    %c0_15 = arith.constant 0 : index
    %c0_16 = arith.constant 0 : index
    %26 = vector.load %arg14[%c0_15, %c0_16] : memref<256x256xbf16, #tpu.memory_space<vmem>>, vector<256x256xbf16>
    %c0_17 = arith.constant 0 : index
    %c0_18 = arith.constant 0 : index
    %27 = vector.load %arg15[%c0_17, %c0_18] : memref<1x256xf32, #tpu.memory_space<vmem>>, vector<1x256xf32>
    %c0_19 = arith.constant 0 : index
    %c0_20 = arith.constant 0 : index
    %28 = vector.load %arg18[%c0_19, %c0_20] : memref<256x256xbf16, #tpu.memory_space<vmem>>, vector<256x256xbf16>
    %c0_21 = arith.constant 0 : index
    %c0_22 = arith.constant 0 : index
    %29 = vector.load %arg19[%c0_21, %c0_22] : memref<1x256xf32, #tpu.memory_space<vmem>>, vector<1x256xf32>
    %c0_23 = arith.constant 0 : index
    %c0_24 = arith.constant 0 : index
    %30 = vector.load %arg20[%c0_23, %c0_24] : memref<256x512xbf16, #tpu.memory_space<vmem>>, vector<256x512xbf16>
    %c0_25 = arith.constant 0 : index
    %c0_26 = arith.constant 0 : index
    %31 = vector.load %arg21[%c0_25, %c0_26] : memref<1x512xf32, #tpu.memory_space<vmem>>, vector<1x512xf32>
    %c0_27 = arith.constant 0 : index
    %c0_28 = arith.constant 0 : index
    %32 = vector.load %arg22[%c0_27, %c0_28] : memref<512x256xbf16, #tpu.memory_space<vmem>>, vector<512x256xbf16>
    %c0_29 = arith.constant 0 : index
    %c0_30 = arith.constant 0 : index
    %33 = vector.load %arg23[%c0_29, %c0_30] : memref<1x256xf32, #tpu.memory_space<vmem>>, vector<1x256xf32>
    %c0_31 = arith.constant 0 : index
    %c0_32 = arith.constant 0 : index
    %c0_33 = arith.constant 0 : index
    %34 = vector.load %arg3[%c0_31, %c0_32, %c0_33] : memref<1x8x256xf32, #tpu.memory_space<vmem>>, vector<1x8x256xf32>
    %35 = vector.shape_cast %34 : vector<1x8x256xf32> to vector<8x256xf32>
    %c0_34 = arith.constant 0 : index
    %c0_35 = arith.constant 0 : index
    %c0_36 = arith.constant 0 : index
    %36 = vector.load %arg25[%c0_34, %c0_35, %c0_36] : memref<2x16x128xbf16, #tpu.memory_space<vmem>>, vector<2x16x128xbf16>
    %c0_37 = arith.constant 0 : index
    %c0_38 = arith.constant 0 : index
    %c0_39 = arith.constant 0 : index
    %37 = vector.load %arg26[%c0_37, %c0_38, %c0_39] : memref<2x16x128xbf16, #tpu.memory_space<vmem>>, vector<2x16x128xbf16>
    %c0_40 = arith.constant 0 : index
    %c0_41 = arith.constant 0 : index
    %c0_42 = arith.constant 0 : index
    %38 = vector.load %arg27[%c0_40, %c0_41, %c0_42] : memref<2x8x128xbf16, #tpu.memory_space<vmem>>, vector<2x8x128xbf16>
    %c0_43 = arith.constant 0 : index
    %c0_44 = arith.constant 0 : index
    %c0_45 = arith.constant 0 : index
    %39 = vector.load %arg28[%c0_43, %c0_44, %c0_45] : memref<2x8x128xbf16, #tpu.memory_space<vmem>>, vector<2x8x128xbf16>
    %40 = vector.extract_strided_slice %20 {offsets = [0, 0], sizes = [1, 256], strides = [1, 1]} : vector<3x256xf32> to vector<1x256xf32>
    %41 = vector.extract_strided_slice %21 {offsets = [0, 0], sizes = [1, 256], strides = [1, 1]} : vector<3x256xf32> to vector<1x256xf32>
    %cst_46 = arith.constant dense<0.000000e+00> : vector<8xf32>
    %42 = vector.multi_reduction <add>, %35, %cst_46 [1] : vector<8x256xf32> to vector<8xf32>
    %43 = vector.shape_cast %42 : vector<8xf32> to vector<8x1xf32>
    %cst_47 = arith.constant 2.560000e+02 : f32
    %44 = vector.broadcast %cst_47 : f32 to vector<8x1xf32>
    %45 = arith.divf %43, %44 : vector<8x1xf32>
    %46 = vector.broadcast %45 : vector<8x1xf32> to vector<8x256xf32>
    %47 = arith.subf %35, %46 : vector<8x256xf32>
    %48 = arith.mulf %47, %47 : vector<8x256xf32>
    %cst_48 = arith.constant dense<0.000000e+00> : vector<8xf32>
    %49 = vector.multi_reduction <add>, %48, %cst_48 [1] : vector<8x256xf32> to vector<8xf32>
    %50 = vector.shape_cast %49 : vector<8xf32> to vector<8x1xf32>
    %cst_49 = arith.constant 2.550000e+02 : f32
    %51 = vector.broadcast %cst_49 : f32 to vector<8x1xf32>
    %52 = arith.divf %50, %51 : vector<8x1xf32>
    %53 = math.sqrt %52 : vector<8x1xf32>
    %54 = vector.broadcast %45 : vector<8x1xf32> to vector<8x256xf32>
    %55 = arith.subf %35, %54 : vector<8x256xf32>
    %56 = vector.broadcast %40 : vector<1x256xf32> to vector<8x256xf32>
    %57 = arith.mulf %56, %55 : vector<8x256xf32>
    %cst_50 = arith.constant 9.99999997E-7 : f32
    %58 = vector.broadcast %cst_50 : f32 to vector<8x1xf32>
    %59 = arith.addf %53, %58 : vector<8x1xf32>
    %60 = vector.broadcast %59 : vector<8x1xf32> to vector<8x256xf32>
    %61 = arith.divf %57, %60 : vector<8x256xf32>
    %62 = vector.broadcast %41 : vector<1x256xf32> to vector<8x256xf32>
    %63 = arith.addf %61, %62 : vector<8x256xf32>
    %64 = arith.truncf %63 : vector<8x256xf32> to vector<8x256xbf16>
    %cst_51 = arith.constant dense<0.000000e+00> : vector<8x256xf32>
    %65 = tpu.matmul %64, %22, %cst_51 {dimension_numbers = #tpu.dot_dimension_numbers<[1], [0], [0], [1], [0, 0, 1, 1], [], []>} : vector<8x256xbf16>, vector<256x256xbf16>, vector<8x256xf32> -> vector<8x256xf32>
    %66 = vector.broadcast %23 : vector<1x256xf32> to vector<8x256xf32>
    %67 = arith.addf %65, %66 : vector<8x256xf32>
    %cst_52 = arith.constant 0.0883883461 : f32
    %68 = vector.broadcast %cst_52 : f32 to vector<8x256xf32>
    %69 = arith.mulf %67, %68 : vector<8x256xf32>
    %70 = arith.truncf %69 : vector<8x256xf32> to vector<8x256xbf16>
    %71 = vector.extract_strided_slice %70 {offsets = [0, 0], sizes = [8, 128], strides = [1, 1]} : vector<8x256xbf16> to vector<8x128xbf16>
    %72 = vector.extract_strided_slice %70 {offsets = [0, 128], sizes = [8, 128], strides = [1, 1]} : vector<8x256xbf16> to vector<8x128xbf16>
    %73 = vector.shape_cast %71 : vector<8x128xbf16> to vector<1x8x128xbf16>
    %74 = vector.shape_cast %72 : vector<8x128xbf16> to vector<1x8x128xbf16>
    %75 = tpu.concatenate %73, %74 in 0 : vector<1x8x128xbf16>, vector<1x8x128xbf16> -> vector<2x8x128xbf16>
    %cst_53 = arith.constant dense<0.000000e+00> : vector<2x8x16xf32>
    %76 = tpu.matmul %75, %36, %cst_53 {dimension_numbers = #tpu.dot_dimension_numbers<[2], [2], [1], [1], [0, 0, 0, 1, 1, 1], [0], [0]>} : vector<2x8x128xbf16>, vector<2x16x128xbf16>, vector<2x8x16xf32> -> vector<2x8x16xf32>
    %77 = vector.shape_cast %11 : vector<8x16xf32> to vector<1x8x16xf32>
    %78 = vector.broadcast %77 : vector<1x8x16xf32> to vector<2x8x16xf32>
    %79 = arith.addf %76, %78 : vector<2x8x16xf32>
    %cst_54 = arith.constant dense<0xFF800000> : vector<2x8xf32>
    %80 = vector.multi_reduction <maximumf>, %79, %cst_54 [2] : vector<2x8x16xf32> to vector<2x8xf32>
    %81 = vector.shape_cast %80 : vector<2x8xf32> to vector<2x8x1xf32>
    %82 = vector.broadcast %81 : vector<2x8x1xf32> to vector<2x8x16xf32>
    %83 = arith.subf %79, %82 : vector<2x8x16xf32>
    %84 = math.exp %83 : vector<2x8x16xf32>
    %cst_55 = arith.constant dense<0.000000e+00> : vector<2x8xf32>
    %85 = vector.multi_reduction <add>, %84, %cst_55 [2] : vector<2x8x16xf32> to vector<2x8xf32>
    %86 = vector.shape_cast %85 : vector<2x8xf32> to vector<2x8x1xf32>
    %87 = arith.truncf %84 : vector<2x8x16xf32> to vector<2x8x16xbf16>
    %cst_56 = arith.constant dense<0.000000e+00> : vector<2x8x128xf32>
    %88 = tpu.matmul %87, %37, %cst_56 {dimension_numbers = #tpu.dot_dimension_numbers<[2], [1], [1], [2], [0, 0, 0, 1, 1, 2], [0], [0]>} : vector<2x8x16xbf16>, vector<2x16x128xbf16>, vector<2x8x128xf32> -> vector<2x8x128xf32>
    %89 = tpu.reciprocal %86 {approx = true} : vector<2x8x1xf32> -> vector<2x8x1xf32>
    %90 = vector.broadcast %89 : vector<2x8x1xf32> to vector<2x8x128xf32>
    %91 = arith.mulf %88, %90 : vector<2x8x128xf32>
    %92 = vector.extract_strided_slice %91 {offsets = [0, 0, 0], sizes = [1, 8, 128], strides = [1, 1, 1]} : vector<2x8x128xf32> to vector<1x8x128xf32>
    %93 = vector.shape_cast %92 : vector<1x8x128xf32> to vector<8x128xf32>
    %94 = vector.extract_strided_slice %91 {offsets = [1, 0, 0], sizes = [1, 8, 128], strides = [1, 1, 1]} : vector<2x8x128xf32> to vector<1x8x128xf32>
    %95 = vector.shape_cast %94 : vector<1x8x128xf32> to vector<8x128xf32>
    %96 = tpu.concatenate %93, %95 in 1 : vector<8x128xf32>, vector<8x128xf32> -> vector<8x256xf32>
    %97 = arith.truncf %96 : vector<8x256xf32> to vector<8x256xbf16>
    %cst_57 = arith.constant dense<0.000000e+00> : vector<8x256xf32>
    %98 = tpu.matmul %97, %24, %cst_57 {dimension_numbers = #tpu.dot_dimension_numbers<[1], [0], [0], [1], [0, 0, 1, 1], [], []>} : vector<8x256xbf16>, vector<256x256xbf16>, vector<8x256xf32> -> vector<8x256xf32>
    %99 = vector.broadcast %25 : vector<1x256xf32> to vector<8x256xf32>
    %100 = arith.addf %98, %99 : vector<8x256xf32>
    %101 = arith.addf %35, %100 : vector<8x256xf32>
    %102 = vector.extract_strided_slice %20 {offsets = [1, 0], sizes = [1, 256], strides = [1, 1]} : vector<3x256xf32> to vector<1x256xf32>
    %103 = vector.extract_strided_slice %21 {offsets = [1, 0], sizes = [1, 256], strides = [1, 1]} : vector<3x256xf32> to vector<1x256xf32>
    %cst_58 = arith.constant dense<0.000000e+00> : vector<8xf32>
    %104 = vector.multi_reduction <add>, %101, %cst_58 [1] : vector<8x256xf32> to vector<8xf32>
    %105 = vector.shape_cast %104 : vector<8xf32> to vector<8x1xf32>
    %cst_59 = arith.constant 2.560000e+02 : f32
    %106 = vector.broadcast %cst_59 : f32 to vector<8x1xf32>
    %107 = arith.divf %105, %106 : vector<8x1xf32>
    %108 = vector.broadcast %107 : vector<8x1xf32> to vector<8x256xf32>
    %109 = arith.subf %101, %108 : vector<8x256xf32>
    %110 = arith.mulf %109, %109 : vector<8x256xf32>
    %cst_60 = arith.constant dense<0.000000e+00> : vector<8xf32>
    %111 = vector.multi_reduction <add>, %110, %cst_60 [1] : vector<8x256xf32> to vector<8xf32>
    %112 = vector.shape_cast %111 : vector<8xf32> to vector<8x1xf32>
    %cst_61 = arith.constant 2.550000e+02 : f32
    %113 = vector.broadcast %cst_61 : f32 to vector<8x1xf32>
    %114 = arith.divf %112, %113 : vector<8x1xf32>
    %115 = math.sqrt %114 : vector<8x1xf32>
    %116 = vector.broadcast %107 : vector<8x1xf32> to vector<8x256xf32>
    %117 = arith.subf %101, %116 : vector<8x256xf32>
    %118 = vector.broadcast %102 : vector<1x256xf32> to vector<8x256xf32>
    %119 = arith.mulf %118, %117 : vector<8x256xf32>
    %cst_62 = arith.constant 9.99999997E-7 : f32
    %120 = vector.broadcast %cst_62 : f32 to vector<8x1xf32>
    %121 = arith.addf %115, %120 : vector<8x1xf32>
    %122 = vector.broadcast %121 : vector<8x1xf32> to vector<8x256xf32>
    %123 = arith.divf %119, %122 : vector<8x256xf32>
    %124 = vector.broadcast %103 : vector<1x256xf32> to vector<8x256xf32>
    %125 = arith.addf %123, %124 : vector<8x256xf32>
    %126 = arith.truncf %125 : vector<8x256xf32> to vector<8x256xbf16>
    %cst_63 = arith.constant dense<0.000000e+00> : vector<8x256xf32>
    %127 = tpu.matmul %126, %26, %cst_63 {dimension_numbers = #tpu.dot_dimension_numbers<[1], [0], [0], [1], [0, 0, 1, 1], [], []>} : vector<8x256xbf16>, vector<256x256xbf16>, vector<8x256xf32> -> vector<8x256xf32>
    %128 = vector.broadcast %27 : vector<1x256xf32> to vector<8x256xf32>
    %129 = arith.addf %127, %128 : vector<8x256xf32>
    %cst_64 = arith.constant 0.0883883461 : f32
    %130 = vector.broadcast %cst_64 : f32 to vector<8x256xf32>
    %131 = arith.mulf %129, %130 : vector<8x256xf32>
    %132 = arith.truncf %131 : vector<8x256xf32> to vector<8x256xbf16>
    %133 = vector.extract_strided_slice %132 {offsets = [0, 0], sizes = [8, 128], strides = [1, 1]} : vector<8x256xbf16> to vector<8x128xbf16>
    %134 = vector.extract_strided_slice %132 {offsets = [0, 128], sizes = [8, 128], strides = [1, 1]} : vector<8x256xbf16> to vector<8x128xbf16>
    %135 = vector.shape_cast %133 : vector<8x128xbf16> to vector<1x8x128xbf16>
    %136 = vector.shape_cast %134 : vector<8x128xbf16> to vector<1x8x128xbf16>
    %137 = tpu.concatenate %135, %136 in 0 : vector<1x8x128xbf16>, vector<1x8x128xbf16> -> vector<2x8x128xbf16>
    %cst_65 = arith.constant dense<0.000000e+00> : vector<2x8x8xf32>
    %138 = tpu.matmul %137, %38, %cst_65 {dimension_numbers = #tpu.dot_dimension_numbers<[2], [2], [1], [1], [0, 0, 0, 1, 1, 1], [0], [0]>} : vector<2x8x128xbf16>, vector<2x8x128xbf16>, vector<2x8x8xf32> -> vector<2x8x8xf32>
    %139 = vector.shape_cast %19 : vector<1x8xf32> to vector<1x1x8xf32>
    %140 = vector.broadcast %139 : vector<1x1x8xf32> to vector<2x8x8xf32>
    %141 = arith.addf %138, %140 : vector<2x8x8xf32>
    %cst_66 = arith.constant dense<0xFF800000> : vector<2x8xf32>
    %142 = vector.multi_reduction <maximumf>, %141, %cst_66 [2] : vector<2x8x8xf32> to vector<2x8xf32>
    %143 = vector.shape_cast %142 : vector<2x8xf32> to vector<2x8x1xf32>
    %144 = vector.broadcast %143 : vector<2x8x1xf32> to vector<2x8x8xf32>
    %145 = arith.subf %141, %144 : vector<2x8x8xf32>
    %146 = math.exp %145 : vector<2x8x8xf32>
    %cst_67 = arith.constant dense<0.000000e+00> : vector<2x8xf32>
    %147 = vector.multi_reduction <add>, %146, %cst_67 [2] : vector<2x8x8xf32> to vector<2x8xf32>
    %148 = vector.shape_cast %147 : vector<2x8xf32> to vector<2x8x1xf32>
    %149 = arith.truncf %146 : vector<2x8x8xf32> to vector<2x8x8xbf16>
    %cst_68 = arith.constant dense<0.000000e+00> : vector<2x8x128xf32>
    %150 = tpu.matmul %149, %39, %cst_68 {dimension_numbers = #tpu.dot_dimension_numbers<[2], [1], [1], [2], [0, 0, 0, 1, 1, 2], [0], [0]>} : vector<2x8x8xbf16>, vector<2x8x128xbf16>, vector<2x8x128xf32> -> vector<2x8x128xf32>
    %151 = tpu.reciprocal %148 {approx = true} : vector<2x8x1xf32> -> vector<2x8x1xf32>
    %152 = vector.broadcast %151 : vector<2x8x1xf32> to vector<2x8x128xf32>
    %153 = arith.mulf %150, %152 : vector<2x8x128xf32>
    %154 = vector.extract_strided_slice %153 {offsets = [0, 0, 0], sizes = [1, 8, 128], strides = [1, 1, 1]} : vector<2x8x128xf32> to vector<1x8x128xf32>
    %155 = vector.shape_cast %154 : vector<1x8x128xf32> to vector<8x128xf32>
    %156 = vector.extract_strided_slice %153 {offsets = [1, 0, 0], sizes = [1, 8, 128], strides = [1, 1, 1]} : vector<2x8x128xf32> to vector<1x8x128xf32>
    %157 = vector.shape_cast %156 : vector<1x8x128xf32> to vector<8x128xf32>
    %158 = tpu.concatenate %155, %157 in 1 : vector<8x128xf32>, vector<8x128xf32> -> vector<8x256xf32>
    %159 = arith.truncf %158 : vector<8x256xf32> to vector<8x256xbf16>
    %cst_69 = arith.constant dense<0.000000e+00> : vector<8x256xf32>
    %160 = tpu.matmul %159, %28, %cst_69 {dimension_numbers = #tpu.dot_dimension_numbers<[1], [0], [0], [1], [0, 0, 1, 1], [], []>} : vector<8x256xbf16>, vector<256x256xbf16>, vector<8x256xf32> -> vector<8x256xf32>
    %161 = vector.broadcast %29 : vector<1x256xf32> to vector<8x256xf32>
    %162 = arith.addf %160, %161 : vector<8x256xf32>
    %163 = arith.addf %101, %162 : vector<8x256xf32>
    %164 = vector.extract_strided_slice %20 {offsets = [2, 0], sizes = [1, 256], strides = [1, 1]} : vector<3x256xf32> to vector<1x256xf32>
    %165 = vector.extract_strided_slice %21 {offsets = [2, 0], sizes = [1, 256], strides = [1, 1]} : vector<3x256xf32> to vector<1x256xf32>
    %cst_70 = arith.constant dense<0.000000e+00> : vector<8xf32>
    %166 = vector.multi_reduction <add>, %163, %cst_70 [1] : vector<8x256xf32> to vector<8xf32>
    %167 = vector.shape_cast %166 : vector<8xf32> to vector<8x1xf32>
    %cst_71 = arith.constant 2.560000e+02 : f32
    %168 = vector.broadcast %cst_71 : f32 to vector<8x1xf32>
    %169 = arith.divf %167, %168 : vector<8x1xf32>
    %170 = vector.broadcast %169 : vector<8x1xf32> to vector<8x256xf32>
    %171 = arith.subf %163, %170 : vector<8x256xf32>
    %172 = arith.mulf %171, %171 : vector<8x256xf32>
    %cst_72 = arith.constant dense<0.000000e+00> : vector<8xf32>
    %173 = vector.multi_reduction <add>, %172, %cst_72 [1] : vector<8x256xf32> to vector<8xf32>
    %174 = vector.shape_cast %173 : vector<8xf32> to vector<8x1xf32>
    %cst_73 = arith.constant 2.550000e+02 : f32
    %175 = vector.broadcast %cst_73 : f32 to vector<8x1xf32>
    %176 = arith.divf %174, %175 : vector<8x1xf32>
    %177 = math.sqrt %176 : vector<8x1xf32>
    %178 = vector.broadcast %169 : vector<8x1xf32> to vector<8x256xf32>
    %179 = arith.subf %163, %178 : vector<8x256xf32>
    %180 = vector.broadcast %164 : vector<1x256xf32> to vector<8x256xf32>
    %181 = arith.mulf %180, %179 : vector<8x256xf32>
    %cst_74 = arith.constant 9.99999997E-7 : f32
    %182 = vector.broadcast %cst_74 : f32 to vector<8x1xf32>
    %183 = arith.addf %177, %182 : vector<8x1xf32>
    %184 = vector.broadcast %183 : vector<8x1xf32> to vector<8x256xf32>
    %185 = arith.divf %181, %184 : vector<8x256xf32>
    %186 = vector.broadcast %165 : vector<1x256xf32> to vector<8x256xf32>
    %187 = arith.addf %185, %186 : vector<8x256xf32>
    %188 = arith.truncf %187 : vector<8x256xf32> to vector<8x256xbf16>
    %cst_75 = arith.constant dense<0.000000e+00> : vector<8x512xf32>
    %189 = tpu.matmul %188, %30, %cst_75 {dimension_numbers = #tpu.dot_dimension_numbers<[1], [0], [0], [1], [0, 0, 1, 1], [], []>} : vector<8x256xbf16>, vector<256x512xbf16>, vector<8x512xf32> -> vector<8x512xf32>
    %190 = vector.broadcast %31 : vector<1x512xf32> to vector<8x512xf32>
    %191 = arith.addf %189, %190 : vector<8x512xf32>
    %cst_76 = arith.constant 0.000000e+00 : f32
    %192 = vector.broadcast %cst_76 : f32 to vector<8x512xf32>
    %193 = arith.maximumf %191, %192 : vector<8x512xf32>
    %194 = arith.truncf %193 : vector<8x512xf32> to vector<8x512xbf16>
    %cst_77 = arith.constant dense<0.000000e+00> : vector<8x256xf32>
    %195 = tpu.matmul %194, %32, %cst_77 {dimension_numbers = #tpu.dot_dimension_numbers<[1], [0], [0], [1], [0, 0, 1, 1], [], []>} : vector<8x512xbf16>, vector<512x256xbf16>, vector<8x256xf32> -> vector<8x256xf32>
    %196 = vector.broadcast %33 : vector<1x256xf32> to vector<8x256xf32>
    %197 = arith.addf %195, %196 : vector<8x256xf32>
    %198 = arith.addf %163, %197 : vector<8x256xf32>
    %c0_78 = arith.constant 0 : index
    %c0_79 = arith.constant 0 : index
    %c0_80 = arith.constant 0 : index
    %199 = vector.load %arg24[%c0_78, %c0_79, %c0_80] : memref<1x8x256xf32, #tpu.memory_space<vmem>>, vector<1x8x256xf32>
    %200 = vector.shape_cast %199 : vector<1x8x256xf32> to vector<8x256xf32>
    %201 = vector.shape_cast %198 : vector<8x256xf32> to vector<1x8x256xf32>
    tpu.vector_store %arg24[%c0_78, %c0_79, %c0_80], %201 {strides = array<i32>} : memref<1x8x256xf32, #tpu.memory_space<vmem>>, vector<1x8x256xf32>,
    return
  }
  func.func @transform_0(%arg0: i32, %arg1: i32, %arg2: memref<2xi32, #tpu.memory_space<smem>>) -> (i32, i32, i32) {
    %c0_i32 = arith.constant 0 : i32
    %c0_i32_0 = arith.constant 0 : i32
    return %arg0, %arg1, %c0_i32 : i32, i32, i32
  }
  func.func @transform_1(%arg0: i32, %arg1: i32, %arg2: memref<2xi32, #tpu.memory_space<smem>>) -> (i32, i32, i32) {
    %c0_i32 = arith.constant 0 : i32
    %c0_i32_0 = arith.constant 0 : i32
    %c0_i32_1 = arith.constant 0 : i32
    return %arg0, %c0_i32, %c0_i32_0 : i32, i32, i32
  }
  func.func @transform_2(%arg0: i32, %arg1: i32, %arg2: memref<2xi32, #tpu.memory_space<smem>>) -> (i32, i32, i32) {
    %c0_i32 = arith.constant 0 : i32
    %c0_i32_0 = arith.constant 0 : i32
    %c0_i32_1 = arith.constant 0 : i32
    return %arg0, %c0_i32, %c0_i32_0 : i32, i32, i32
  }
  func.func @transform_3(%arg0: i32, %arg1: i32, %arg2: memref<2xi32, #tpu.memory_space<smem>>) -> (i32, i32) {
    %c0_i32 = arith.constant 0 : i32
    %c0_i32_0 = arith.constant 0 : i32
    %c0_i32_1 = arith.constant 0 : i32
    return %c0_i32, %c0_i32_0 : i32, i32
  }
  func.func @transform_4(%arg0: i32, %arg1: i32, %arg2: memref<2xi32, #tpu.memory_space<smem>>) -> (i32, i32) {
    %c0_i32 = arith.constant 0 : i32
    %c0_i32_0 = arith.constant 0 : i32
    %c0_i32_1 = arith.constant 0 : i32
    return %c0_i32, %c0_i32_0 : i32, i32
  }
  func.func @transform_5(%arg0: i32, %arg1: i32, %arg2: memref<2xi32, #tpu.memory_space<smem>>) -> (i32, i32) {
    %c0_i32 = arith.constant 0 : i32
    %c0_i32_0 = arith.constant 0 : i32
    %c0_i32_1 = arith.constant 0 : i32
    return %c0_i32, %c0_i32_0 : i32, i32
  }
  func.func @transform_6(%arg0: i32, %arg1: i32, %arg2: memref<2xi32, #tpu.memory_space<smem>>) -> (i32, i32) {
    %c0_i32 = arith.constant 0 : i32
    %c0_i32_0 = arith.constant 0 : i32
    %c0_i32_1 = arith.constant 0 : i32
    return %c0_i32, %c0_i32_0 : i32, i32
  }
  func.func @transform_7(%arg0: i32, %arg1: i32, %arg2: memref<2xi32, #tpu.memory_space<smem>>) -> (i32, i32) {
    %c0_i32 = arith.constant 0 : i32
    %c0_i32_0 = arith.constant 0 : i32
    %c0_i32_1 = arith.constant 0 : i32
    return %c0_i32, %c0_i32_0 : i32, i32
  }
  func.func @transform_8(%arg0: i32, %arg1: i32, %arg2: memref<2xi32, #tpu.memory_space<smem>>) -> (i32, i32) {
    %c0_i32 = arith.constant 0 : i32
    %c0_i32_0 = arith.constant 0 : i32
    %c0_i32_1 = arith.constant 0 : i32
    return %c0_i32, %c0_i32_0 : i32, i32
  }
  func.func @transform_9(%arg0: i32, %arg1: i32, %arg2: memref<2xi32, #tpu.memory_space<smem>>) -> (i32, i32) {
    %c0_i32 = arith.constant 0 : i32
    %c0_i32_0 = arith.constant 0 : i32
    %c0_i32_1 = arith.constant 0 : i32
    return %c0_i32, %c0_i32_0 : i32, i32
  }
  func.func @transform_10(%arg0: i32, %arg1: i32, %arg2: memref<2xi32, #tpu.memory_space<smem>>) -> (i32, i32) {
    %c0_i32 = arith.constant 0 : i32
    %c0_i32_0 = arith.constant 0 : i32
    %c0_i32_1 = arith.constant 0 : i32
    return %c0_i32, %c0_i32_0 : i32, i32
  }
  func.func @transform_11(%arg0: i32, %arg1: i32, %arg2: memref<2xi32, #tpu.memory_space<smem>>) -> (i32, i32) {
    %c0_i32 = arith.constant 0 : i32
    %c0_i32_0 = arith.constant 0 : i32
    %c0_i32_1 = arith.constant 0 : i32
    return %c0_i32, %c0_i32_0 : i32, i32
  }
  func.func @transform_12(%arg0: i32, %arg1: i32, %arg2: memref<2xi32, #tpu.memory_space<smem>>) -> (i32, i32) {
    %c0_i32 = arith.constant 0 : i32
    %c0_i32_0 = arith.constant 0 : i32
    %c0_i32_1 = arith.constant 0 : i32
    return %c0_i32, %c0_i32_0 : i32, i32
  }
  func.func @transform_13(%arg0: i32, %arg1: i32, %arg2: memref<2xi32, #tpu.memory_space<smem>>) -> (i32, i32) {
    %c0_i32 = arith.constant 0 : i32
    %c0_i32_0 = arith.constant 0 : i32
    %c0_i32_1 = arith.constant 0 : i32
    return %c0_i32, %c0_i32_0 : i32, i32
  }
  func.func @transform_14(%arg0: i32, %arg1: i32, %arg2: memref<2xi32, #tpu.memory_space<smem>>) -> (i32, i32) {
    %c0_i32 = arith.constant 0 : i32
    %c0_i32_0 = arith.constant 0 : i32
    %c0_i32_1 = arith.constant 0 : i32
    return %c0_i32, %c0_i32_0 : i32, i32
  }
  func.func @transform_15(%arg0: i32, %arg1: i32, %arg2: memref<2xi32, #tpu.memory_space<smem>>) -> (i32, i32) {
    %c0_i32 = arith.constant 0 : i32
    %c0_i32_0 = arith.constant 0 : i32
    %c0_i32_1 = arith.constant 0 : i32
    return %c0_i32, %c0_i32_0 : i32, i32
  }
  func.func @transform_16(%arg0: i32, %arg1: i32, %arg2: memref<2xi32, #tpu.memory_space<smem>>) -> (i32, i32) {
    %c0_i32 = arith.constant 0 : i32
    %c0_i32_0 = arith.constant 0 : i32
    %c0_i32_1 = arith.constant 0 : i32
    return %c0_i32, %c0_i32_0 : i32, i32
  }
  func.func @transform_17(%arg0: i32, %arg1: i32, %arg2: memref<2xi32, #tpu.memory_space<smem>>) -> (i32, i32) {
    %c0_i32 = arith.constant 0 : i32
    %c0_i32_0 = arith.constant 0 : i32
    %c0_i32_1 = arith.constant 0 : i32
    return %c0_i32, %c0_i32_0 : i32, i32
  }
  func.func @transform_18(%arg0: i32, %arg1: i32, %arg2: memref<2xi32, #tpu.memory_space<smem>>) -> (i32, i32) {
    %c0_i32 = arith.constant 0 : i32
    %c0_i32_0 = arith.constant 0 : i32
    %c0_i32_1 = arith.constant 0 : i32
    return %c0_i32, %c0_i32_0 : i32, i32
  }
  func.func @transform_19(%arg0: i32, %arg1: i32, %arg2: memref<2xi32, #tpu.memory_space<smem>>) -> (i32, i32) {
    %c0_i32 = arith.constant 0 : i32
    %c0_i32_0 = arith.constant 0 : i32
    %c0_i32_1 = arith.constant 0 : i32
    return %c0_i32, %c0_i32_0 : i32, i32
  }
  func.func @transform_20(%arg0: i32, %arg1: i32, %arg2: memref<2xi32, #tpu.memory_space<smem>>) -> (i32, i32) {
    %c0_i32 = arith.constant 0 : i32
    %c0_i32_0 = arith.constant 0 : i32
    %c0_i32_1 = arith.constant 0 : i32
    return %c0_i32, %c0_i32_0 : i32, i32
  }
  func.func @transform_21(%arg0: i32, %arg1: i32, %arg2: memref<2xi32, #tpu.memory_space<smem>>) -> (i32, i32, i32) {
    %c0_i32 = arith.constant 0 : i32
    %c0_i32_0 = arith.constant 0 : i32
    return %arg0, %arg1, %c0_i32 : i32, i32, i32
  }
}

</mosaic_0001>

<bundles_post_ra>
// kernel: tpu_custom_call.1
= control target key start
LH: loop header
LB: loop body
LE: loop exit
PB: predicated region body
PF: predicated region fallthrough
CT: control target
= control target key end

     0   :  { %s7639_s0 = inlined_call_operand.hbm [shape: s32[2], index: 0, kind: input, shape index: {}]   ;;  %s7640_s1 = inlined_call_operand.hbm [shape: f32[2,16,256], index: 1, kind: input, shape index: {}]   ;;  %s7641_s2 = inlined_call_operand.hbm [shape: bf16[2,16,256], index: 2, kind: input, shape index: {}]   ;;  %s7642_s3 = inlined_call_operand.hbm [shape: bf16[2,8,256], index: 3, kind: input, shape index: {}]   ;;  %s7643_s4 = inlined_call_operand.hbm [shape: f32[3,256], index: 4, kind: input, shape index: {}]   ;;  %s7644_s5 = inlined_call_operand.vmem [shape: f32[3,256], index: 5, kind: input, shape index: {}]   ;;  %s7645_s6 = inlined_call_operand.hbm [shape: bf16[256,256], index: 6, kind: input, shape index: {}]   ;;  %s7646_s7 = inlined_call_operand.hbm [shape: f32[1,256], index: 7, kind: input, shape index: {}]   ;;  %s7647_s8 = inlined_call_operand.hbm [shape: bf16[256,512], index: 8, kind: input, shape index: {}]   ;;  %s7648_s9 = inlined_call_operand.vmem [shape: f32[1,512], index: 9, kind: input, shape index: {}]   ;;  %s7649_s10 = inlined_call_operand.hbm [shape: bf16[256,256], index: 10, kind: input, shape index: {}]   ;;  %s7650_s11 = inlined_call_operand.hbm [shape: f32[1,256], index: 11, kind: input, shape index: {}]   ;;  %s7651_s12 = inlined_call_operand.hbm [shape: bf16[256,256], index: 12, kind: input, shape index: {}]   ;;  %s7652_s13 = inlined_call_operand.vmem [shape: f32[1,256], index: 13, kind: input, shape index: {}]   ;;  %s7653_s14 = inlined_call_operand.hbm [shape: bf16[256,512], index: 14, kind: input, shape index: {}]   ;;  %s7654_s15 = inlined_call_operand.vmem [shape: f32[1,512], index: 15, kind: input, shape index: {}]   ;;  %s7655_s16 = inlined_call_operand.hbm [shape: bf16[256,256], index: 16, kind: input, shape index: {}]   ;;  %s7656_s17 = inlined_call_operand.vmem [shape: f32[1,256], index: 17, kind: input, shape index: {}]   ;;  %s7657_s18 = inlined_call_operand.hbm [shape: bf16[256,512], index: 18, kind: input, shape index: {}]   ;;  %s7658_s19 = inlined_call_operand.vmem [shape: f32[1,512], index: 19, kind: input, shape index: {}]   ;;  %s7659_s20 = inlined_call_operand.hbm [shape: bf16[512,256], index: 20, kind: input, shape index: {}]   ;;  %s7660_s21 = inlined_call_operand.vmem [shape: f32[1,256], index: 21, kind: input, shape index: {}]   ;;  %s7661_s22 = inlined_call_operand.hbm [shape: f32[2,16,256], index: 22, kind: output, shape index: {}]  }
   0x1   :  { %7687 = sst [smem:[#allocation51_spill]] %s7639_s0 }
   0x2   :  { %7688 = sst [smem:[#allocation52_spill]] %s7640_s1 }
   0x3   :  { %7689 = sst [smem:[#allocation53_spill]] %s7641_s2 }
   0x4   :  { %7690 = sst [smem:[#allocation54_spill]] %s7642_s3  ;;  %s6861_s3 = smov [#allocation7]  }
   0x5   :  { %7691 = sst [smem:[#allocation55_spill]] %s7643_s4 }
   0x6   :  { %7692 = sst [smem:[#allocation56_spill]] %s7644_s5 }
   0x7   :  { %7693 = sst [smem:[#allocation57_spill]] %s7645_s6 }
   0x8   :  { %7694 = sst [smem:[#allocation58_spill]] %s7646_s7 }
   0x9   :  { %7695 = sst [smem:[#allocation59_spill]] %s7647_s8 }
   0xa   :  { %7696 = sst [smem:[#allocation60_spill]] %s7648_s9 }
   0xb   :  { %7697 = sst [smem:[#allocation61_spill]] %s7649_s10 }
   0xc   :  { %7698 = sst [smem:[#allocation62_spill]] %s7650_s11 }
   0xd   :  { %7699 = sst [smem:[#allocation63_spill]] %s7651_s12 }
   0xe   :  { %7700 = sst [smem:[#allocation64_spill]] %s7652_s13 }
   0xf   :  { %7701 = sst [smem:[#allocation65_spill]] %s7653_s14 }
  0x10   :  { %7702 = sst [smem:[#allocation66_spill]] %s7654_s15 }
  0x11   :  { %7703 = sst [smem:[#allocation67_spill]] %s7655_s16 }
  0x12   :  { %7704 = sst [smem:[#allocation68_spill]] %s7656_s17 }
  0x13   :  { %7705 = sst [smem:[#allocation69_spill]] %s7657_s18 }
  0x14   :  { %7706 = sst [smem:[#allocation70_spill]] %s7658_s19 }
  0x15   :  { %7707 = sst [smem:[#allocation71_spill]] %s7659_s20 }
  0x16   :  { %7708 = sst [smem:[#allocation72_spill]] %s7660_s21 }
  0x17   :  { %7709 = sst [smem:[#allocation73_spill]] %s7661_s22 }
  0x18   :  { %s7710_s13 = sld [smem:[#allocation51_spill]] }
  0x1e   :  { %28 = dma.hbm_to_smem %s7710_s13, 16, %s6861_s3, [#allocation6] }
  0x1f   :  { %6779 = dma.done.wait [#allocation6], 16 }
  0x20   :  { %6780 = vsyncadd [#allocation6], 4294967280 }
  0x21   :  { %30 = sfence }
  0x22   :  { %31 = vsyncpa [#allocation9], 0 }
  0x23   :  { %33 = vsyncpa [#allocation9 + $0x1], 0 }
  0x24   :  { %34 = vsyncpa [#allocation12], 0 }
  0x25   :  { %36 = vsyncpa [#allocation12 + $0x1], 0 }
  0x26   :  { %37 = vsyncpa [#allocation15], 0 }
  0x27   :  { %38 = vsyncpa [#allocation18], 0 }
  0x28   :  { %39 = vsyncpa [#allocation21], 0 }
  0x29   :  { %40 = vsyncpa [#allocation24], 0 }
  0x2a   :  { %41 = vsyncpa [#allocation27], 0 }
  0x2b   :  { %42 = vsyncpa [#allocation30], 0 }
  0x2c   :  { %43 = vsyncpa [#allocation10], 0 }
  0x2d   :  { %45 = vsyncpa [#allocation10 + $0x1], 0  ;;  %s7002_s30 = smov 0   ;;  %s7004_s4 = smov 0  }
  0x2e   :  { %s7006_s13 = smov 0   ;;  %s7008_s0 = smov 0  }
  0x2f   :  { %s7010_s23 = smov 0   ;;  %s7012_s1 = smov 0  }
  0x30   :  { %s7014_s5 = smov 0   ;;  %s7016_s24 = smov 0  }
  0x31   :  { %s7018_s6 = smov 0   ;;  %s7020_s25 = smov 0  }
  0x32   :  { %s7022_s26 = smov 0  }
  0x33 LB: > { %7711 = sst [smem:[#allocation42_spill]] %s6823_s4  ;;  %s7058_s2 = sadd.s32 4294967295, %s6859_s26   ;;  %s6859_s26 = sphi %s7022_s26, %s51_s26   ;;  %s6855_s25 = sphi %s7020_s25, %s7795_s25   ;;  %s6851_s6 = sphi %s7018_s6, %s7787_s6   ;;  %s6847_s24 = sphi %s7016_s24, %s7794_s24   ;;  %s6843_s5 = sphi %s7014_s5, %s7786_s5   ;;  %s6839_s1 = sphi %s7012_s1, %s7793_s1   ;;  %s6835_s23 = sphi %s7010_s23, %s7792_s23   ;;  %s6831_s0 = sphi %s7008_s0, %s7791_s0   ;;  %s6827_s13 = sphi %s7006_s13, %s7790_s13   ;;  %s6823_s4 = sphi %s7004_s4, %s7789_s4   ;;  %s6819_s30 = sphi %s7002_s30, %s7784_s30  }
  0x34   : > { %7712 = sst [smem:[#allocation43_spill]] %s6831_s0  ;;  %p4923_p0 = scmp.ge.s32.totalorder %s6859_s26, 1 }
  0x35   : > { %7713 = sst [smem:[#allocation44_spill]] %s6843_s5  ;;  %p7665_p1 = scmp.eq.s32.totalorder %s7058_s2, 0 }
  0x36   : > { %7714 = sst [smem:[#allocation45_spill]] %s6847_s24  ;;  %p554_p2 = scmp.lt.s32.totalorder %s6859_s26, 5 }
  0x37   : > { %7715 = sst [smem:[#allocation46_spill]] %s6851_s6  ;;  %s6862_s3 = smov [#allocation14]  }
  0x38   : > { %p7063_p3 = pnand %p4923_p0, %p554_p2  ;;  %s567_s28 = sshll.u32 %s6862_s3, 4  ;;  %s568_s28 = int_to_ptr.vmem [resolvable:$true] %s567_s28 }
  0x39   : > { %s6863_s29 = smov [#allocation17]   ;;  %s6864_s19 = smov [#allocation20]  }
  0x3a   : > { %s7716_s27 = scalar_select %p7063_p3, 1, 0 }
  0x3b   : > { %p5530_p4 = pneg %p7063_p3  ;;  %s594_s22 = sshll.u32 %s6863_s29, 4  ;;  %s595_s22 = int_to_ptr.vmem [resolvable:$true] %s594_s22 }
  0x3c   : > { %s620_s17 = sshll.u32 %s6864_s19, 4  ;;  %s6350_s3 = scalar_lea.vmem %s568_s28, 128  ;;  %s621_s17 = int_to_ptr.vmem [resolvable:$true] %s620_s17 }
  0x3d   : > { %p7071_p5 = pnand %p5530_p4, %p7665_p1  ;;  %p6351_p7 = scmp.ne.s32.totalorder %s568_s28, %s6350_s3 }
  0x3e   : > { %p6358_p10 = scmp.lt.s32.totalorder %s568_s28, %s568_s28  ;;  %p6359_p11 = scmp.lt.s32.totalorder %s6350_s3, %s6350_s3 }
  0x3f   : > { %p7077_p6 = pneg %p7071_p5 }
  0x40   : > { %p6360_p12 = por %p6359_p11, %p6358_p10 }
  0x41   : > { %p6353_p8 = pnand %p6351_p7, %p7077_p6 }
  0x43   : > { %p6354_p9 = pneg %p6353_p8 }
  0x45   : > { %p6361_p13 = pnand %p6360_p12, %p6354_p9 }
  0x47   : > { %6364 = shalt.err (!%p6361_p13)
}
  0x48   : > { %s7719_s15 = sld [smem:[#allocation55_spill]]  ;;  %s6376_s9 = scalar_lea.vmem %s595_s22, 32 }
  0x49   : > { %p6377_p0 = scmp.ne.s32.totalorder %s595_s22, %s6376_s9  ;;  %p6384_p1 = scmp.lt.s32.totalorder %s595_s22, %s595_s22 }
  0x4a   : > { %p6385_p7 = scmp.lt.s32.totalorder %s6376_s9, %s6376_s9 }
  0x4b   : > { %p6379_p2 = pnand %p6377_p0, %p7077_p6 }
  0x4c   : > { %p6386_p8 = por %p6385_p7, %p6384_p1 }
  0x4d   : > { %p6380_p4 = pneg %p6379_p2 }
  0x4e   : > { %5533 = dma.hbm_to_vmem [thread:$0]  (!%p7071_p5), %s7719_s15, 128, %s568_s28, [#allocation15]  }
  0x4f   : > { %p6387_p3 = pnand %p6386_p8, %p6380_p4 }
  0x51   : > { %6390 = shalt.err (!%p6387_p3)
}
  0x52   : > { %s7720_s7 = sld [smem:[#allocation58_spill]]  ;;  %s6402_s29 = scalar_lea.vmem %s621_s17, 4096 }
  0x53   : > { %p6403_p9 = scmp.ne.s32.totalorder %s621_s17, %s6402_s29  ;;  %p6410_p12 = scmp.lt.s32.totalorder %s621_s17, %s621_s17 }
  0x54   : > { %p6411_p13 = scmp.lt.s32.totalorder %s6402_s29, %s6402_s29 }
  0x55   : > { %p6405_p10 = pnand %p6403_p9, %p7077_p6 }
  0x56   : > { %p6412_p0 = por %p6411_p13, %p6410_p12 }
  0x57   : > { %p6406_p11 = pneg %p6405_p10 }
  0x58   : > { %5539 = dma.hbm_to_vmem [thread:$0]  (!%p7071_p5), %s7720_s7, 32, %s595_s22, [#allocation18]  }
  0x59   : > { %p6413_p2 = pnand %p6412_p0, %p6406_p11 }
  0x5b   : > { %6416 = shalt.err (!%p6413_p2)
}
  0x5c   : > { %s7668_s9 = smov 128   ;;  %s7670_s15 = smov 8  }
  0x5d   : > { %s7721_s10 = sld [smem:[#allocation61_spill]]  ;;  %s6867_s28 = smov [#allocation23]  }
  0x5e   : > { %s644_s19 = sshll.u32 %s6867_s28, 4  ;;  %s6868_s3 = smov [#allocation26]   ;;  %s645_s19 = int_to_ptr.vmem [resolvable:$true] %s644_s19 }
  0x5f   : > { %s676_s29 = sshll.u32 %s6868_s3, 4  ;;  %s6428_s7 = scalar_lea.vmem %s645_s19, 4096  ;;  %s677_s29 = int_to_ptr.vmem [resolvable:$true] %s676_s29 }
  0x60   : > { %p6429_p1 = scmp.ne.s32.totalorder %s645_s19, %s6428_s7  ;;  %p6436_p7 = scmp.lt.s32.totalorder %s645_s19, %s645_s19 }
  0x61   : > { %p6437_p8 = scmp.lt.s32.totalorder %s6428_s7, %s6428_s7 }
  0x62   : > { %p6431_p3 = pnand %p6429_p1, %p7077_p6 }
  0x63   : > { %5545 = dma.hbm_to_vmem [thread:$0]  (!%p7071_p5), %s7721_s10, 4096, %s621_s17, [#allocation21], %s7668_s9, %s7668_s9, %s7670_s15  }
  0x64   : > { %p6432_p4 = pneg %p6431_p3  ;;  %p6438_p9 = por %p6437_p8, %p6436_p7 }
  0x66   : > { %p6439_p10 = pnand %p6438_p9, %p6432_p4 }
  0x68   : > { %6442 = shalt.err (!%p6439_p10)
}
  0x69   : > { %s7722_s12 = sld [smem:[#allocation63_spill]]  ;;  %s6454_s5 = scalar_lea.vmem %s677_s29, 4096 }
  0x6a   : > { %p6455_p11 = scmp.ne.s32.totalorder %s677_s29, %s6454_s5  ;;  %p6462_p0 = scmp.lt.s32.totalorder %s677_s29, %s677_s29 }
  0x6b   : > { %p6463_p2 = scmp.lt.s32.totalorder %s6454_s5, %s6454_s5 }
  0x6c   : > { %p6457_p12 = pnand %p6455_p11, %p7077_p6 }
  0x6d   : > { %p6464_p1 = por %p6463_p2, %p6462_p0 }
  0x6e   : > { %p6458_p13 = pneg %p6457_p12 }
  0x6f   : > { %5551 = dma.hbm_to_vmem [thread:$0]  (!%p7071_p5), %s7722_s12, 4096, %s645_s19, [#allocation24], %s7668_s9, %s7668_s9, %s7670_s15  }
  0x70   : > { %p6465_p3 = pnand %p6464_p1, %p6458_p13 }
  0x72   : > { %6468 = shalt.err (!%p6465_p3)
}
  0x73   : > { %s7723_s16 = sld [smem:[#allocation67_spill]]  ;;  %p7678_p4 = scmp.eq.s32.totalorder %s6859_s26, 0 }
  0x74   : > { %p105_p7 = scmp.ne.s32.totalorder %s6827_s13, %s6823_s4  ;;  %p111_p8 = scmp.ne.s32.totalorder %s6823_s4, %s6819_s30 }
  0x75   : > { %p7676_p9 = scmp.lt.s32.totalorder %s6859_s26, 4  ;;  %s746_s3 = sand.u32 1, %s6859_s26  }
  0x76   : > { %p107_p10 = por %p105_p7, %p7678_p4  ;;  %p7724_p11 = scmp.eq.s32.totalorder %s7058_s2, 0 }
  0x77   : > { %s7672_s22 = sand.u32 1, %s6827_s13   ;;  %s5372_s5 = sshll.u32 %s6855_s25, 8 }
  0x78   : > { %p7137_p12 = por %p111_p8, %p7724_p11  ;;  %s4940_s7 = sshll.u32 %s7672_s22, 4 }
  0x79   : > { %5557 = dma.hbm_to_vmem [thread:$0]  (!%p7071_p5), %s7723_s16, 4096, %s677_s29, [#allocation27], %s7668_s9, %s7668_s9, %s7670_s15  }
  0x7a   : > { %s7725_s17 = scalar_select %p7137_p12, 1, 0 }
  0x7b   : > { %s7727_s29 = sld [smem:[#allocation53_spill]]  ;;  %p7150_p13 = pnand %p7676_p9, %p107_p10 }
  0x7c   : > { %7726 = sst [smem:[#allocation47_spill]] %s7725_s17  ;;  %s750_s19 = scalar_lea.vmem [#allocation11], %s4940_s7 }
  0x7d   : > { %s7728_s30 = scalar_select %p7150_p13, 1, 0 }
  0x7e   : > { %s757_s15 = sshll.u32 %s750_s19, 4  ;;  %s7154_s12 = scalar_lea.sflag [#allocation12], %s746_s3  ;;  %s758_s15 = int_to_ptr.vmem [resolvable:$true] %s757_s15 }
  0x7f   : > { %p7675_p0 = pneg %p7150_p13  ;;  %s6482_s16 = scalar_lea.vmem %s758_s15, 256 }
  0x80   : > { %p6483_p2 = scmp.ne.s32.totalorder %s758_s15, %s6482_s16  ;;  %s6869_s10 = smov [#allocation11]  }
  0x81   : > { %s756_s9 = scalar_lea.hbm %s7727_s29, %s5372_s5  ;;  %s6487_s5 = sshll.u32 %s6869_s10, 4  ;;  %s6488_s5 = int_to_ptr.vmem [resolvable:$false] %s6487_s5 }
  0x82   : > { %p6485_p1 = pnand %p6483_p2, %p7675_p0  ;;  %s6489_s28 = scalar_lea.vmem %s6488_s5, 512 }
  0x83   : > { %p6490_p7 = scmp.lt.s32.totalorder %s758_s15, %s6488_s5  ;;  %p6491_p8 = scmp.lt.s32.totalorder %s6489_s28, %s6482_s16 }
  0x84   : > { %p6486_p3 = pneg %p6485_p1 }
  0x85   : > { %p6492_p10 = por %p6491_p8, %p6490_p7 }
  0x87   : > { %p6493_p11 = pnand %p6492_p10, %p6486_p3 }
  0x89   : > { %6496 = shalt.err (!%p6493_p11)
}
  0x8a   : > { %s7729_s19 = smov 8   ;;  %s7730_s3 = smov 128  }
  0x8b   : > { %5570 = dma.hbm_to_vmem [thread:$0]  (!%p7150_p13), %s756_s9, 256, %s758_s15, %s7154_s12, %s7730_s3, %s7730_s3, %s7729_s19  }
  0x8c   : > { %s6870_s7 = smov [#allocation16]   ;;  %s6871_s22 = smov [#allocation19]  }
  0x8d   : > { %s580_s29 = sshll.u32 %s6870_s7, 4  ;;  %s604_s10 = sshll.u32 %s6871_s22, 4  ;;  %s581_s29 = int_to_ptr.vmem [resolvable:$true] %s580_s29  ;;  %s605_s10 = int_to_ptr.vmem [resolvable:$true] %s604_s10 }
  0x8e   : > { %s6508_s17 = scalar_lea.vmem %s581_s29, 4096  ;;  %p6516_p3 = scmp.lt.s32.totalorder %s581_s29, %s581_s29 }
  0x8f   : > { %p6509_p2 = scmp.ne.s32.totalorder %s581_s29, %s6508_s17  ;;  %p6517_p8 = scmp.lt.s32.totalorder %s6508_s17, %s6508_s17 }
  0x91   : > { %p6511_p1 = pnand %p6509_p2, %p7077_p6  ;;  %p6518_p10 = por %p6517_p8, %p6516_p3 }
  0x93   : > { %p6512_p7 = pneg %p6511_p1 }
  0x95   : > { %p6519_p11 = pnand %p6518_p10, %p6512_p7 }
  0x97   : > { %6522 = shalt.err (!%p6519_p11)
}
  0x98   : > { %s7731_s15 = sld [smem:[#allocation57_spill]]  ;;  %s6534_s22 = scalar_lea.vmem %s605_s10, 8192 }
  0x99   : > { %p6535_p0 = scmp.ne.s32.totalorder %s605_s10, %s6534_s22  ;;  %p6542_p9 = scmp.lt.s32.totalorder %s605_s10, %s605_s10 }
  0x9a   : > { %p6543_p3 = scmp.lt.s32.totalorder %s6534_s22, %s6534_s22 }
  0x9b   : > { %p6537_p2 = pnand %p6535_p0, %p7077_p6 }
  0x9c   : > { %p6544_p7 = por %p6543_p3, %p6542_p9 }
  0x9d   : > { %p6538_p1 = pneg %p6537_p2 }
  0x9e   : > { %5536 = dma.hbm_to_vmem [thread:$0]  (!%p7071_p5), %s7731_s15, 4096, %s581_s29, [#allocation15], %s7730_s3, %s7730_s3, %s7729_s19  }
  0x9f   : > { %p6545_p8 = pnand %p6544_p7, %p6538_p1 }
  0xa1   : > { %6548 = shalt.err (!%p6545_p8)
}
  0xa2   : > { %s6872_s17 = smov 256   ;;  %s6873_s5 = smov 16  }
  0xa3   : > { %s7732_s8 = sld [smem:[#allocation59_spill]]  ;;  %s6874_s29 = smov [#allocation22]  }
  0xa4   : > { %s634_s16 = sshll.u32 %s6874_s29, 4  ;;  %s6875_s9 = smov [#allocation25]   ;;  %s635_s16 = int_to_ptr.vmem [resolvable:$true] %s634_s16 }
  0xa5   : > { %s660_s15 = sshll.u32 %s6875_s9, 4  ;;  %s6560_s22 = scalar_lea.vmem %s635_s16, 32  ;;  %s661_s15 = int_to_ptr.vmem [resolvable:$true] %s660_s15 }
  0xa6   : > { %p6561_p9 = scmp.ne.s32.totalorder %s635_s16, %s6560_s22  ;;  %p6568_p11 = scmp.lt.s32.totalorder %s635_s16, %s635_s16 }
  0xa7   : > { %p6569_p2 = scmp.lt.s32.totalorder %s6560_s22, %s6560_s22 }
  0xa8   : > { %p6563_p0 = pnand %p6561_p9, %p7077_p6 }
  0xa9   : > { %5542 = dma.hbm_to_vmem [thread:$0]  (!%p7071_p5), %s7732_s8, 8192, %s605_s10, [#allocation18], %s6872_s17, %s6872_s17, %s6873_s5  }
  0xaa   : > { %p6564_p10 = pneg %p6563_p0  ;;  %p6570_p1 = por %p6569_p2, %p6568_p11 }
  0xac   : > { %p6571_p3 = pnand %p6570_p1, %p6564_p10 }
  0xae   : > { %6574 = shalt.err (!%p6571_p3)
}
  0xaf   : > { %s7733_s11 = sld [smem:[#allocation62_spill]]  ;;  %s6586_s10 = scalar_lea.vmem %s661_s15, 8192 }
  0xb0   : > { %p6587_p7 = scmp.ne.s32.totalorder %s661_s15, %s6586_s10  ;;  %p6594_p9 = scmp.lt.s32.totalorder %s661_s15, %s661_s15 }
  0xb1   : > { %p6595_p0 = scmp.lt.s32.totalorder %s6586_s10, %s6586_s10 }
  0xb2   : > { %p6589_p8 = pnand %p6587_p7, %p7077_p6 }
  0xb3   : > { %p6596_p12 = por %p6595_p0, %p6594_p9 }
  0xb4   : > { %p6590_p4 = pneg %p6589_p8 }
  0xb5   : > { %5548 = dma.hbm_to_vmem [thread:$0]  (!%p7071_p5), %s7733_s11, 32, %s635_s16, [#allocation21]  }
  0xb6   : > { %p6597_p13 = pnand %p6596_p12, %p6590_p4 }
  0xb8   : > { %6600 = shalt.err (!%p6597_p13)
}
  0xb9   : > { %s7734_s14 = sld [smem:[#allocation65_spill]]  ;;  %s6876_s29 = smov [#allocation28]  }
  0xba   : > { %s692_s16 = sshll.u32 %s6876_s29, 4  ;;  %s6877_s9 = smov [#allocation29]   ;;  %s693_s16 = int_to_ptr.vmem [resolvable:$true] %s692_s16 }
  0xbb   : > { %s708_s22 = sshll.u32 %s6877_s9, 4  ;;  %s6612_s28 = scalar_lea.vmem %s693_s16, 8192  ;;  %s709_s22 = int_to_ptr.vmem [resolvable:$true] %s708_s22 }
  0xbc   : > { %p6613_p10 = scmp.ne.s32.totalorder %s693_s16, %s6612_s28  ;;  %p6620_p13 = scmp.lt.s32.totalorder %s693_s16, %s693_s16 }
  0xbd   : > { %p6621_p11 = scmp.lt.s32.totalorder %s6612_s28, %s6612_s28 }
  0xbe   : > { %p6615_p4 = pnand %p6613_p10, %p7077_p6 }
  0xbf   : > { %5554 = dma.hbm_to_vmem [thread:$0]  (!%p7071_p5), %s7734_s14, 8192, %s661_s15, [#allocation24], %s6872_s17, %s6872_s17, %s6873_s5  }
  0xc0   : > { %p6616_p12 = pneg %p6615_p4  ;;  %p6622_p2 = por %p6621_p11, %p6620_p13 }
  0xc2   : > { %p6623_p1 = pnand %p6622_p2, %p6616_p12 }
  0xc4   : > { %6626 = shalt.err (!%p6623_p1)
}
  0xc5   : > { %s7735_s18 = sld [smem:[#allocation69_spill]]  ;;  %s6638_s7 = scalar_lea.vmem %s709_s22, 8192 }
  0xc6   : > { %p6639_p3 = scmp.ne.s32.totalorder %s709_s22, %s6638_s7  ;;  %p6646_p9 = scmp.lt.s32.totalorder %s709_s22, %s709_s22 }
  0xc7   : > { %p6647_p0 = scmp.lt.s32.totalorder %s6638_s7, %s6638_s7 }
  0xc8   : > { %p6641_p7 = pnand %p6639_p3, %p7077_p6 }
  0xc9   : > { %p6648_p10 = por %p6647_p0, %p6646_p9 }
  0xca   : > { %p6642_p8 = pneg %p6641_p7 }
  0xcb   : > { %5560 = dma.hbm_to_vmem [thread:$0]  (!%p7071_p5), %s7735_s18, 8192, %s693_s16, [#allocation27], %s6872_s17, %s6872_s17, %s6873_s5  }
  0xcc   : > { %p6649_p4 = pnand %p6648_p10, %p6642_p8 }
  0xce   : > { %6652 = shalt.err (!%p6649_p4)
}
  0xcf   : > { %s7736_s20 = sld [smem:[#allocation71_spill]]  ;;  %s4922_s21 = sadd.s32 4294967294, %s6859_s26  }
  0xd0   : > { %s60_s24 = sadd.s32 1, %s6851_s6  ;;  %s63_s17 = sadd.s32 1, %s6855_s25 }
  0xd1   : > { %p61_p6 = scmp.ge.s32.totalorder %s60_s24, 2  ;;  %s72_s5 = sadd.s32 1, %s6839_s1 }
  0xd2   : > { %p79_p12 = scmp.ne.s32.totalorder %s6839_s1, %s6835_s23  ;;  %p85_p13 = scmp.ne.s32.totalorder %s6835_s23, %s6831_s0 }
  0xd3   : > { %s7797_s24 = smov (%p61_p6, %s60_s24), 0  ;;  %s7799_s17 = smov (!%p61_p6, %s63_s17), %s6855_s25 }
  0xd4   : > { %7737 = sst [smem:[#allocation48_spill]] %s7797_s24  ;;  %s68_s16 = ssub.s32 %s6851_s6, %s7797_s24 }
  0xd5   : > { %5563 = dma.hbm_to_vmem [thread:$0]  (!%p7071_p5), %s7736_s20, 8192, %s709_s22, [#allocation30], %s7730_s3, %s7730_s3, %s7729_s19  }
  0xd6   : > { %p7738_p11 = scmp.eq.s32.totalorder %s6859_s26, 0  ;;  %p65_p5 = scmp.ge.s32.totalorder %s7799_s17, 2 }
  0xd7   : > { %p7740_p1 = scmp.eq.s32.totalorder %s7058_s2, 0  ;;  %p541_p7 = scmp.eq.s32.totalorder %s7058_s2, 3 }
  0xd8   : > { %p7239_p2 = por %p7738_p11, %p79_p12  ;;  %p547_p8 = scmp.eq.s32.totalorder %s4922_s21, 3 }
  0xd9   : > { %p7245_p3 = por %p7740_p1, %p85_p13  ;;  %s7801_s17 = smov (%p65_p5, %s7799_s17), 0 }
  0xda   : > { %7742 = sst [smem:[#allocation49_spill]] %s7801_s17  ;;  %p7252_p9 = por %p541_p7, %p79_p12 }
  0xdb   : > { %p7256_p0 = por %p547_p8, %p85_p13  ;;  %s67_s28 = ssub.s32 %s6855_s25, %s7801_s17 }
  0xdc   : > { %s725_s15 = sand.u32 1, %s6839_s1   ;;  %s69_s10 = sor.u32 %s68_s16, %s67_s28 }
  0xdd   : > { %s7744_s22 = scalar_select %p7256_p0, 1, 0 }
  0xde   : > { %p96_p10 = scmp.eq.s32.totalorder %s67_s28, 0  ;;  %p70_p4 = scmp.eq.s32.totalorder %s69_s10, 0 }
  0xdf   : > { %7745 = sst [smem:[#allocation50_spill]] %s7744_s22  ;;  %s7746_s7 = sadd.s32 1, %s6827_s13 }
  0xe0   : > { %s7266_s4 = scalar_select %p96_p10, %s6827_s13, %s7746_s7  }
  0xe1   : > { %s7269_s29 = scalar_select %p70_p4, %s6839_s1, %s72_s5  }
  0xe2   : > { %s4936_s21 = sshll.u32 %s725_s15, 4  ;;  %s4937_s8 = sshll.u32 %s6851_s6, 1 }
  0xe3   : > { %s4938_s11 = sshll.u32 %s6855_s25, 2  ;;  %s729_s18 = scalar_lea.vmem [#allocation8], %s4936_s21 }
  0xe4   : > { %s735_s14 = sadd.s32 %s4938_s11, %s4937_s8  ;;  %s739_s20 = sshll.u32 %s729_s18, 4  ;;  %s740_s20 = int_to_ptr.vmem [resolvable:$true] %s739_s20 }
  0xe5   : > { %s4939_s17 = sshll.u32 %s735_s14, 7  ;;  %s7747_s0 = sld [smem:[#allocation52_spill]] }
  0xe6   : > { %p7748_p6 = scmp.lt.s32.totalorder %s6859_s26, 4  ;;  %s7750_s5 = sand.u32 1, %s6827_s13  }
  0xe7   : > { %s4943_s10 = sshll.u32 %s7750_s5, 3  ;;  %s5373_s7 = sshll.u32 %s6855_s25, 7 }
  0xe8   : > { %p7280_p12 = pnand %p7748_p6, %p7239_p2  ;;  %s726_s6 = scalar_lea.sflag [#allocation9], %s725_s15 }
  0xe9   : > { %s6666_s8 = scalar_lea.vmem %s740_s20, 256  ;;  %s6878_s11 = smov [#allocation8]  }
  0xea   : > { %p6655_p13 = pneg %p7280_p12  ;;  %p6667_p11 = scmp.ne.s32.totalorder %s740_s20, %s6666_s8 }
  0xeb   : > { %s737_s16 = scalar_lea.hbm %s7747_s0, %s4939_s17  ;;  %s6671_s14 = sshll.u32 %s6878_s11, 4  ;;  %s6672_s14 = int_to_ptr.vmem [resolvable:$false] %s6671_s14 }
  0xec   : > { %p6669_p5 = pnand %p6667_p11, %p6655_p13  ;;  %s6673_s18 = scalar_lea.vmem %s6672_s14, 512 }
  0xed   : > { %p6674_p7 = scmp.lt.s32.totalorder %s740_s20, %s6672_s14  ;;  %p6675_p2 = scmp.lt.s32.totalorder %s6673_s18, %s6666_s8 }
  0xee   : > { %p6670_p1 = pneg %p6669_p5 }
  0xef   : > { %p6676_p8 = por %p6675_p2, %p6674_p7 }
  0xf1   : > { %p6677_p10 = pnand %p6676_p8, %p6670_p1 }
  0xf3   : > { %6680 = shalt.err (!%p6677_p10)
}
  0xf4   : > { %5567 = dma.hbm_to_vmem [thread:$0]  (!%p7280_p12), %s737_s16, 256, %s740_s20, %s726_s6  }
  0xf5   : > { %s7751_s17 = sld [smem:[#allocation54_spill]]  ;;  %s771_s22 = scalar_lea.vmem [#allocation13], %s4943_s10 }
  0xf6   : > { %s779_s15 = sshll.u32 %s771_s22, 4  ;;  %p7752_p6 = scmp.ne.s32.totalorder %s7728_s30, 0  ;;  %s780_s15 = int_to_ptr.vmem [resolvable:$true] %s779_s15 }
  0xf7   : > { %s6694_s21 = scalar_lea.vmem %s780_s15, 128  ;;  %s6879_s5 = smov [#allocation13]  }
  0xf8   : > { %p6695_p4 = scmp.ne.s32.totalorder %s780_s15, %s6694_s21  ;;  %p7753_p13 = pneg %p7752_p6 }
  0xf9   : > { %s6699_s8 = sshll.u32 %s6879_s5, 4  ;;  %s6700_s8 = int_to_ptr.vmem [resolvable:$false] %s6699_s8 }
  0xfa   : > { %p6697_p11 = pnand %p6695_p4, %p7753_p13  ;;  %s6701_s11 = scalar_lea.vmem %s6700_s8, 256 }
  0xfb   : > { %s777_s19 = scalar_lea.hbm %s7751_s17, %s5373_s7  ;;  %p6702_p1 = scmp.lt.s32.totalorder %s780_s15, %s6700_s8 }
  0xfc   : > { %p6698_p5 = pneg %p6697_p11  ;;  %p6703_p7 = scmp.lt.s32.totalorder %s6701_s11, %s6694_s21 }
  0xfe   : > { %p6704_p12 = por %p6703_p7, %p6702_p1 }
 0x100   : > { %p6705_p2 = pnand %p6704_p12, %p6698_p5 }
 0x102   : > { %6708 = shalt.err (!%p6705_p2)
}
 0x103   : > { %5573 = dma.hbm_to_vmem [thread:$0]  (!%p7752_p6), %s777_s19, 128, %s780_s15, %s7154_s12  }
 0x104   : > { %p7754_p8 = scmp.ne.s32.totalorder %s7716_s27, 0 }
 0x105   : > { %s7303_s20 = sand.u32 (!%p7754_p8), 1, %s6835_s23  }
 0x106   : > { %788 = sbr.rel (%p7754_p8) target bundleno = 4230 (0x1086), region = 104  ;;  %s4947_s6 = sshll.u32 (!%p7754_p8), %s7303_s20, 4 }
 0x107   : > { %s791_s16 = scalar_lea.sflag (!%p7754_p8), [#allocation9], %s7303_s20  ;;  %s7307_s28 = scalar_lea.vmem (!%p7754_p8), [#allocation8], %s4947_s6 }
 0x10b   : > { %6782 = dma.done.wait (%p7245_p3), %s791_s16, 256  }
 0x10c   : > { %6784 = vsyncadd (%p7245_p3), %s791_s16, 4294967040  ;;  %s7755_s12 = sld [smem:[#allocation42_spill]]  ;;  %s799_s27 = sand.u32 1, %s7058_s2  }
 0x10d   : > { %s7756_s30 = sld [smem:[#allocation47_spill]]  ;;  %s800_s14 = scalar_lea.sflag [#allocation12], %s799_s27 }
 0x112   : > { %s801_s10 = sand.u32 1, %s7755_s12  }
 0x113   : > { %s4948_s7 = sshll.u32 %s801_s10, 4  ;;  %p7757_p10 = scmp.ne.s32.totalorder %s7756_s30, 0 }
 0x114   : > { %s803_s18 = scalar_lea.vmem [#allocation11], %s4948_s7 }
 0x115   : > { %6786 = dma.done.wait (%p7757_p10), %s800_s14, 384  }
 0x116   : > { %6788 = vsyncadd (%p7757_p10), %s800_s14, 4294966912  ;;  %s7319_s0 = sshll.u32 %s801_s10, 3  ;;  %p7758_p4 = scmp.eq.s32.totalorder %s7058_s2, 0 }
 0x117   : > { %s812_s24 = scalar_lea.vmem [#allocation13], %s7319_s0 }
 0x118   : > { %6790 = dma.done.wait (%p7758_p4), [#allocation15], 4224   ;;  %p7759_p3 = pmov %p7758_p4 }
 0x11a   : > { %6792 = vsyncadd (%p7759_p3), [#allocation15], 4294963072  ;;  %p7760_p6 = pmov %p7759_p3 }
 0x11b   : > { %p7761_p13 = pmov %p7759_p3 }
 0x11c   : > { %6794 = dma.done.wait (%p7760_p6), [#allocation18], 8224  }
 0x11d   : > { %6796 = vsyncadd (%p7761_p13), [#allocation18], 4294959072  ;;  %p7762_p11 = pmov %p7759_p3 }
 0x11e   : > { %p7763_p5 = pmov %p7759_p3 }
 0x11f   : > { %6798 = dma.done.wait (%p7762_p11), [#allocation21], 4128  }
 0x120   : > { %6800 = vsyncadd (%p7763_p5), [#allocation21], 4294963168  ;;  %p7764_p1 = pmov %p7759_p3 }
 0x122   : > { %6802 = dma.done.wait (%p7764_p1), [#allocation24], 12288   ;;  %p7765_p7 = pmov %p7764_p1 }
 0x123   : > { %p7766_p12 = pmov %p7764_p1 }
 0x124   : > { %6804 = vsyncadd (%p7765_p7), [#allocation24], 4294955008 }
 0x125   : > { %6806 = dma.done.wait (%p7766_p12), [#allocation27], 12288   ;;  %p7767_p2 = pmov %p7764_p1 }
 0x126   : > { %p7768_p8 = pmov %p7764_p1 }
 0x127   : > { %6808 = vsyncadd (%p7767_p2), [#allocation27], 4294955008 }
 0x128   : > { %6810 = dma.done.wait (%p7768_p8), [#allocation30], 8192   ;;  %p7769_p10 = pmov %p7764_p1 }
 0x129   : > { %s7346_s3 = scalar_lea.vmem [#allocation31], %s4947_s6  ;;  %s7770_s17 = sld [smem:[#allocation44_spill]] }
 0x12a   : > { %6812 = vsyncadd (%p7769_p10), [#allocation30], 4294959104 }
 0x12f   : > { %p4962_p4 = scmp.ne.s32.totalorder %s7770_s17, 0 }
 0x130   : > { %s7771_s22 = sld [smem:[#allocation56_spill]] (!%p4962_p4) }
 0x131   : > { %929 = sbr.rel (%p4962_p4) target bundleno = 910 (0x38e), region = 164  ;;  %s7772_s5 = sld [smem:[#allocation60_spill]] (!%p4962_p4) }
 0x132   : > { %s7773_s6 = sld [smem:[#allocation66_spill]] (!%p4962_p4) }
 0x136   : > { %v930_v0 = vld [vmem:[%s803_s18] sm:$0xff]  ;;  %v931_v1 = vld [vmem:[%s803_s18 + $0x8] sm:$0xff] }
 0x137   : > { %v932_v2 = vunpack.c.l.bf16 %v930_v0  ;;  %v933_v3 = vunpack.c.h.bf16 %v930_v0  ;;  %v934_v4 = vunpack.c.l.bf16 %v931_v1  ;;  %v935_v5 = vunpack.c.h.bf16 %v931_v1  ;;  %v5709_v8 = vld [vmem:[#allocation19 + $0xe4] ss:$16 sps:$4 sm:$0xff]   ;;  %v5711_v9 = vld [vmem:[#allocation19 + $0xec] ss:$16 sps:$4 sm:$0xff]   ;;  %v5713_v10 = vld [vmem:[#allocation19 + $0xe0] ss:$16 sps:$4 sm:$0xff]  }
 0x138   : > { %v5714_v11 = vld [vmem:[#allocation19 + $0xe8] ss:$16 sps:$4 sm:$0xff]   ;;  %v5715_v12 = vld [vmem:[#allocation19 + $0xc4] ss:$16 sps:$4 sm:$0xff]   ;;  %v5717_v13 = vld [vmem:[#allocation19 + $0xcc] ss:$16 sps:$4 sm:$0xff]   ;;  %1424 = vmatprep.subr.bf16.mxu0 %v5709_v8  ;;  %1467 = vmatprep.subr.bf16.mxu1 %v5711_v9 }
 0x139   : > { %v938_v6 = vadd.f32 %v933_v3, %v932_v2  ;;  %v941_v7 = vadd.f32 %v935_v5, %v934_v4  ;;  %1425 = vmatpush1.bf16.msra.mxu0 %v5713_v10  ;;  %1468 = vmatpush1.bf16.msra.mxu1 %v5714_v11  ;;  %v5719_v14 = vld [vmem:[#allocation19 + $0xc0] ss:$16 sps:$4 sm:$0xff]   ;;  %v5720_v15 = vld [vmem:[#allocation19 + $0xc8] ss:$16 sps:$4 sm:$0xff]   ;;  %v5721_v16 = vld [vmem:[#allocation19 + $0xa4] ss:$16 sps:$4 sm:$0xff]  }
 0x13a   : > { %1426 = vmatprep.subr.bf16.mxu0 %v5715_v12  ;;  %1469 = vmatprep.subr.bf16.mxu1 %v5717_v13  ;;  %v5723_v17 = vld [vmem:[#allocation19 + $0xac] ss:$16 sps:$4 sm:$0xff]   ;;  %v5725_v18 = vld [vmem:[#allocation19 + $0xa0] ss:$16 sps:$4 sm:$0xff]   ;;  %v5726_v19 = vld [vmem:[#allocation19 + $0xa8] ss:$16 sps:$4 sm:$0xff]  }
 0x13b   : > { %939 = vadd.xlane.f32.xlu0 %v938_v6  ;;  %v5727_v20 = vld [vmem:[#allocation19 + $0x84] ss:$16 sps:$4 sm:$0xff]   ;;  %v5729_v21 = vld [vmem:[#allocation19 + $0x8c] ss:$16 sps:$4 sm:$0xff]   ;;  %v5731_v22 = vld [vmem:[#allocation19 + $0x80] ss:$16 sps:$4 sm:$0xff]  }
 0x13c   : > { %v5732_v23 = vld [vmem:[#allocation19 + $0x88] ss:$16 sps:$4 sm:$0xff]   ;;  %v5733_v24 = vld [vmem:[#allocation19 + $0x64] ss:$16 sps:$4 sm:$0xff]   ;;  %v5735_v25 = vld [vmem:[#allocation19 + $0x6c] ss:$16 sps:$4 sm:$0xff]  }
 0x13d   : > { %1427 = vmatpush1.bf16.msra.mxu0 %v5719_v14  ;;  %1470 = vmatpush1.bf16.msra.mxu1 %v5720_v15  ;;  %v5737_v26 = vld [vmem:[#allocation19 + $0x60] ss:$16 sps:$4 sm:$0xff]   ;;  %v5738_v27 = vld [vmem:[#allocation19 + $0x68] ss:$16 sps:$4 sm:$0xff]   ;;  %v5739_v42 = vld [vmem:[#allocation19 + $0x44] ss:$16 sps:$4 sm:$0xff]  }
 0x13e   : > { %1428 = vmatprep.subr.bf16.mxu0 %v5721_v16  ;;  %1471 = vmatprep.subr.bf16.mxu1 %v5723_v17  ;;  %v5741_v43 = vld [vmem:[#allocation19 + $0x4c] ss:$16 sps:$4 sm:$0xff]   ;;  %v5743_v44 = vld [vmem:[#allocation19 + $0x40] ss:$16 sps:$4 sm:$0xff]   ;;  %v5744_v45 = vld [vmem:[#allocation19 + $0x48] ss:$16 sps:$4 sm:$0xff]  }
 0x13f   : > { %942 = vadd.xlane.f32.xlu0 %v941_v7  ;;  %v5745_v46 = vld [vmem:[#allocation19 + $0x24] ss:$16 sps:$4 sm:$0xff]   ;;  %v5747_v47 = vld [vmem:[#allocation19 + $0x2c] ss:$16 sps:$4 sm:$0xff]   ;;  %v5749_v48 = vld [vmem:[#allocation19 + $0x20] ss:$16 sps:$4 sm:$0xff]  }
 0x140   : > { %v5750_v49 = vld [vmem:[#allocation19 + $0x28] ss:$16 sps:$4 sm:$0xff]   ;;  %v5751_v50 = vld [vmem:[#allocation19 + $0x4] ss:$16 sps:$4 sm:$0xff]   ;;  %v5753_v51 = vld [vmem:[#allocation19 + $0xc] ss:$16 sps:$4 sm:$0xff]  }
 0x141   : > { %1429 = vmatpush1.bf16.msra.mxu0 %v5725_v18  ;;  %1472 = vmatpush1.bf16.msra.mxu1 %v5726_v19  ;;  %v5755_v52 = vld [vmem:[#allocation19] ss:$16 sps:$4 sm:$0xff]   ;;  %v5756_v53 = vld [vmem:[#allocation19 + $0x8] ss:$16 sps:$4 sm:$0xff]   ;;  %v5757_v54 = vld [vmem:[#allocation19 + $0x1e4] ss:$16 sps:$4 sm:$0xff]  }
 0x142   : > { %1430 = vmatprep.subr.bf16.mxu0 %v5727_v20  ;;  %1473 = vmatprep.subr.bf16.mxu1 %v5729_v21  ;;  %v5759_v55 = vld [vmem:[#allocation19 + $0x1ec] ss:$16 sps:$4 sm:$0xff]   ;;  %v5761_v56 = vld [vmem:[#allocation19 + $0x1e0] ss:$16 sps:$4 sm:$0xff]   ;;  %v5762_v57 = vld [vmem:[#allocation19 + $0x1e8] ss:$16 sps:$4 sm:$0xff]  }
 0x143   : > { %v5763_v58 = vld [vmem:[#allocation19 + $0x1c4] ss:$16 sps:$4 sm:$0xff]   ;;  %v5765_v59 = vld [vmem:[#allocation19 + $0x1cc] ss:$16 sps:$4 sm:$0xff]   ;;  %v5767_v60 = vld [vmem:[#allocation19 + $0x1c0] ss:$16 sps:$4 sm:$0xff]  }
 0x144   : > { %v5768_v61 = vld [vmem:[#allocation19 + $0x1c8] ss:$16 sps:$4 sm:$0xff]   ;;  %v5769_v62 = vld [vmem:[#allocation19 + $0x1a4] ss:$16 sps:$4 sm:$0xff]   ;;  %v5771_v63 = vld [vmem:[#allocation19 + $0x1ac] ss:$16 sps:$4 sm:$0xff]  }
 0x145   : > { %1431 = vmatpush1.bf16.msra.mxu0 %v5731_v22  ;;  %1474 = vmatpush1.bf16.msra.mxu1 %v5732_v23  ;;  %v5773_v0 = vld [vmem:[#allocation19 + $0x1a0] ss:$16 sps:$4 sm:$0xff]   ;;  %v5774_v1 = vld [vmem:[#allocation19 + $0x1a8] ss:$16 sps:$4 sm:$0xff]   ;;  %v5781_v6 = vld [vmem:[#allocation19 + $0x164] ss:$16 sps:$4 sm:$0xff]  }
 0x146   : > { %1432 = vmatprep.subr.bf16.mxu0 %v5733_v24  ;;  %1475 = vmatprep.subr.bf16.mxu1 %v5735_v25  ;;  %v5783_v7 = vld [vmem:[#allocation19 + $0x16c] ss:$16 sps:$4 sm:$0xff]   ;;  %v5785_v8 = vld [vmem:[#allocation19 + $0x160] ss:$16 sps:$4 sm:$0xff]   ;;  %v5786_v9 = vld [vmem:[#allocation19 + $0x168] ss:$16 sps:$4 sm:$0xff]  }
 0x147   : > { %v5787_v10 = vld [vmem:[#allocation19 + $0x144] ss:$16 sps:$4 sm:$0xff]   ;;  %v5789_v11 = vld [vmem:[#allocation19 + $0x14c] ss:$16 sps:$4 sm:$0xff]   ;;  %v5791_v12 = vld [vmem:[#allocation19 + $0x140] ss:$16 sps:$4 sm:$0xff]  }
 0x148   : > { %v5792_v13 = vld [vmem:[#allocation19 + $0x148] ss:$16 sps:$4 sm:$0xff]   ;;  %v5793_v14 = vld [vmem:[#allocation19 + $0x124] ss:$16 sps:$4 sm:$0xff]   ;;  %v5795_v15 = vld [vmem:[#allocation19 + $0x12c] ss:$16 sps:$4 sm:$0xff]  }
 0x149   : > { %1433 = vmatpush1.bf16.msra.mxu0 %v5737_v26  ;;  %1476 = vmatpush1.bf16.msra.mxu1 %v5738_v27  ;;  %v5797_v16 = vld [vmem:[#allocation19 + $0x120] ss:$16 sps:$4 sm:$0xff]   ;;  %v5798_v17 = vld [vmem:[#allocation19 + $0x128] ss:$16 sps:$4 sm:$0xff]   ;;  %v5799_v18 = vld [vmem:[#allocation19 + $0x104] ss:$16 sps:$4 sm:$0xff]  }
 0x14a   : > { %1434 = vmatprep.subr.bf16.mxu0 %v5739_v42  ;;  %1477 = vmatprep.subr.bf16.mxu1 %v5741_v43  ;;  %v5801_v19 = vld [vmem:[#allocation19 + $0x10c] ss:$16 sps:$4 sm:$0xff]   ;;  %v5803_v20 = vld [vmem:[#allocation19 + $0x100] ss:$16 sps:$4 sm:$0xff]   ;;  %v5804_v21 = vld [vmem:[#allocation19 + $0x108] ss:$16 sps:$4 sm:$0xff]  }
 0x14b   : > { %v5807_v22 = vld [vmem:[#allocation25 + $0xe4] ss:$16 sps:$4 sm:$0xff]   ;;  %v5810_v23 = vld [vmem:[#allocation25 + $0xec] ss:$16 sps:$4 sm:$0xff]  }
 0x14d   : > { %1435 = vmatpush1.bf16.msra.mxu0 %v5743_v44  ;;  %1478 = vmatpush1.bf16.msra.mxu1 %v5744_v45 }
 0x14e   : > { %1436 = vmatprep.subr.bf16.mxu0 %v5745_v46  ;;  %1479 = vmatprep.subr.bf16.mxu1 %v5747_v47 }
 0x151   : > { %1437 = vmatpush1.bf16.msra.mxu0 %v5749_v48  ;;  %1480 = vmatpush1.bf16.msra.mxu1 %v5750_v49  ;;  %v936_v48 = vld [vmem:[#allocation14] ss:$4 sm:$0x3] }
 0x152   : > { %1438 = vmatprep.subr.bf16.mxu0 %v5751_v50  ;;  %1481 = vmatprep.subr.bf16.mxu1 %v5753_v51 }
 0x155   : > { %1439 = vmatpush1.bf16.msra.mxu0 %v5755_v52  ;;  %1482 = vmatpush1.bf16.msra.mxu1 %v5756_v53  ;;  %v937_v52 = vld [vmem:[%s7771_s22] ss:$4 sm:$0x3] }
 0x156   : > { %1440 = vmatprep.subr.bf16.mxu0 %v5757_v54  ;;  %1483 = vmatprep.subr.bf16.mxu1 %v5759_v55 }
 0x159   : > { %1441 = vmatpush2.bf16.msra.mxu0 %v5761_v56  ;;  %1484 = vmatpush2.bf16.msra.mxu1 %v5762_v57 }
 0x15a   : > { %1442 = vmatprep.subr.bf16.mxu0 %v5763_v58  ;;  %1485 = vmatprep.subr.bf16.mxu1 %v5765_v59 }
 0x15d   : > { %1443 = vmatpush2.bf16.msra.mxu0 %v5767_v60  ;;  %1486 = vmatpush2.bf16.msra.mxu1 %v5768_v61 }
 0x15e   : > { %1444 = vmatprep.subr.bf16.mxu0 %v5769_v62  ;;  %1487 = vmatprep.subr.bf16.mxu1 %v5771_v63 }
 0x161   : > { %1445 = vmatpush2.bf16.msra.mxu0 %v5773_v0  ;;  %1488 = vmatpush2.bf16.msra.mxu1 %v5774_v1 }
 0x1c4   : > { %v940_v28 = vpop.xlane.xlu0 %939 }
 0x1c5   : > { %v945_v29 = vmul.f32 0.00390625, %v940_v28 }
 0x1c7   : > { %v7349_v30 = vsub.f32 %v932_v2, %v945_v29  ;;  %v7351_v31 = vsub.f32 %v933_v3, %v945_v29  ;;  %v5775_v2 = vld [vmem:[#allocation19 + $0x184] ss:$16 sps:$4 sm:$0xff]   ;;  %v5777_v3 = vld [vmem:[#allocation19 + $0x18c] ss:$16 sps:$4 sm:$0xff]  }
 0x1c8   : > { %v943_v32 = vpop.xlane.xlu0 %942  ;;  %1446 = vmatprep.subr.bf16.mxu0 %v5775_v2  ;;  %1489 = vmatprep.subr.bf16.mxu1 %v5777_v3 }
 0x1c9   : > { %v946_v33 = vmul.f32 0.00390625, %v943_v32  ;;  %v951_v34 = vmul.f32 %v7349_v30, %v7349_v30  ;;  %v952_v35 = vmul.f32 %v7351_v31, %v7351_v31 }
 0x1cb   : > { %v7357_v36 = vsub.f32 %v934_v4, %v946_v33  ;;  %v7359_v37 = vsub.f32 %v935_v5, %v946_v33  ;;  %v955_v38 = vadd.f32 %v952_v35, %v951_v34  ;;  %v5779_v4 = vld [vmem:[#allocation19 + $0x180] ss:$16 sps:$4 sm:$0xff]   ;;  %v5780_v5 = vld [vmem:[#allocation19 + $0x188] ss:$16 sps:$4 sm:$0xff]  }
 0x1cc   : > { %1447 = vmatpush2.bf16.msra.mxu0 %v5779_v4  ;;  %1490 = vmatpush2.bf16.msra.mxu1 %v5780_v5  ;;  %v5808_v4 = vld [vmem:[#allocation25 + $0xe8] ss:$16 sps:$4 sm:$0xff]   ;;  %v5813_v5 = vld [vmem:[#allocation25 + $0xc4] ss:$16 sps:$4 sm:$0xff]  }
 0x1cd   : > { %v953_v39 = vmul.f32 %v7357_v36, %v7357_v36  ;;  %v954_v40 = vmul.f32 %v7359_v37, %v7359_v37  ;;  %956 = vadd.xlane.f32.xlu1 %v955_v38  ;;  %1448 = vmatprep.subr.bf16.mxu0 %v5781_v6  ;;  %v979_v38 = vlaneseq  ;;  %v5816_v6 = vld [vmem:[#allocation25 + $0xcc] ss:$16 sps:$4 sm:$0xff]  }
 0x1ce   : > { %1491 = vmatprep.subr.bf16.mxu1 %v5783_v7 }
 0x1cf   : > { %v958_v41 = vadd.f32 %v954_v40, %v953_v39  ;;  %v7365_v44 = vshrl.u32 %v979_v38, 7  ;;  %v5855_v38 = vld [vmem:[#allocation25 + $0x1e4] ss:$16 sps:$4 sm:$0xff]  }
 0x1d0   : > { %1449 = vmatpush2.bf16.msra.mxu0 %v5785_v8  ;;  %1492 = vmatpush2.bf16.msra.mxu1 %v5786_v9  ;;  %v5811_v8 = vld [vmem:[#allocation25 + $0xc0] ss:$16 sps:$4 sm:$0xff]   ;;  %v5814_v9 = vld [vmem:[#allocation25 + $0xc8] ss:$16 sps:$4 sm:$0xff]  }
 0x1d1   : > { %959 = vadd.xlane.f32.xlu1 %v958_v41  ;;  %1450 = vmatprep.subr.bf16.mxu0 %v5787_v10  ;;  %v7368_v46 = vsub.s32 0, %v7365_v44  ;;  %v7371_v47 = vsub.s32 1, %v7365_v44  ;;  %v5819_v10 = vld [vmem:[#allocation25 + $0xa4] ss:$16 sps:$4 sm:$0xff]  }
 0x1d2   : > { %1493 = vmatprep.subr.bf16.mxu1 %v5789_v11  ;;  %v5822_v11 = vld [vmem:[#allocation25 + $0xac] ss:$16 sps:$4 sm:$0xff]  }
 0x1d3   : > { %v982_v49 = vrot.slane %v936_v48, %v7368_v46  ;;  %v986_v50 = vrot.slane %v936_v48, %v7371_v47  ;;  %v1005_v58 = vrot.slane %v937_v52, %v7368_v46  ;;  %v1009_v59 = vrot.slane %v937_v52, %v7371_v47  ;;  %v5862_v48 = vld [vmem:[#allocation25 + $0x1c8] ss:$16 sps:$4 sm:$0xff]  }
 0x1d4   : > { %1451 = vmatpush2.bf16.msra.mxu0 %v5791_v12  ;;  %1494 = vmatpush2.bf16.msra.mxu1 %v5792_v13  ;;  %v5817_v12 = vld [vmem:[#allocation25 + $0xa0] ss:$16 sps:$4 sm:$0xff]   ;;  %v5820_v13 = vld [vmem:[#allocation25 + $0xa8] ss:$16 sps:$4 sm:$0xff]  }
 0x1d5   : > { %1452 = vmatprep.subr.bf16.mxu0 %v5793_v14  ;;  %1495 = vmatprep.subr.bf16.mxu1 %v5795_v15  ;;  %v989_v53 = vmul.f32 %v982_v49, %v7349_v30  ;;  %v990_v54 = vmul.f32 %v986_v50, %v7351_v31  ;;  %v991_v55 = vmul.f32 %v982_v49, %v7357_v36  ;;  %v7386_v30 = vld [vmem:[%s812_s24] sm:$0xff] }
 0x1d6   : > { %v992_v56 = vmul.f32 %v986_v50, %v7359_v37  ;;  %v5805_v36 = vld [vmem:[#allocation25 + $0xe0] ss:$16 sps:$4 sm:$0xff]   ;;  %v5036_v7 = vcombine.high %v7386_v30, %v7386_v30  ;;  %v5825_v14 = vld [vmem:[#allocation25 + $0x84] ss:$16 sps:$4 sm:$0xff]   ;;  %v5828_v15 = vld [vmem:[#allocation25 + $0x8c] ss:$16 sps:$4 sm:$0xff]  }
 0x1d7   : > { %v5867_v49 = vld [vmem:[#allocation25 + $0x1a4] ss:$16 sps:$4 sm:$0xff]   ;;  %v5870_v50 = vld [vmem:[#allocation25 + $0x1ac] ss:$16 sps:$4 sm:$0xff]   ;;  %v5868_v52 = vld [vmem:[#allocation25 + $0x1a8] ss:$16 sps:$4 sm:$0xff]  }
 0x1d8   : > { %1453 = vmatpush2.bf16.msra.mxu0 %v5797_v16  ;;  %1496 = vmatpush2.bf16.msra.mxu1 %v5798_v17  ;;  %v5823_v16 = vld [vmem:[#allocation25 + $0x80] ss:$16 sps:$4 sm:$0xff]   ;;  %v5826_v17 = vld [vmem:[#allocation25 + $0x88] ss:$16 sps:$4 sm:$0xff]  }
 0x1d9   : > { %1454 = vmatprep.subr.bf16.mxu0 %v5799_v18  ;;  %1497 = vmatprep.subr.bf16.mxu1 %v5801_v19  ;;  %v5831_v18 = vld [vmem:[#allocation25 + $0x64] ss:$16 sps:$4 sm:$0xff]   ;;  %v5834_v19 = vld [vmem:[#allocation25 + $0x6c] ss:$16 sps:$4 sm:$0xff]  }
 0x1dc   : > { %1455 = vmatpush2.bf16.msra.mxu0 %v5803_v20  ;;  %1498 = vmatpush2.bf16.msra.mxu1 %v5804_v21  ;;  %v5829_v20 = vld [vmem:[#allocation25 + $0x60] ss:$16 sps:$4 sm:$0xff]   ;;  %v5832_v21 = vld [vmem:[#allocation25 + $0x68] ss:$16 sps:$4 sm:$0xff]  }
 0x1dd   : > { %1964 = vmatprep.subr.bf16.mxu0 %v5807_v22  ;;  %2005 = vmatprep.subr.bf16.mxu1 %v5810_v23  ;;  %v5837_v22 = vld [vmem:[#allocation25 + $0x44] ss:$16 sps:$4 sm:$0xff]   ;;  %v5840_v23 = vld [vmem:[#allocation25 + $0x4c] ss:$16 sps:$4 sm:$0xff]  }
 0x256   : > { %v957_v24 = vpop.xlane.xlu1 %956 }
 0x257   : > { %v962_v25 = vmul.f32 0.003921569, %v957_v24  ;;  %v5835_v24 = vld [vmem:[#allocation25 + $0x40] ss:$16 sps:$4 sm:$0xff]  }
 0x259   : > { %5903 = vrsqrt.f32 %v962_v25  ;;  %vm966_vm0 = vcmp.eq.f32.partialorder %v962_v25, inf  ;;  %v969_v32 = vand.u32 2147483648, %v962_v25  ;;  %vm968_vm1 = vcmp.eq.f32.partialorder %v962_v25, 0.0 }
 0x25a   : > { %v960_v26 = vpop.xlane.xlu1 %959 }
 0x25b   : > { %v963_v27 = vmul.f32 0.003921569, %v960_v26  ;;  %v5843_v26 = vld [vmem:[#allocation25 + $0x24] ss:$16 sps:$4 sm:$0xff]  }
 0x25d   : > { %5905 = vrsqrt.f32 %v963_v27  ;;  %vm973_vm2 = vcmp.eq.f32.partialorder %v963_v27, inf  ;;  %v976_v41 = vand.u32 2147483648, %v963_v27  ;;  %vm975_vm3 = vcmp.eq.f32.partialorder %v963_v27, 0.0 }
 0x266   : > { %v5904_v28 = vpop.eup %5903 }
 0x267   : > { %v965_v29 = vmul.f32 %v5904_v28, %v962_v25  ;;  %v5841_v28 = vld [vmem:[#allocation25 + $0x20] ss:$16 sps:$4 sm:$0xff]  }
 0x269   : > { %v967_v33 = vsel %vm966_vm0, %v962_v25, %v965_v29  ;;  %v5838_v25 = vld [vmem:[#allocation25 + $0x48] ss:$16 sps:$4 sm:$0xff]  }
 0x26a   : > { %v5906_v34 = vpop.eup %5905  ;;  %v970_v35 = vsel %vm968_vm1, %v969_v32, %v967_v33  ;;  %v5844_v29 = vld [vmem:[#allocation25 + $0x28] ss:$16 sps:$4 sm:$0xff]   ;;  %v5849_v32 = vld [vmem:[#allocation25 + $0x4] ss:$16 sps:$4 sm:$0xff]   ;;  %v5852_v33 = vld [vmem:[#allocation25 + $0xc] ss:$16 sps:$4 sm:$0xff]  }
 0x26b   : > { %v972_v39 = vmul.f32 %v5906_v34, %v963_v27  ;;  %v993_v40 = vadd.f32 1e-06, %v970_v35  ;;  %v5847_v34 = vld [vmem:[#allocation25] ss:$16 sps:$4 sm:$0xff]   ;;  %v5850_v35 = vld [vmem:[#allocation25 + $0x8] ss:$16 sps:$4 sm:$0xff]  }
 0x26d   : > { %v974_v42 = vsel %vm973_vm2, %v963_v27, %v972_v39  ;;  %5907 = vrcp.f32 %v993_v40  ;;  %v5846_v27 = vld [vmem:[#allocation25 + $0x2c] ss:$16 sps:$4 sm:$0xff]   ;;  %v5853_v40 = vld [vmem:[#allocation25 + $0x1e0] ss:$16 sps:$4 sm:$0xff]  }
 0x26e   : > { %v977_v43 = vsel %vm975_vm3, %v976_v41, %v974_v42  ;;  %v5858_v39 = vld [vmem:[#allocation25 + $0x1ec] ss:$16 sps:$4 sm:$0xff]   ;;  %v5856_v41 = vld [vmem:[#allocation25 + $0x1e8] ss:$16 sps:$4 sm:$0xff]   ;;  %v5861_v42 = vld [vmem:[#allocation25 + $0x1c4] ss:$16 sps:$4 sm:$0xff]  }
 0x26f   : > { %v994_v45 = vadd.f32 1e-06, %v977_v43  ;;  %v5864_v43 = vld [vmem:[#allocation25 + $0x1cc] ss:$16 sps:$4 sm:$0xff]  }
 0x271   : > { %5909 = vrcp.f32 %v994_v45  ;;  %v5859_v45 = vld [vmem:[#allocation25 + $0x1c0] ss:$16 sps:$4 sm:$0xff]  }
 0x27a   : > { %v5908_v51 = vpop.eup %5907 }
 0x27b   : > { %v997_v57 = vmul.f32 %v5908_v51, %v990_v54  ;;  %v996_v60 = vmul.f32 %v5908_v51, %v989_v53  ;;  %v5865_v51 = vld [vmem:[#allocation25 + $0x1a0] ss:$16 sps:$4 sm:$0xff]   ;;  %v5873_v53 = vld [vmem:[#allocation25 + $0x184] ss:$16 sps:$4 sm:$0xff]   ;;  %v5876_v54 = vld [vmem:[#allocation25 + $0x18c] ss:$16 sps:$4 sm:$0xff]  }
 0x27d   : > { %v1013_v0 = vadd.f32 %v1009_v59, %v997_v57  ;;  %v1012_v2 = vadd.f32 %v1005_v58, %v996_v60  ;;  %v5879_v57 = vld [vmem:[#allocation25 + $0x164] ss:$16 sps:$4 sm:$0xff]   ;;  %v5880_v60 = vld [vmem:[#allocation25 + $0x168] ss:$16 sps:$4 sm:$0xff]  }
 0x27e   : > { %v5910_v61 = vpop.eup %5909 }
 0x27f   : > { %v1000_v62 = vmul.f32 %v5910_v61, %v992_v56  ;;  %v999_v63 = vmul.f32 %v5910_v61, %v991_v55  ;;  %v5871_v55 = vld [vmem:[#allocation25 + $0x180] ss:$16 sps:$4 sm:$0xff]   ;;  %v5874_v56 = vld [vmem:[#allocation25 + $0x188] ss:$16 sps:$4 sm:$0xff]   ;;  %v5885_v61 = vld [vmem:[#allocation25 + $0x144] ss:$16 sps:$4 sm:$0xff]  }
 0x281   : > { %v1015_v1 = vadd.f32 %v1009_v59, %v1000_v62  ;;  %v1014_v3 = vadd.f32 %v1005_v58, %v999_v63  ;;  %v5882_v58 = vld [vmem:[#allocation25 + $0x16c] ss:$16 sps:$4 sm:$0xff]   ;;  %v5877_v59 = vld [vmem:[#allocation25 + $0x160] ss:$16 sps:$4 sm:$0xff]  }
 0x282   : > { %v5888_v62 = vld [vmem:[#allocation25 + $0x14c] ss:$16 sps:$4 sm:$0xff]   ;;  %v5883_v63 = vld [vmem:[#allocation25 + $0x140] ss:$16 sps:$4 sm:$0xff]  }
 0x283   : > { %v1082_v31 = vpack.c.bf16 %v1015_v1, %v1013_v0  ;;  %v1081_v37 = vpack.c.bf16 %v1014_v3, %v1012_v2  ;;  %v5886_v0 = vld [vmem:[#allocation25 + $0x148] ss:$16 sps:$4 sm:$0xff]   ;;  %v5891_v1 = vld [vmem:[#allocation25 + $0x124] ss:$16 sps:$4 sm:$0xff]   ;;  %v5894_v2 = vld [vmem:[#allocation25 + $0x12c] ss:$16 sps:$4 sm:$0xff]  }
 0x284   : > { %v5889_v3 = vld [vmem:[#allocation25 + $0x120] ss:$16 sps:$4 sm:$0xff]  }
 0x285   : > { %1456 = vmatprep.mubr.bf16.mxu0 %v1082_v31  ;;  %1499 = vmatprep.mubr.bf16.mxu1 %v1082_v31  ;;  %v5892_v31 = vld [vmem:[#allocation25 + $0x128] ss:$16 sps:$4 sm:$0xff]  }
 0x286   : > { %1457 = vmatmul.mubr.bf16.vlgmr.msra.gmra.mxu0 %v1081_v37  ;;  %1500 = vmatmul.mubr.bf16.vlgmr.msra.gmra.mxu1 %v1081_v37  ;;  %v5895_v37 = vld [vmem:[#allocation25 + $0x100] ss:$16 sps:$4 sm:$0xff]  }
 0x287   : > { %1965 = vmatpush1.bf16.msra.mxu0 %v5805_v36  ;;  %2006 = vmatpush1.bf16.msra.mxu1 %v5808_v4  ;;  %v5897_v36 = vld [vmem:[#allocation25 + $0x104] ss:$16 sps:$4 sm:$0xff]   ;;  %v5900_v4 = vld [vmem:[#allocation25 + $0x10c] ss:$16 sps:$4 sm:$0xff]  }
 0x288   : > { %1966 = vmatprep.subr.bf16.mxu0 %v5813_v5  ;;  %2007 = vmatprep.subr.bf16.mxu1 %v5816_v6  ;;  %v5898_v5 = vld [vmem:[#allocation25 + $0x108] ss:$16 sps:$4 sm:$0xff]   ;;  %v5035_v6 = vcombine.low %v7386_v30, %v7386_v30 }
 0x289   : > { %1996 = vmatprep.mubr.bf16.mxu0 %v5036_v7  ;;  %2037 = vmatprep.mubr.bf16.mxu1 %v5036_v7  ;;  %v1094_v7 = vsub.s32 2, %v7365_v44 }
 0x28b   : > { %1967 = vmatpush1.bf16.msra.mxu0 %v5811_v8  ;;  %2008 = vmatpush1.bf16.msra.mxu1 %v5814_v9  ;;  %v1080_v8 = vld [vmem:[%s7772_s5] sm:$0xf]  ;;  %v1098_v9 = vsub.s32 3, %v7365_v44 }
 0x28c   : > { %1968 = vmatprep.subr.bf16.mxu0 %v5819_v10  ;;  %2009 = vmatprep.subr.bf16.mxu1 %v5822_v11 }
 0x28f   : > { %1969 = vmatpush1.bf16.msra.mxu0 %v5817_v12  ;;  %2010 = vmatpush1.bf16.msra.mxu1 %v5820_v13  ;;  %v1087_v12 = vrot.slane %v1080_v8, %v7368_v46  ;;  %v1095_v13 = vrot.slane %v1080_v8, %v1094_v7 }
 0x290   : > { %1970 = vmatprep.subr.bf16.mxu0 %v5825_v14  ;;  %2011 = vmatprep.subr.bf16.mxu1 %v5828_v15  ;;  %v1091_v14 = vrot.slane %v1080_v8, %v7371_v47  ;;  %v1099_v15 = vrot.slane %v1080_v8, %v1098_v9 }
 0x293   : > { %1971 = vmatpush1.bf16.msra.mxu0 %v5823_v16  ;;  %2012 = vmatpush1.bf16.msra.mxu1 %v5826_v17 }
 0x294   : > { %1972 = vmatprep.subr.bf16.mxu0 %v5831_v18  ;;  %2013 = vmatprep.subr.bf16.mxu1 %v5834_v19 }
 0x297   : > { %1973 = vmatpush1.bf16.msra.mxu0 %v5829_v20  ;;  %2014 = vmatpush1.bf16.msra.mxu1 %v5832_v21 }
 0x298   : > { %1974 = vmatprep.subr.bf16.mxu0 %v5837_v22  ;;  %2015 = vmatprep.subr.bf16.mxu1 %v5840_v23 }
 0x29b   : > { %1975 = vmatpush1.bf16.msra.mxu0 %v5835_v24  ;;  %2016 = vmatpush1.bf16.msra.mxu1 %v5838_v25 }
 0x29c   : > { %1976 = vmatprep.subr.bf16.mxu0 %v5843_v26  ;;  %2017 = vmatprep.subr.bf16.mxu1 %v5846_v27 }
 0x29f   : > { %1977 = vmatpush1.bf16.msra.mxu0 %v5841_v28  ;;  %2018 = vmatpush1.bf16.msra.mxu1 %v5844_v29 }
 0x2a0   : > { %1978 = vmatprep.subr.bf16.mxu0 %v5849_v32  ;;  %2019 = vmatprep.subr.bf16.mxu1 %v5852_v33 }
 0x2a3   : > { %1979 = vmatpush1.bf16.msra.mxu0 %v5847_v34  ;;  %2020 = vmatpush1.bf16.msra.mxu1 %v5850_v35  ;;  %v1615_v34 = vld [vmem:[%s7773_s6] sm:$0xf] }
 0x2a4   : > { %1980 = vmatprep.subr.bf16.mxu0 %v5855_v38  ;;  %2021 = vmatprep.subr.bf16.mxu1 %v5858_v39  ;;  %v1620_v35 = vrot.slane %v1615_v34, %v7368_v46  ;;  %v1628_v38 = vrot.slane %v1615_v34, %v1094_v7  ;;  %v1624_v39 = vrot.slane %v1615_v34, %v7371_v47 }
 0x2a7   : > { %1981 = vmatpush2.bf16.msra.mxu0 %v5853_v40  ;;  %2022 = vmatpush2.bf16.msra.mxu1 %v5856_v41  ;;  %v1632_v40 = vrot.slane %v1615_v34, %v1098_v9 }
 0x2a8   : > { %1982 = vmatprep.subr.bf16.mxu0 %v5861_v42  ;;  %2023 = vmatprep.subr.bf16.mxu1 %v5864_v43 }
 0x2ab   : > { %1983 = vmatpush2.bf16.msra.mxu0 %v5859_v45  ;;  %2024 = vmatpush2.bf16.msra.mxu1 %v5862_v48 }
 0x2ac   : > { %1984 = vmatprep.subr.bf16.mxu0 %v5867_v49  ;;  %2025 = vmatprep.subr.bf16.mxu1 %v5870_v50 }
 0x2af   : > { %1985 = vmatpush2.bf16.msra.mxu0 %v5865_v51  ;;  %2026 = vmatpush2.bf16.msra.mxu1 %v5868_v52 }
 0x2b0   : > { %1986 = vmatprep.subr.bf16.mxu0 %v5873_v53  ;;  %2027 = vmatprep.subr.bf16.mxu1 %v5876_v54 }
 0x2b3   : > { %1987 = vmatpush2.bf16.msra.mxu0 %v5871_v55  ;;  %2028 = vmatpush2.bf16.msra.mxu1 %v5874_v56 }
 0x2b4   : > { %1988 = vmatprep.subr.bf16.mxu0 %v5879_v57  ;;  %2029 = vmatprep.subr.bf16.mxu1 %v5882_v58 }
 0x2b7   : > { %1989 = vmatpush2.bf16.msra.mxu0 %v5877_v59  ;;  %2030 = vmatpush2.bf16.msra.mxu1 %v5880_v60 }
 0x2b8   : > { %1990 = vmatprep.subr.bf16.mxu0 %v5885_v61  ;;  %2031 = vmatprep.subr.bf16.mxu1 %v5888_v62 }
 0x2bb   : > { %1991 = vmatpush2.bf16.msra.mxu0 %v5883_v63  ;;  %2032 = vmatpush2.bf16.msra.mxu1 %v5886_v0 }
 0x2bc   : > { %1992 = vmatprep.subr.bf16.mxu0 %v5891_v1  ;;  %2033 = vmatprep.subr.bf16.mxu1 %v5894_v2 }
 0x2bf   : > { %1993 = vmatpush2.bf16.msra.mxu0 %v5889_v3  ;;  %2034 = vmatpush2.bf16.msra.mxu1 %v5892_v31 }
 0x2c0   : > { %1994 = vmatprep.subr.bf16.mxu0 %v5897_v36  ;;  %2035 = vmatprep.subr.bf16.mxu1 %v5900_v4 }
 0x2c3   : > { %1995 = vmatpush2.bf16.msra.mxu0 %v5895_v37  ;;  %2036 = vmatpush2.bf16.msra.mxu1 %v5898_v5 }
 0x2c6   : > { %1997 = vmatmul.mubr.bf16.vlgmr.msra.gmra.mxu0 %v5035_v6  ;;  %2038 = vmatmul.mubr.bf16.vlgmr.msra.gmra.mxu1 %v5035_v6 }
 0x346   : > { %v1458_v10 = vpop.f32.mrf.mxu0  ;;  %v1501_v11 = vpop.f32.mrf.mxu1 }
 0x347   : > { %v1459_v19 = vadd.f32 %v1458_v10, %v1087_v12  ;;  %v1502_v20 = vadd.f32 %v1501_v11, %v1095_v13 }
 0x348   : > { %v1460_v30 = vpop.f32.mrf.mxu0  ;;  %v1503_v16 = vpop.f32.mrf.mxu1 }
 0x349   : > { %v1461_v23 = vadd.f32 %v1460_v30, %v1091_v14  ;;  %v1504_v24 = vadd.f32 %v1503_v16, %v1099_v15 }
 0x34a   : > { %v1462_v17 = vpop.f32.mrf.mxu0  ;;  %v1505_v18 = vpop.f32.mrf.mxu1 }
 0x34b   : > { %v1463_v21 = vadd.f32 %v1462_v17, %v1087_v12  ;;  %v1506_v22 = vadd.f32 %v1505_v18, %v1095_v13 }
 0x34c   : > { %v1464_v25 = vpop.f32.mrf.mxu0  ;;  %v1507_v44 = vpop.f32.mrf.mxu1 }
 0x34d   : > { %v5385_v26 = vpack.c.bf16 %v1463_v21, %v1459_v19  ;;  %v5395_v27 = vpack.c.bf16 %v1506_v22, %v1502_v20  ;;  %v1465_v28 = vadd.f32 %v1464_v25, %v1091_v14  ;;  %v1508_v29 = vadd.f32 %v1507_v44, %v1099_v15 }
 0x34f   : > { %5386 = vst [vmem:[#allocation2] sm:$0xff] %v5385_v26   ;;  %5396 = vst [vmem:[#allocation3] sm:$0xff] %v5395_v27   ;;  %v5390_v32 = vpack.c.bf16 %v1465_v28, %v1461_v23  ;;  %v5400_v33 = vpack.c.bf16 %v1508_v29, %v1504_v24 }
 0x351   : > { %5412 = vst [vmem:[#allocation2 + $0x8] sm:$0xff] %v5390_v32   ;;  %5413 = vst [vmem:[#allocation3 + $0x8] sm:$0xff] %v5400_v33  }
 0x386   : > { %v1998_v41 = vpop.f32.mrf.mxu0  ;;  %v2039_v42 = vpop.f32.mrf.mxu1 }
 0x387   : > { %v1999_v48 = vadd.f32 %v1998_v41, %v1620_v35  ;;  %v2040_v49 = vadd.f32 %v2039_v42, %v1628_v38 }
 0x388   : > { %v2000_v43 = vpop.f32.mrf.mxu0  ;;  %v2041_v45 = vpop.f32.mrf.mxu1 }
 0x389   : > { %v2001_v50 = vadd.f32 %v2000_v43, %v1624_v39  ;;  %v2042_v51 = vadd.f32 %v2041_v45, %v1632_v40 }
 0x38a   : > { %v2002_v52 = vpop.f32.mrf.mxu0  ;;  %v2043_v53 = vpop.f32.mrf.mxu1 }
 0x38b   : > { %v5405_v54 = vpack.c.bf16 %v2001_v50, %v1999_v48  ;;  %v5410_v55 = vpack.c.bf16 %v2042_v51, %v2040_v49 }
 0x38c   : > { %v2003_v56 = vpop.f32.mrf.mxu0  ;;  %v2044_v57 = vpop.f32.mrf.mxu1 }
 0x38d   : > { %5406 = vst [vmem:[#allocation4] sm:$0xff] %v5405_v54   ;;  %5411 = vst [vmem:[#allocation5] sm:$0xff] %v5410_v55  }
 0x38e PF: > { %v2331_v46 = vld [vmem:[%s7307_s28] sm:$0xff]  ;;  %v2332_v47 = vld [vmem:[%s7307_s28 + $0x8] sm:$0xff]  ;;  %v6880_v32 = vmov 0.0   ;;  %v2055_v35 = vlaneseq  ;;  %s7774_s30 = sld [smem:[#allocation56_spill]]  ;;  %vm6881_vm6 = vmmov 0   ;;  %vm2722_vm8 = vcmask 130048  }
 0x38f   : > { %v2345_v58 = vadd.f32 %v2332_v47, %v2331_v46  ;;  %v5911_v59 = vld [vmem:[#allocation16 + $0x74] ss:$8 sps:$4 sm:$0xff]   ;;  %v5913_v60 = vld [vmem:[#allocation16 + $0x70] ss:$8 sps:$4 sm:$0xff]   ;;  %v5914_v61 = vld [vmem:[#allocation16 + $0x64] ss:$8 sps:$4 sm:$0xff]   ;;  %5430 = vmatprep.subr.bf16.mxu1 %v6880_v32  ;;  %5432 = vmatprep.mubr.msk.bf16.mxu1 %vm6881_vm6, %v6880_v32 }
 0x390   : > { %2585 = vmatprep.subr.bf16.mxu0 %v5911_v59  ;;  %v5916_v62 = vld [vmem:[#allocation16 + $0x60] ss:$8 sps:$4 sm:$0xff]   ;;  %v5917_v63 = vld [vmem:[#allocation16 + $0x54] ss:$8 sps:$4 sm:$0xff]   ;;  %v5919_v0 = vld [vmem:[#allocation16 + $0x50] ss:$8 sps:$4 sm:$0xff]  }
 0x391   : > { %2346 = vadd.xlane.f32.xlu0 %v2345_v58  ;;  %2586 = vmatpush1.bf16.msra.mxu0 %v5913_v60  ;;  %v5920_v1 = vld [vmem:[#allocation16 + $0x44] ss:$8 sps:$4 sm:$0xff]   ;;  %v5922_v2 = vld [vmem:[#allocation16 + $0x40] ss:$8 sps:$4 sm:$0xff]   ;;  %v5923_v3 = vld [vmem:[#allocation16 + $0x34] ss:$8 sps:$4 sm:$0xff]  }
 0x392   : > { %2587 = vmatprep.subr.bf16.mxu0 %v5914_v61  ;;  %v5925_v31 = vld [vmem:[#allocation16 + $0x30] ss:$8 sps:$4 sm:$0xff]   ;;  %v5926_v9 = vld [vmem:[#allocation16 + $0x24] ss:$8 sps:$4 sm:$0xff]   ;;  %v5928_v10 = vld [vmem:[#allocation16 + $0x20] ss:$8 sps:$4 sm:$0xff]  }
 0x393   : > { %v5929_v11 = vld [vmem:[#allocation16 + $0x14] ss:$8 sps:$4 sm:$0xff]   ;;  %v5931_v12 = vld [vmem:[#allocation16 + $0x10] ss:$8 sps:$4 sm:$0xff]   ;;  %v5932_v13 = vld [vmem:[#allocation16 + $0x4] ss:$8 sps:$4 sm:$0xff]  }
 0x394   : > { %v5934_v14 = vld [vmem:[#allocation16] ss:$8 sps:$4 sm:$0xff]   ;;  %v5935_v30 = vld [vmem:[#allocation16 + $0xf4] ss:$8 sps:$4 sm:$0xff]   ;;  %v5937_v15 = vld [vmem:[#allocation16 + $0xf0] ss:$8 sps:$4 sm:$0xff]  }
 0x395   : > { %2588 = vmatpush1.bf16.msra.mxu0 %v5916_v62  ;;  %v5938_v16 = vld [vmem:[#allocation16 + $0xe4] ss:$8 sps:$4 sm:$0xff]   ;;  %v5940_v17 = vld [vmem:[#allocation16 + $0xe0] ss:$8 sps:$4 sm:$0xff]   ;;  %v5941_v18 = vld [vmem:[#allocation16 + $0xd4] ss:$8 sps:$4 sm:$0xff]  }
 0x396   : > { %2589 = vmatprep.subr.bf16.mxu0 %v5917_v63  ;;  %v5943_v19 = vld [vmem:[#allocation16 + $0xd0] ss:$8 sps:$4 sm:$0xff]   ;;  %v5944_v20 = vld [vmem:[#allocation16 + $0xc4] ss:$8 sps:$4 sm:$0xff]   ;;  %v5946_v21 = vld [vmem:[#allocation16 + $0xc0] ss:$8 sps:$4 sm:$0xff]  }
 0x397   : > { %v5947_v22 = vld [vmem:[#allocation16 + $0xb4] ss:$8 sps:$4 sm:$0xff]   ;;  %v5949_v23 = vld [vmem:[#allocation16 + $0xb0] ss:$8 sps:$4 sm:$0xff]   ;;  %v5950_v24 = vld [vmem:[#allocation16 + $0xa4] ss:$8 sps:$4 sm:$0xff]  }
 0x398   : > { %v5952_v25 = vld [vmem:[#allocation16 + $0xa0] ss:$8 sps:$4 sm:$0xff]   ;;  %v5953_v44 = vld [vmem:[#allocation16 + $0x94] ss:$8 sps:$4 sm:$0xff]   ;;  %v5955_v26 = vld [vmem:[#allocation16 + $0x90] ss:$8 sps:$4 sm:$0xff]  }
 0x399   : > { %2590 = vmatpush1.bf16.msra.mxu0 %v5919_v0  ;;  %v5956_v27 = vld [vmem:[#allocation16 + $0x84] ss:$8 sps:$4 sm:$0xff]   ;;  %v5958_v28 = vld [vmem:[#allocation16 + $0x80] ss:$8 sps:$4 sm:$0xff]   ;;  %v5959_v29 = vld [vmem:[#allocation2] sm:$0xff]   ;;  %v7416_v41 = vshrl.u32 %v2055_v35, 7 }
 0x39a   : > { %2591 = vmatprep.subr.bf16.mxu0 %v5920_v1  ;;  %5431 = vmatpush3.bf16.xpose.msra.mxu1 %v5959_v29  ;;  %v7422_v50 = vld [vmem:[#allocation14] sm:$0x77]  ;;  %v7430_v53 = vld [vmem:[%s7774_s30] sm:$0x77]  ;;  %s7775_s27 = sld [smem:[#allocation44_spill]]  ;;  %vm3422_vm12 = vcmask 64512  }
 0x39b   : > { %5436 = vmatprep.subr.bf16.mxu1 %v6880_v32  ;;  %v7419_v48 = vsub.s32 0, %v7416_v41  ;;  %v2373_v49 = vsub.s32 4, %v7416_v41  ;;  %s7776_s14 = sld [smem:[#allocation64_spill]]  ;;  %vm3446_vm13 = vcmask 1043456   ;;  %s6883_s17 = smov [#allocation31]  }
 0x39c   : > { %s7777_s18 = sld [smem:[#allocation45_spill]] }
 0x39d   : > { %2592 = vmatpush1.bf16.msra.mxu0 %v5922_v2  ;;  %v2370_v51 = vrot.slane %v7422_v50, %v7419_v48  ;;  %v2374_v52 = vrot.slane %v7422_v50, %v2373_v49  ;;  %v2399_v56 = vrot.slane %v7430_v53, %v2373_v49  ;;  %v2395_v57 = vrot.slane %v7430_v53, %v7419_v48  ;;  %s7778_s2 = sld [smem:[#allocation68_spill]] }
 0x39e   : > { %2593 = vmatprep.subr.bf16.mxu0 %v5923_v3  ;;  %v2101_v3 = vld [vmem:[#allocation17] sm:$0x3]  ;;  %s7779_s5 = sld [smem:[#allocation70_spill]] }
 0x39f   : > { %v2380_v54 = vrot.slane %v2370_v51, %v7419_v48  ;;  %v2384_v55 = vrot.slane %v2374_v52, %v7419_v48  ;;  %v2409_v58 = vrot.slane %v2399_v56, %v7419_v48  ;;  %v2405_v59 = vrot.slane %v2395_v57, %v7419_v48  ;;  %v5963_v56 = vld [vmem:[#allocation20 + $0x70] ss:$8 sps:$4 sm:$0xff]   ;;  %v5965_v57 = vld [vmem:[#allocation20 + $0x74] ss:$8 sps:$4 sm:$0xff]   ;;  %s7780_s6 = sld [smem:[#allocation72_spill]] }
 0x3a0   : > { %s5101_s10 = sshll.u32 %s7775_s27, 3  ;;  %s5367_s16 = sshll.u32 %s7775_s27, 1 }
 0x3a1   : > { %2594 = vmatpush1.bf16.msra.mxu0 %v5925_v31  ;;  %v2418_v31 = vrot.slane %v2101_v3, %v7419_v48 }
 0x3a2   : > { %2595 = vmatprep.subr.bf16.mxu0 %v5926_v9  ;;  %v5960_v9 = vld [vmem:[#allocation2 + $0x8] sm:$0xff]   ;;  %s2063_s0 = sld [smem:[#allocation7 + %s7777_s18]]  ;;  %s5368_s12 = sshll.u32 %s7777_s18, 2 }
 0x3a5   : > { %2596 = vmatpush1.bf16.msra.mxu0 %v5928_v10 }
 0x3a6   : > { %2597 = vmatprep.subr.bf16.mxu0 %v5929_v11 }
 0x3a9   : > { %2598 = vmatpush1.bf16.msra.mxu0 %v5931_v12 }
 0x3aa   : > { %2599 = vmatprep.subr.bf16.mxu0 %v5932_v13 }
 0x3ad   : > { %2600 = vmatpush1.bf16.msra.mxu0 %v5934_v14 }
 0x3ae   : > { %2601 = vmatprep.subr.bf16.mxu0 %v5935_v30  ;;  %v2057_v30 = vstv %s5101_s10 }
 0x3b1   : > { %2602 = vmatpush2.bf16.msra.mxu0 %v5937_v15  ;;  %v2058_v15 = vadd.s32 %v2057_v30, %v7416_v41  ;;  %v6002_v30 = vld [vmem:[#allocation20 + $0xa0] ss:$8 sps:$4 sm:$0xff]  }
 0x3b2   : > { %2603 = vmatprep.subr.bf16.mxu0 %v5938_v16  ;;  %v7455_v16 = vand.u32 127, %v2055_v35 }
 0x3b4   : > { %vm2061_vm7 = vcmp.ge.s32.totalorder %v2058_v15, %v7455_v16  ;;  %v6007_v15 = vld [vmem:[#allocation20 + $0x94] ss:$8 sps:$4 sm:$0xff]  }
 0x3b5   : > { %2604 = vmatpush2.bf16.msra.mxu0 %v5940_v17  ;;  %v6882_v17 = vmov -1e+09  }
 0x3b6   : > { %2605 = vmatprep.subr.bf16.mxu0 %v5941_v18  ;;  %v2062_v18 = vsel %vm2061_vm7, 0.0, %v6882_v17 }
 0x3b9   : > { %2606 = vmatpush2.bf16.msra.mxu0 %v5943_v19 }
 0x3ba   : > { %2607 = vmatprep.subr.bf16.mxu0 %v5944_v20 }
 0x3bd   : > { %2608 = vmatpush2.bf16.msra.mxu0 %v5946_v21 }
 0x3be   : > { %2609 = vmatprep.subr.bf16.mxu0 %v5947_v22 }
 0x3c1   : > { %2610 = vmatpush2.bf16.msra.mxu0 %v5949_v23 }
 0x3c2   : > { %2611 = vmatprep.subr.bf16.mxu0 %v5950_v24 }
 0x3c5   : > { %2612 = vmatpush2.bf16.msra.mxu0 %v5952_v25 }
 0x3c6   : > { %2613 = vmatprep.subr.bf16.mxu0 %v5953_v44 }
 0x3c9   : > { %2614 = vmatpush2.bf16.msra.mxu0 %v5955_v26 }
 0x3ca   : > { %2615 = vmatprep.subr.bf16.mxu0 %v5956_v27 }
 0x3cd   : > { %2616 = vmatpush2.bf16.msra.mxu0 %v5958_v28 }
 0x41a   : > { %v2347_v36 = vpop.xlane.xlu0 %2346 }
 0x41b   : > { %v2349_v4 = vmul.f32 0.00390625, %v2347_v36  ;;  %v7445_v36 = vsub.s32 1, %v7416_v41 }
 0x41d   : > { %v7406_v37 = vsub.f32 %v2331_v46, %v2349_v4  ;;  %v7408_v5 = vsub.f32 %v2332_v47, %v2349_v4 }
 0x41f   : > { %v2352_v6 = vmul.f32 %v7406_v37, %v7406_v37  ;;  %v2353_v7 = vmul.f32 %v7408_v5, %v7408_v5  ;;  %v2385_v46 = vmul.f32 %v2380_v54, %v7406_v37  ;;  %v2386_v47 = vmul.f32 %v2384_v55, %v7408_v5 }
 0x420   : > { %v2422_v5 = vrot.slane %v2101_v3, %v7445_v36  ;;  %v5981_v3 = vld [vmem:[#allocation20 + $0x10] ss:$8 sps:$4 sm:$0xff]  }
 0x421   : > { %v2354_v8 = vadd.f32 %v2353_v7, %v2352_v6 }
 0x423   : > { %2355 = vadd.xlane.f32.xlu0 %v2354_v8 }
 0x4ac   : > { %v2356_v33 = vpop.xlane.xlu0 %2355 }
 0x4ad   : > { %v2358_v34 = vmul.f32 0.003921569, %v2356_v33  ;;  %v5961_v33 = vld [vmem:[#allocation3] sm:$0xff]  }
 0x4af   : > { %6299 = vrsqrt.f32 %v2358_v34  ;;  %vm2361_vm4 = vcmp.eq.f32.partialorder %v2358_v34, inf  ;;  %v2364_v40 = vand.u32 2147483648, %v2358_v34  ;;  %vm2363_vm5 = vcmp.eq.f32.partialorder %v2358_v34, 0.0 }
 0x4bc   : > { %v6300_v38 = vpop.eup %6299 }
 0x4bd   : > { %v2360_v39 = vmul.f32 %v6300_v38, %v2358_v34 }
 0x4bf   : > { %v2362_v42 = vsel %vm2361_vm4, %v2358_v34, %v2360_v39 }
 0x4c0   : > { %v2365_v43 = vsel %vm2363_vm5, %v2364_v40, %v2362_v42 }
 0x4c1   : > { %v2387_v45 = vadd.f32 1e-06, %v2365_v43 }
 0x4c3   : > { %6301 = vrcp.f32 %v2387_v45  ;;  %v5962_v45 = vld [vmem:[#allocation3 + $0x8] sm:$0xff]  }
 0x4d0   : > { %v6302_v60 = vpop.eup %6301 }
 0x4d1   : > { %v2390_v61 = vmul.f32 %v6302_v60, %v2386_v47  ;;  %v2389_v62 = vmul.f32 %v6302_v60, %v2385_v46  ;;  %v5968_v46 = vld [vmem:[#allocation20 + $0x64] ss:$8 sps:$4 sm:$0xff]   ;;  %v5966_v47 = vld [vmem:[#allocation20 + $0x60] ss:$8 sps:$4 sm:$0xff]  }
 0x4d2   : > { %v5974_v60 = vld [vmem:[#allocation20 + $0x44] ss:$8 sps:$4 sm:$0xff]  }
 0x4d3   : > { %v2411_v63 = vadd.f32 %v2409_v58, %v2390_v61  ;;  %v2410_v0 = vadd.f32 %v2405_v59, %v2389_v62  ;;  %v5971_v58 = vld [vmem:[#allocation20 + $0x54] ss:$8 sps:$4 sm:$0xff]   ;;  %v5969_v59 = vld [vmem:[#allocation20 + $0x50] ss:$8 sps:$4 sm:$0xff]   ;;  %v5972_v61 = vld [vmem:[#allocation20 + $0x40] ss:$8 sps:$4 sm:$0xff]  }
 0x4d4   : > { %v5977_v62 = vld [vmem:[#allocation20 + $0x34] ss:$8 sps:$4 sm:$0xff]  }
 0x4d5   : > { %v2413_v1 = vpack.c.bf16 %v2411_v63, %v2411_v63  ;;  %v2412_v2 = vpack.c.bf16 %v2410_v0, %v2410_v0  ;;  %v5975_v63 = vld [vmem:[#allocation20 + $0x30] ss:$8 sps:$4 sm:$0xff]   ;;  %v5980_v0 = vld [vmem:[#allocation20 + $0x24] ss:$8 sps:$4 sm:$0xff]  }
 0x4d7   : > { %2617 = vmatprep.mubr.bf16.mxu0 %v2413_v1  ;;  %v5978_v1 = vld [vmem:[#allocation20 + $0x20] ss:$8 sps:$4 sm:$0xff]  }
 0x4d8   : > { %2618 = vmatmul.mubr.bf16.vlgmr.msra.gmra.mxu0 %v2412_v2  ;;  %v5983_v2 = vld [vmem:[#allocation20 + $0x14] ss:$8 sps:$4 sm:$0xff]  }
 0x598   : > { %v2619_v4 = vpop.f32.mrf.mxu0 }
 0x599   : > { %v2620_v37 = vadd.f32 %v2619_v4, %v2418_v31  ;;  %v5986_v31 = vld [vmem:[#allocation20 + $0x4] ss:$8 sps:$4 sm:$0xff]   ;;  %v5984_v4 = vld [vmem:[#allocation20] ss:$8 sps:$4 sm:$0xff]  }
 0x59a   : > { %v2621_v6 = vpop.f32.mrf.mxu0 }
 0x59b   : > { %v2626_v7 = vmul.f32 0.088388346, %v2620_v37  ;;  %v2622_v11 = vadd.f32 %v2621_v6, %v2422_v5  ;;  %v5989_v37 = vld [vmem:[#allocation20 + $0xf4] ss:$8 sps:$4 sm:$0xff]   ;;  %v5987_v5 = vld [vmem:[#allocation20 + $0xf0] ss:$8 sps:$4 sm:$0xff]  }
 0x59c   : > { %v2623_v8 = vpop.f32.mrf.mxu0  ;;  %v5992_v6 = vld [vmem:[#allocation20 + $0xe4] ss:$8 sps:$4 sm:$0xff]  }
 0x59d   : > { %v2628_v10 = vpack.c.bf16 %v2626_v7, %v2626_v7  ;;  %v2627_v13 = vmul.f32 0.088388346, %v2622_v11  ;;  %v5990_v7 = vld [vmem:[#allocation20 + $0xe0] ss:$8 sps:$4 sm:$0xff]   ;;  %v5995_v8 = vld [vmem:[#allocation20 + $0xd4] ss:$8 sps:$4 sm:$0xff]  }
 0x59e   : > { %v2624_v12 = vpop.f32.mrf.mxu0  ;;  %v5996_v11 = vld [vmem:[#allocation20 + $0xc0] ss:$8 sps:$4 sm:$0xff]  }
 0x59f   : > { %5433 = vmatmul.mubr.bf16.vlgmr.msra.gmra.mxu1 %v2628_v10  ;;  %v2629_v14 = vpack.c.bf16 %v2627_v13, %v2627_v13  ;;  %v5998_v10 = vld [vmem:[#allocation20 + $0xc4] ss:$8 sps:$4 sm:$0xff]   ;;  %v6001_v12 = vld [vmem:[#allocation20 + $0xb4] ss:$8 sps:$4 sm:$0xff]   ;;  %v5999_v13 = vld [vmem:[#allocation20 + $0xb0] ss:$8 sps:$4 sm:$0xff]  }
 0x5a0   : > { %5437 = vmatpush3.bf16.xpose.msra.mxu1 %v5960_v9  ;;  %5438 = vmatprep.mubr.msk.bf16.mxu1 %vm6881_vm6, %v6880_v32  ;;  %v5993_v9 = vld [vmem:[#allocation20 + $0xd0] ss:$8 sps:$4 sm:$0xff]  }
 0x5a1   : > { %5442 = vmatprep.subr.bf16.mxu1 %v6880_v32 }
 0x5a7   : > { %5439 = vmatmul.mubr.bf16.vlgmr.msra.gmra.mxu1 %v2629_v14  ;;  %v6004_v14 = vld [vmem:[#allocation20 + $0xa4] ss:$8 sps:$4 sm:$0xff]  }
 0x5a8   : > { %5444 = vmatprep.mubr.msk.bf16.mxu1 %vm6881_vm6, %v6880_v32  ;;  %5443 = vmatpush3.bf16.msra.mxu1 %v5961_v33 }
 0x5a9   : > { %5448 = vmatprep.subr.bf16.mxu1 %v6880_v32 }
 0x65f   : > { %v2670_v19 = vpop.f32.mrf.mxu1 }
 0x660   : > { %v2671_v20 = vadd.f32 %v2670_v19, %v2062_v18  ;;  %v6010_v19 = vld [vmem:[#allocation20 + $0x84] ss:$8 sps:$4 sm:$0xff]  }
 0x661   : > { %v5434_v21 = vpop.f32.mrf.mxu1 }
 0x662   : > { %v2723_v22 = vsel %vm2722_vm8, %v2671_v20, -inf }
 0x663   : > { %v2673_v23 = vpop.f32.mrf.mxu1  ;;  %2724 = vmax.xlane.f32.xlu1 %v2723_v22 }
 0x665   : > { %v5435_v24 = vpop.f32.mrf.mxu1 }
 0x667   : > { %v2716_v25 = vpop.f32.mrf.mxu1 }
 0x668   : > { %v2717_v44 = vadd.f32 %v2716_v25, %v2062_v18  ;;  %v6005_v18 = vld [vmem:[#allocation20 + $0x90] ss:$8 sps:$4 sm:$0xff]  }
 0x669   : > { %v5440_v26 = vpop.f32.mrf.mxu1 }
 0x66a   : > { %v2726_v27 = vsel %vm2722_vm8, %v2717_v44, -inf }
 0x66b   : > { %v2719_v28 = vpop.f32.mrf.mxu1  ;;  %2727 = vmax.xlane.f32.xlu1 %v2726_v27 }
 0x66d   : > { %v5441_v29 = vpop.f32.mrf.mxu1 }
 0x6ec   : > { %v2725_v34 = vpop.xlane.xlu1 %2724 }
 0x6ed   : > { %v2729_v35 = vsub.f32 %v2671_v20, %v2725_v34  ;;  %v6008_v20 = vld [vmem:[#allocation20 + $0x80] ss:$8 sps:$4 sm:$0xff]  }
 0x6ef   : > { %v2731_v38 = vmul.f32 1.442695, %v2729_v35 }
 0x6f1   : > { %6303 = vpow2.f32 %v2731_v38 }
 0x6f4   : > { %v2728_v39 = vpop.xlane.xlu1 %2727 }
 0x6f5   : > { %v2730_v40 = vsub.f32 %v2717_v44, %v2728_v39 }
 0x6f7   : > { %v2733_v42 = vmul.f32 1.442695, %v2730_v40 }
 0x6f9   : > { %6305 = vpow2.f32 %v2733_v42  ;;  %v2134_v42 = vld [vmem:[#allocation22] sm:$0x3] }
 0x6fe   : > { %v6304_v43 = vpop.eup %6303 }
 0x6ff   : > { %v2735_v49 = vsel %vm2722_vm8, %v6304_v43, 0.0  ;;  %v2741_v51 = vpack.c.bf16 %v6304_v43, %v6304_v43  ;;  %v2851_v43 = vrot.slane %v2134_v42, %v7419_v48 }
 0x700   : > { %2736 = vadd.xlane.f32.xlu1 %v2735_v49 }
 0x701   : > { %5445 = vmatmul.mubr.msk.bf16.vlgmr.msra.gmra.mxu1 %vm2722_vm8, %v2741_v51 }
 0x702   : > { %5449 = vmatpush3.bf16.msra.mxu1 %v5962_v45  ;;  %5450 = vmatprep.mubr.msk.bf16.mxu1 %vm6881_vm6, %v6880_v32  ;;  %v2855_v45 = vrot.slane %v2134_v42, %v7445_v36 }
 0x703   : > { %3018 = vmatprep.subr.bf16.mxu1 %v5965_v57 }
 0x706   : > { %v6306_v52 = vpop.eup %6305 }
 0x707   : > { %v2738_v54 = vsel %vm2722_vm8, %v6306_v52, 0.0  ;;  %v2742_v55 = vpack.c.bf16 %v6306_v52, %v6306_v52 }
 0x708   : > { %2739 = vadd.xlane.f32.xlu0 %v2738_v54 }
 0x709   : > { %5451 = vmatmul.mubr.msk.bf16.vlgmr.msra.gmra.mxu1 %vm2722_vm8, %v2742_v55 }
 0x70a   : > { %3019 = vmatpush1.bf16.msra.mxu1 %v5963_v56  ;;  %v6327_v56 = vld [vmem:[%s7307_s28] sm:$0xff] }
 0x70b   : > { %3020 = vmatprep.subr.bf16.mxu1 %v5968_v46  ;;  %v6328_v46 = vld [vmem:[%s7307_s28 + $0x8] sm:$0xff]  ;;  %s4686_s28 = sshll.u32 %s7346_s3, 4  ;;  %s4687_s28 = int_to_ptr.vmem [resolvable:$true] %s4686_s28 }
 0x70c   : > { %s6709_s24 = scalar_lea.vmem %s4687_s28, 256 }
 0x70d   : > { %p6710_p3 = scmp.ne.s32.totalorder %s4687_s28, %s6709_s24 }
 0x70e   : > { %3021 = vmatpush1.bf16.msra.mxu1 %v5966_v47 }
 0x70f   : > { %3022 = vmatprep.subr.bf16.mxu1 %v5971_v58  ;;  %p6711_p6 = pnand %p6710_p3, %p7252_p9 }
 0x711   : > { %p6712_p13 = pneg %p6711_p6 }
 0x712   : > { %3023 = vmatpush1.bf16.msra.mxu1 %v5969_v59 }
 0x713   : > { %3024 = vmatprep.subr.bf16.mxu1 %v5974_v60  ;;  %v6011_v60 = vld [vmem:[#allocation23 + $0x70] ss:$8 sps:$4 sm:$0xff]  }
 0x716   : > { %3025 = vmatpush1.bf16.msra.mxu1 %v5972_v61  ;;  %v6013_v61 = vld [vmem:[#allocation23 + $0x74] ss:$8 sps:$4 sm:$0xff]  }
 0x717   : > { %3026 = vmatprep.subr.bf16.mxu1 %v5977_v62  ;;  %v6016_v62 = vld [vmem:[#allocation23 + $0x64] ss:$8 sps:$4 sm:$0xff]   ;;  %3297 = vmatprep.subr.bf16.mxu0 %v6013_v61 }
 0x718   : > { %3298 = vmatpush1.bf16.msra.mxu0 %v6011_v60  ;;  %v3107_v60 = vrot.slane %v7430_v53, %v7445_v36 }
 0x719   : > { %3299 = vmatprep.subr.bf16.mxu0 %v6016_v62 }
 0x71a   : > { %3027 = vmatpush1.bf16.msra.mxu1 %v5975_v63  ;;  %v6014_v63 = vld [vmem:[#allocation23 + $0x60] ss:$8 sps:$4 sm:$0xff]  }
 0x71b   : > { %3028 = vmatprep.subr.bf16.mxu1 %v5980_v0  ;;  %v6019_v0 = vld [vmem:[#allocation23 + $0x54] ss:$8 sps:$4 sm:$0xff]  }
 0x71c   : > { %3300 = vmatpush1.bf16.msra.mxu0 %v6014_v63 }
 0x71d   : > { %3301 = vmatprep.subr.bf16.mxu0 %v6019_v0  ;;  %v3117_v0 = vrot.slane %v3107_v60, %v7445_v36  ;;  %v6064_v60 = vld [vmem:[#allocation26 + $0x64] ss:$8 sps:$4 sm:$0xff]  }
 0x71e   : > { %3029 = vmatpush1.bf16.msra.mxu1 %v5978_v1  ;;  %v6017_v1 = vld [vmem:[#allocation23 + $0x50] ss:$8 sps:$4 sm:$0xff]  }
 0x71f   : > { %3030 = vmatprep.subr.bf16.mxu1 %v5983_v2  ;;  %v6022_v2 = vld [vmem:[#allocation23 + $0x44] ss:$8 sps:$4 sm:$0xff]  }
 0x720   : > { %3302 = vmatpush1.bf16.msra.mxu0 %v6017_v1 }
 0x721   : > { %3303 = vmatprep.subr.bf16.mxu0 %v6022_v2 }
 0x722   : > { %3031 = vmatpush1.bf16.msra.mxu1 %v5981_v3  ;;  %v6020_v3 = vld [vmem:[#allocation23 + $0x40] ss:$8 sps:$4 sm:$0xff]  }
 0x723   : > { %3032 = vmatprep.subr.bf16.mxu1 %v5986_v31  ;;  %v6025_v31 = vld [vmem:[#allocation23 + $0x34] ss:$8 sps:$4 sm:$0xff]  }
 0x724   : > { %3304 = vmatpush1.bf16.msra.mxu0 %v6020_v3 }
 0x725   : > { %3305 = vmatprep.subr.bf16.mxu0 %v6025_v31 }
 0x726   : > { %3033 = vmatpush1.bf16.msra.mxu1 %v5984_v4  ;;  %v6023_v4 = vld [vmem:[#allocation23 + $0x30] ss:$8 sps:$4 sm:$0xff]  }
 0x727   : > { %3034 = vmatprep.subr.bf16.mxu1 %v5989_v37  ;;  %v6028_v37 = vld [vmem:[#allocation23 + $0x24] ss:$8 sps:$4 sm:$0xff]  }
 0x728   : > { %3306 = vmatpush1.bf16.msra.mxu0 %v6023_v4 }
 0x729   : > { %3307 = vmatprep.subr.bf16.mxu0 %v6028_v37 }
 0x72a   : > { %3035 = vmatpush2.bf16.msra.mxu1 %v5987_v5  ;;  %v6026_v5 = vld [vmem:[#allocation23 + $0x20] ss:$8 sps:$4 sm:$0xff]  }
 0x72b   : > { %3036 = vmatprep.subr.bf16.mxu1 %v5992_v6 }
 0x72c   : > { %3308 = vmatpush1.bf16.msra.mxu0 %v6026_v5 }
 0x72e   : > { %3037 = vmatpush2.bf16.msra.mxu1 %v5990_v7 }
 0x72f   : > { %3038 = vmatprep.subr.bf16.mxu1 %v5995_v8 }
 0x732   : > { %3039 = vmatpush2.bf16.msra.mxu1 %v5993_v9 }
 0x733   : > { %3040 = vmatprep.subr.bf16.mxu1 %v5998_v10 }
 0x736   : > { %3041 = vmatpush2.bf16.msra.mxu1 %v5996_v11 }
 0x737   : > { %3042 = vmatprep.subr.bf16.mxu1 %v6001_v12 }
 0x73a   : > { %3043 = vmatpush2.bf16.msra.mxu1 %v5999_v13  ;;  %v6031_v13 = vld [vmem:[#allocation23 + $0x14] ss:$8 sps:$4 sm:$0xff]  }
 0x73b   : > { %3044 = vmatprep.subr.bf16.mxu1 %v6004_v14  ;;  %v6029_v14 = vld [vmem:[#allocation23 + $0x10] ss:$8 sps:$4 sm:$0xff]   ;;  %3309 = vmatprep.subr.bf16.mxu0 %v6031_v13 }
 0x73c   : > { %3310 = vmatpush1.bf16.msra.mxu0 %v6029_v14  ;;  %v2342_v14 = vld [vmem:[#allocation4 + $0x4] sm:$0xf] }
 0x73e   : > { %3045 = vmatpush2.bf16.msra.mxu1 %v6002_v30  ;;  %v6034_v30 = vld [vmem:[#allocation23 + $0x4] ss:$8 sps:$4 sm:$0xff]  }
 0x73f   : > { %3046 = vmatprep.subr.bf16.mxu1 %v6007_v15  ;;  %v6032_v15 = vld [vmem:[#allocation23] ss:$8 sps:$4 sm:$0xff]   ;;  %3311 = vmatprep.subr.bf16.mxu0 %v6034_v30 }
 0x740   : > { %3312 = vmatpush1.bf16.msra.mxu0 %v6032_v15 }
 0x742   : > { %3047 = vmatpush2.bf16.msra.mxu1 %v6005_v18  ;;  %v6037_v18 = vld [vmem:[#allocation23 + $0xf4] ss:$8 sps:$4 sm:$0xff]  }
 0x743   : > { %3048 = vmatprep.subr.bf16.mxu1 %v6010_v19  ;;  %v6035_v19 = vld [vmem:[#allocation23 + $0xf0] ss:$8 sps:$4 sm:$0xff]   ;;  %3313 = vmatprep.subr.bf16.mxu0 %v6037_v18 }
 0x744   : > { %3314 = vmatpush2.bf16.msra.mxu0 %v6035_v19  ;;  %v2064_v19 = vstv %s2063_s0  ;;  %s4670_s0 = scalar_lea.sflag [#allocation10], %s7303_s20 }
 0x745   : > { %vm2065_vm11 = vcmp.lt.s32.totalorder %v7455_v16, %v2064_v19  ;;  %v2343_v16 = vld [vmem:[#allocation5] sm:$0xf]  ;;  %v6101_v19 = vld [vmem:[#allocation26 + $0x90] ss:$8 sps:$4 sm:$0xff]  }
 0x746   : > { %3049 = vmatpush2.bf16.msra.mxu1 %v6008_v20  ;;  %v6040_v20 = vld [vmem:[#allocation23 + $0xe4] ss:$8 sps:$4 sm:$0xff]  }
 0x747   : > { %5454 = vmatprep.subr.bf16.mxu1 %v6880_v32  ;;  %3315 = vmatprep.subr.bf16.mxu0 %v6040_v20  ;;  %v2066_v20 = vsel %vm2065_vm11, 0.0, %v6882_v17  ;;  %v3448_v17 = vsel %vm3446_vm13, %v2343_v16, 0 }
 0x789   : > { %v2737_v21 = vpop.xlane.xlu1 %2736 }
 0x78a   : > { %6307 = vrcp.f32 %v2737_v21  ;;  %v6038_v21 = vld [vmem:[#allocation23 + $0xe0] ss:$8 sps:$4 sm:$0xff]  }
 0x78b   : > { %3316 = vmatpush2.bf16.msra.mxu0 %v6038_v21 }
 0x791   : > { %v2740_v22 = vpop.xlane.xlu0 %2739 }
 0x792   : > { %6309 = vrcp.f32 %v2740_v22  ;;  %v6043_v22 = vld [vmem:[#allocation23 + $0xd4] ss:$8 sps:$4 sm:$0xff]  }
 0x793   : > { %3317 = vmatprep.subr.bf16.mxu0 %v6043_v22 }
 0x797   : > { %v6308_v26 = vpop.eup %6307 }
 0x79f   : > { %v6310_v27 = vpop.eup %6309 }
 0x7c1   : > { %v2786_v23 = vpop.f32.mrf.mxu1 }
 0x7c2   : > { %v2843_v28 = vmul.f32 %v6308_v26, %v2786_v23  ;;  %v6041_v23 = vld [vmem:[#allocation23 + $0xd0] ss:$8 sps:$4 sm:$0xff]  }
 0x7c3   : > { %v5446_v24 = vpop.f32.mrf.mxu1  ;;  %3318 = vmatpush2.bf16.msra.mxu0 %v6041_v23  ;;  %v6047_v26 = vld [vmem:[#allocation23 + $0xb0] ss:$8 sps:$4 sm:$0xff]  }
 0x7c4   : > { %v2845_v38 = vpack.c.bf16 %v2843_v28, %v2843_v28  ;;  %v6046_v24 = vld [vmem:[#allocation23 + $0xc4] ss:$8 sps:$4 sm:$0xff]   ;;  %v6050_v28 = vld [vmem:[#allocation23 + $0xa0] ss:$8 sps:$4 sm:$0xff]  }
 0x7c5   : > { %v2789_v25 = vpop.f32.mrf.mxu1  ;;  %3319 = vmatprep.subr.bf16.mxu0 %v6046_v24 }
 0x7c6   : > { %v6044_v25 = vld [vmem:[#allocation23 + $0xc0] ss:$8 sps:$4 sm:$0xff]  }
 0x7c7   : > { %v5447_v44 = vpop.f32.mrf.mxu1  ;;  %3320 = vmatpush2.bf16.msra.mxu0 %v6044_v25 }
 0x7c8   : > { %v6049_v44 = vld [vmem:[#allocation23 + $0xb4] ss:$8 sps:$4 sm:$0xff]  }
 0x7c9   : > { %v2835_v29 = vpop.f32.mrf.mxu1  ;;  %3321 = vmatprep.subr.bf16.mxu0 %v6049_v44 }
 0x7ca   : > { %v2844_v33 = vmul.f32 %v6310_v27, %v2835_v29  ;;  %v6052_v27 = vld [vmem:[#allocation23 + $0xa4] ss:$8 sps:$4 sm:$0xff]   ;;  %v6055_v29 = vld [vmem:[#allocation23 + $0x94] ss:$8 sps:$4 sm:$0xff]  }
 0x7cb   : > { %v5452_v34 = vpop.f32.mrf.mxu1  ;;  %3322 = vmatpush2.bf16.msra.mxu0 %v6047_v26 }
 0x7cc   : > { %v2846_v35 = vpack.c.bf16 %v2844_v33, %v2844_v33  ;;  %3323 = vmatprep.subr.bf16.mxu0 %v6052_v27  ;;  %v6053_v33 = vld [vmem:[#allocation23 + $0x90] ss:$8 sps:$4 sm:$0xff]   ;;  %v6058_v34 = vld [vmem:[#allocation23 + $0x84] ss:$8 sps:$4 sm:$0xff]  }
 0x7cd   : > { %v2838_v39 = vpop.f32.mrf.mxu1 }
 0x7ce   : > { %3050 = vmatprep.mubr.bf16.mxu1 %v2846_v35  ;;  %v6056_v35 = vld [vmem:[#allocation23 + $0x80] ss:$8 sps:$4 sm:$0xff]  }
 0x7cf   : > { %v5453_v40 = vpop.f32.mrf.mxu1  ;;  %3051 = vmatmul.mubr.bf16.vlgmr.msra.gmra.mxu1 %v2845_v38  ;;  %3324 = vmatpush2.bf16.msra.mxu0 %v6050_v28  ;;  %v2341_v38 = vld [vmem:[#allocation4] sm:$0xf] }
 0x7d0   : > { %5456 = vmatprep.mubr.msk.bf16.mxu1 %vm6881_vm6, %v6880_v32  ;;  %3325 = vmatprep.subr.bf16.mxu0 %v6055_v29 }
 0x7d1   : > { %5455 = vmatpush3.bf16.xpose.msra.mxu1 %v2341_v38 }
 0x7d2   : > { %5460 = vmatprep.subr.bf16.mxu1 %v6880_v32 }
 0x7d3   : > { %3326 = vmatpush2.bf16.msra.mxu0 %v6053_v33 }
 0x7d4   : > { %3327 = vmatprep.subr.bf16.mxu0 %v6058_v34 }
 0x7d7   : > { %3328 = vmatpush2.bf16.msra.mxu0 %v6056_v35 }
 0x88f   : > { %v3052_v49 = vpop.f32.mrf.mxu1 }
 0x890   : > { %v3053_v51 = vadd.f32 %v3052_v49, %v2851_v43 }
 0x891   : > { %v3054_v52 = vpop.f32.mrf.mxu1 }
 0x892   : > { %v3055_v54 = vadd.f32 %v3054_v52, %v2855_v45  ;;  %v7474_v57 = vadd.f32 %v6327_v56, %v3053_v51 }
 0x893   : > { %v3056_v55 = vpop.f32.mrf.mxu1 }
 0x894   : > { %v7477_v47 = vadd.f32 %v6328_v46, %v3055_v54  ;;  %v3086_v54 = vsub.s32 5, %v7416_v41  ;;  %v3083_v55 = vrot.slane %v7422_v50, %v7445_v36 }
 0x895   : > { %v3057_v58 = vpop.f32.mrf.mxu1 }
 0x896   : > { %v3061_v59 = vadd.f32 %v7477_v47, %v7474_v57  ;;  %v3087_v56 = vrot.slane %v7422_v50, %v3086_v54  ;;  %v3093_v46 = vrot.slane %v3083_v55, %v7445_v36 }
 0x898   : > { %3062 = vadd.xlane.f32.xlu0 %v3061_v59  ;;  %v3097_v58 = vrot.slane %v3087_v56, %v7445_v36  ;;  %v3111_v59 = vrot.slane %v7430_v53, %v3086_v54  ;;  %v2167_v53 = vld [vmem:[%s7776_s14] sm:$0x3]  ;;  %s7781_s14 = sld [smem:[#allocation73_spill]] }
 0x899   : > { %v3130_v5 = vrot.slane %v2167_v53, %v7419_v48 }
 0x89a   : > { %v3121_v63 = vrot.slane %v3111_v59, %v7445_v36  ;;  %v6061_v59 = vld [vmem:[#allocation26 + $0x74] ss:$8 sps:$4 sm:$0xff]  }
 0x89b   : > { %3713 = vmatprep.subr.bf16.mxu0 %v6061_v59  ;;  %v6107_v59 = vld [vmem:[#allocation28 + $0xe0] ss:$16 sps:$4 sm:$0xff]  }
 0x921   : > { %v3063_v6 = vpop.xlane.xlu0 %3062 }
 0x922   : > { %v3064_v7 = vmul.f32 0.00390625, %v3063_v6 }
 0x924   : > { %v7482_v8 = vsub.f32 %v7474_v57, %v3064_v7  ;;  %v7485_v9 = vsub.f32 %v7477_v47, %v3064_v7 }
 0x926   : > { %v3067_v10 = vmul.f32 %v7482_v8, %v7482_v8  ;;  %v3068_v11 = vmul.f32 %v7485_v9, %v7485_v9  ;;  %v3098_v61 = vmul.f32 %v3093_v46, %v7482_v8  ;;  %v3099_v62 = vmul.f32 %v3097_v58, %v7485_v9  ;;  %v6059_v58 = vld [vmem:[#allocation26 + $0x70] ss:$8 sps:$4 sm:$0xff]  }
 0x927   : > { %v3134_v8 = vrot.slane %v2167_v53, %v7445_v36  ;;  %v6080_v53 = vld [vmem:[#allocation26] ss:$8 sps:$4 sm:$0xff]  }
 0x928   : > { %v3069_v12 = vadd.f32 %v3068_v11, %v3067_v10 }
 0x92a   : > { %3070 = vadd.xlane.f32.xlu1 %v3069_v12 }
 0x9b3   : > { %v3071_v39 = vpop.xlane.xlu1 %3070 }
 0x9b4   : > { %v3072_v40 = vmul.f32 0.003921569, %v3071_v39 }
 0x9b6   : > { %6311 = vrsqrt.f32 %v3072_v40  ;;  %vm3075_vm9 = vcmp.eq.f32.partialorder %v3072_v40, inf  ;;  %v3078_v45 = vand.u32 2147483648, %v3072_v40  ;;  %vm3077_vm10 = vcmp.eq.f32.partialorder %v3072_v40, 0.0 }
 0x9c3   : > { %v6312_v42 = vpop.eup %6311 }
 0x9c4   : > { %v3074_v43 = vmul.f32 %v6312_v42, %v3072_v40 }
 0x9c6   : > { %v3076_v49 = vsel %vm3075_vm9, %v3072_v40, %v3074_v43 }
 0x9c7   : > { %v3079_v51 = vsel %vm3077_vm10, %v3078_v45, %v3076_v49  ;;  %v2344_v45 = vld [vmem:[#allocation5 + $0x4] sm:$0xf] }
 0x9c8   : > { %v3100_v52 = vadd.f32 1e-06, %v3079_v51  ;;  %v3494_v54 = vsel %vm3446_vm13, %v2344_v45, 0 }
 0x9ca   : > { %6313 = vrcp.f32 %v3100_v52 }
 0x9d7   : > { %v6314_v1 = vpop.eup %6313 }
 0x9d8   : > { %v3103_v2 = vmul.f32 %v6314_v1, %v3099_v62  ;;  %v3102_v50 = vmul.f32 %v6314_v1, %v3098_v61  ;;  %v6062_v61 = vld [vmem:[#allocation26 + $0x60] ss:$8 sps:$4 sm:$0xff]   ;;  %v6067_v62 = vld [vmem:[#allocation26 + $0x54] ss:$8 sps:$4 sm:$0xff]  }
 0x9d9   : > { %v6073_v1 = vld [vmem:[#allocation26 + $0x34] ss:$8 sps:$4 sm:$0xff]  }
 0x9da   : > { %v3123_v3 = vadd.f32 %v3121_v63, %v3103_v2  ;;  %v3122_v31 = vadd.f32 %v3117_v0, %v3102_v50  ;;  %v6065_v63 = vld [vmem:[#allocation26 + $0x50] ss:$8 sps:$4 sm:$0xff]   ;;  %v6070_v0 = vld [vmem:[#allocation26 + $0x44] ss:$8 sps:$4 sm:$0xff]  }
 0x9db   : > { %v6071_v2 = vld [vmem:[#allocation26 + $0x30] ss:$8 sps:$4 sm:$0xff]   ;;  %v6076_v50 = vld [vmem:[#allocation26 + $0x24] ss:$8 sps:$4 sm:$0xff]  }
 0x9dc   : > { %v3125_v4 = vpack.c.bf16 %v3123_v3, %v3123_v3  ;;  %v3124_v37 = vpack.c.bf16 %v3122_v31, %v3122_v31  ;;  %v6074_v3 = vld [vmem:[#allocation26 + $0x20] ss:$8 sps:$4 sm:$0xff]   ;;  %v6079_v31 = vld [vmem:[#allocation26 + $0x14] ss:$8 sps:$4 sm:$0xff]  }
 0x9de   : > { %3329 = vmatprep.mubr.bf16.mxu0 %v3125_v4  ;;  %v6077_v4 = vld [vmem:[#allocation26 + $0x10] ss:$8 sps:$4 sm:$0xff]  }
 0x9df   : > { %3330 = vmatmul.mubr.bf16.vlgmr.msra.gmra.mxu0 %v3124_v37  ;;  %v6082_v37 = vld [vmem:[#allocation26 + $0x4] ss:$8 sps:$4 sm:$0xff]  }
 0x9e0   : > { %3714 = vmatpush1.bf16.msra.mxu0 %v6059_v58 }
 0x9e1   : > { %3715 = vmatprep.subr.bf16.mxu0 %v6064_v60  ;;  %v6109_v60 = vld [vmem:[#allocation28 + $0xe4] ss:$16 sps:$4 sm:$0xff]  }
 0x9e4   : > { %3716 = vmatpush1.bf16.msra.mxu0 %v6062_v61  ;;  %v6110_v61 = vld [vmem:[#allocation28 + $0xe8] ss:$16 sps:$4 sm:$0xff]  }
 0x9e5   : > { %3717 = vmatprep.subr.bf16.mxu0 %v6067_v62  ;;  %v6112_v62 = vld [vmem:[#allocation28 + $0xec] ss:$16 sps:$4 sm:$0xff]  }
 0x9e8   : > { %3718 = vmatpush1.bf16.msra.mxu0 %v6065_v63  ;;  %v6115_v63 = vld [vmem:[#allocation28 + $0xc4] ss:$16 sps:$4 sm:$0xff]  }
 0x9e9   : > { %3719 = vmatprep.subr.bf16.mxu0 %v6070_v0  ;;  %v6118_v0 = vld [vmem:[#allocation28 + $0xcc] ss:$16 sps:$4 sm:$0xff]  }
 0xa9f   : > { %v3331_v6 = vpop.f32.mrf.mxu0 }
 0xaa0   : > { %v3332_v7 = vadd.f32 %v3331_v6, %v3130_v5  ;;  %v6085_v5 = vld [vmem:[#allocation26 + $0xf4] ss:$8 sps:$4 sm:$0xff]   ;;  %v6083_v6 = vld [vmem:[#allocation26 + $0xf0] ss:$8 sps:$4 sm:$0xff]  }
 0xaa1   : > { %v3333_v9 = vpop.f32.mrf.mxu0 }
 0xaa2   : > { %v3338_v10 = vmul.f32 0.088388346, %v3332_v7  ;;  %v3334_v13 = vadd.f32 %v3333_v9, %v3134_v8  ;;  %v6088_v7 = vld [vmem:[#allocation26 + $0xe4] ss:$8 sps:$4 sm:$0xff]   ;;  %v6086_v8 = vld [vmem:[#allocation26 + $0xe0] ss:$8 sps:$4 sm:$0xff]  }
 0xaa3   : > { %v3335_v11 = vpop.f32.mrf.mxu0  ;;  %v6091_v9 = vld [vmem:[#allocation26 + $0xd4] ss:$8 sps:$4 sm:$0xff]  }
 0xaa4   : > { %v3340_v12 = vpack.c.bf16 %v3338_v10, %v3338_v10  ;;  %v3339_v15 = vmul.f32 0.088388346, %v3334_v13  ;;  %v6089_v10 = vld [vmem:[#allocation26 + $0xd0] ss:$8 sps:$4 sm:$0xff]   ;;  %v6094_v11 = vld [vmem:[#allocation26 + $0xc4] ss:$8 sps:$4 sm:$0xff]  }
 0xaa5   : > { %v3336_v30 = vpop.f32.mrf.mxu0  ;;  %v6097_v13 = vld [vmem:[#allocation26 + $0xb4] ss:$8 sps:$4 sm:$0xff]  }
 0xaa6   : > { %5457 = vmatmul.mubr.bf16.vlgmr.msra.gmra.mxu1 %v3340_v12  ;;  %v3341_v18 = vpack.c.bf16 %v3339_v15, %v3339_v15  ;;  %v6092_v12 = vld [vmem:[#allocation26 + $0xc0] ss:$8 sps:$4 sm:$0xff]   ;;  %v6100_v30 = vld [vmem:[#allocation26 + $0xa4] ss:$8 sps:$4 sm:$0xff]  }
 0xaa7   : > { %5461 = vmatpush3.bf16.xpose.msra.mxu1 %v2342_v14  ;;  %5462 = vmatprep.mubr.msk.bf16.mxu1 %vm6881_vm6, %v6880_v32  ;;  %v6095_v14 = vld [vmem:[#allocation26 + $0xb0] ss:$8 sps:$4 sm:$0xff]   ;;  %v6098_v15 = vld [vmem:[#allocation26 + $0xa0] ss:$8 sps:$4 sm:$0xff]  }
 0xaa8   : > { %5466 = vmatprep.subr.bf16.mxu1 %v6880_v32 }
 0xaae   : > { %5463 = vmatmul.mubr.bf16.vlgmr.msra.gmra.mxu1 %v3341_v18  ;;  %v6103_v18 = vld [vmem:[#allocation26 + $0x94] ss:$8 sps:$4 sm:$0xff]  }
 0xaaf   : > { %5468 = vmatprep.mubr.msk.bf16.mxu1 %vm6881_vm6, %v6880_v32  ;;  %5467 = vmatpush3.bf16.msra.mxu1 %v3448_v17 }
 0xab0   : > { %5472 = vmatprep.subr.bf16.mxu1 %v6880_v32 }
 0xb66   : > { %v3376_v21 = vpop.f32.mrf.mxu1 }
 0xb67   : > { %v3377_v22 = vadd.f32 %v3376_v21, %v2066_v20  ;;  %v6104_v21 = vld [vmem:[#allocation26 + $0x80] ss:$8 sps:$4 sm:$0xff]  }
 0xb68   : > { %v5458_v23 = vpop.f32.mrf.mxu1 }
 0xb69   : > { %v3423_v24 = vsel %vm3422_vm12, %v3377_v22, -inf }
 0xb6a   : > { %3424 = vmax.xlane.f32.xlu0 %v3423_v24  ;;  %v3379_v25 = vpop.f32.mrf.mxu1 }
 0xb6c   : > { %v5459_v44 = vpop.f32.mrf.mxu1 }
 0xb6e   : > { %v3416_v26 = vpop.f32.mrf.mxu1 }
 0xb6f   : > { %v3417_v27 = vadd.f32 %v3416_v26, %v2066_v20  ;;  %v6106_v20 = vld [vmem:[#allocation26 + $0x84] ss:$8 sps:$4 sm:$0xff]  }
 0xb70   : > { %v5464_v28 = vpop.f32.mrf.mxu1 }
 0xb71   : > { %v3426_v29 = vsel %vm3422_vm12, %v3417_v27, -inf }
 0xb72   : > { %3427 = vmax.xlane.f32.xlu1 %v3426_v29  ;;  %v3419_v33 = vpop.f32.mrf.mxu1 }
 0xb74   : > { %v5465_v34 = vpop.f32.mrf.mxu1 }
 0xbf3   : > { %v3425_v35 = vpop.xlane.xlu0 %3424 }
 0xbf4   : > { %v3429_v38 = vsub.f32 %v3377_v22, %v3425_v35 }
 0xbf6   : > { %v3431_v39 = vmul.f32 1.442695, %v3429_v38 }
 0xbf8   : > { %6315 = vpow2.f32 %v3431_v39 }
 0xbfb   : > { %v3428_v40 = vpop.xlane.xlu1 %3427 }
 0xbfc   : > { %v3430_v42 = vsub.f32 %v3417_v27, %v3428_v40  ;;  %v2200_v40 = vld [vmem:[%s7778_s2] sm:$0x3]  ;;  %s6713_s2 = sshll.u32 %s6883_s17, 4  ;;  %s6714_s2 = int_to_ptr.vmem [resolvable:$false] %s6713_s2 }
 0xbfd   : > { %s6715_s19 = scalar_lea.vmem %s6714_s2, 512  ;;  %p6716_p11 = scmp.lt.s32.totalorder %s4687_s28, %s6714_s2 }
 0xbfe   : > { %v3433_v43 = vmul.f32 1.442695, %v3430_v42  ;;  %v3546_v42 = vrot.slane %v2200_v40, %v7419_v48  ;;  %p6717_p5 = scmp.lt.s32.totalorder %s6715_s19, %s6709_s24 }
 0xc00   : > { %6317 = vpow2.f32 %v3433_v43  ;;  %v3550_v43 = vrot.slane %v2200_v40, %v7445_v36  ;;  %v6167_v40 = vld [vmem:[#allocation28 + $0x1a0] ss:$16 sps:$4 sm:$0xff]   ;;  %p6718_p1 = por %p6717_p5, %p6716_p11 }
 0xc02   : > { %p6719_p7 = pnand %p6718_p1, %p6712_p13 }
 0xc05   : > { %v6316_v49 = vpop.eup %6315 }
 0xc06   : > { %v3435_v51 = vsel %vm3422_vm12, %v6316_v49, 0.0  ;;  %v3441_v52 = vpack.c.bf16 %v6316_v49, %v6316_v49 }
 0xc07   : > { %3436 = vadd.xlane.f32.xlu1 %v3435_v51 }
 0xc08   : > { %5469 = vmatmul.mubr.msk.bf16.vlgmr.msra.gmra.mxu1 %vm3422_vm12, %v3441_v52 }
 0xc09   : > { %5473 = vmatpush3.bf16.msra.mxu1 %v3494_v54  ;;  %5474 = vmatprep.mubr.msk.bf16.mxu1 %vm6881_vm6, %v6880_v32  ;;  %v6068_v32 = vld [vmem:[#allocation26 + $0x40] ss:$8 sps:$4 sm:$0xff]  }
 0xc0a   : > { %3720 = vmatpush1.bf16.msra.mxu0 %v6068_v32  ;;  %4162 = vmatprep.subr.bf16.mxu1 %v6109_v60  ;;  %v6113_v32 = vld [vmem:[#allocation28 + $0xc0] ss:$16 sps:$4 sm:$0xff]   ;;  %v6190_v60 = vld [vmem:[#allocation28 + $0x14c] ss:$16 sps:$4 sm:$0xff]  }
 0xc0b   : > { %3721 = vmatprep.subr.bf16.mxu0 %v6073_v1  ;;  %v6124_v1 = vld [vmem:[#allocation28 + $0xac] ss:$16 sps:$4 sm:$0xff]  }
 0xc0d   : > { %v6318_v55 = vpop.eup %6317 }
 0xc0e   : > { %v3438_v56 = vsel %vm3422_vm12, %v6318_v55, 0.0  ;;  %v3442_v46 = vpack.c.bf16 %v6318_v55, %v6318_v55  ;;  %3722 = vmatpush1.bf16.msra.mxu0 %v6071_v2  ;;  %v6119_v2 = vld [vmem:[#allocation28 + $0xa0] ss:$16 sps:$4 sm:$0xff]  }
 0xc0f   : > { %3439 = vadd.xlane.f32.xlu0 %v3438_v56  ;;  %3723 = vmatprep.subr.bf16.mxu0 %v6076_v50  ;;  %v6122_v50 = vld [vmem:[#allocation28 + $0xa8] ss:$16 sps:$4 sm:$0xff]  }
 0xc10   : > { %5475 = vmatmul.mubr.msk.bf16.vlgmr.msra.gmra.mxu1 %vm3422_vm12, %v3442_v46 }
 0xc11   : > { %4163 = vmatpush1.bf16.msra.mxu1 %v6107_v59  ;;  %v6187_v59 = vld [vmem:[#allocation28 + $0x144] ss:$16 sps:$4 sm:$0xff]  }
 0xc12   : > { %3724 = vmatpush1.bf16.msra.mxu0 %v6074_v3  ;;  %4164 = vmatprep.subr.bf16.mxu1 %v6115_v63  ;;  %v6127_v3 = vld [vmem:[#allocation28 + $0x84] ss:$16 sps:$4 sm:$0xff]  }
 0xc13   : > { %3725 = vmatprep.subr.bf16.mxu0 %v6079_v31  ;;  %v6130_v31 = vld [vmem:[#allocation28 + $0x8c] ss:$16 sps:$4 sm:$0xff]   ;;  %v6193_v63 = vld [vmem:[#allocation28 + $0x124] ss:$16 sps:$4 sm:$0xff]  }
 0xc15   : > { %4165 = vmatpush1.bf16.msra.mxu1 %v6113_v32  ;;  %v6191_v32 = vld [vmem:[#allocation28 + $0x120] ss:$16 sps:$4 sm:$0xff]  }
 0xc16   : > { %3726 = vmatpush1.bf16.msra.mxu0 %v6077_v4  ;;  %v6125_v4 = vld [vmem:[#allocation28 + $0x80] ss:$16 sps:$4 sm:$0xff]  }
 0xc17   : > { %3727 = vmatprep.subr.bf16.mxu0 %v6082_v37  ;;  %v6128_v37 = vld [vmem:[#allocation28 + $0x88] ss:$16 sps:$4 sm:$0xff]  }
 0xc1a   : > { %3728 = vmatpush1.bf16.msra.mxu0 %v6080_v53  ;;  %v6133_v53 = vld [vmem:[#allocation28 + $0x64] ss:$16 sps:$4 sm:$0xff]  }
 0xc1b   : > { %3729 = vmatprep.subr.bf16.mxu0 %v6085_v5  ;;  %v6136_v5 = vld [vmem:[#allocation28 + $0x6c] ss:$16 sps:$4 sm:$0xff]  }
 0xc1e   : > { %3730 = vmatpush2.bf16.msra.mxu0 %v6083_v6  ;;  %v6131_v6 = vld [vmem:[#allocation28 + $0x60] ss:$16 sps:$4 sm:$0xff]  }
 0xc1f   : > { %3731 = vmatprep.subr.bf16.mxu0 %v6088_v7  ;;  %v6134_v7 = vld [vmem:[#allocation28 + $0x68] ss:$16 sps:$4 sm:$0xff]  }
 0xc22   : > { %3732 = vmatpush2.bf16.msra.mxu0 %v6086_v8  ;;  %v6139_v8 = vld [vmem:[#allocation28 + $0x44] ss:$16 sps:$4 sm:$0xff]  }
 0xc23   : > { %3733 = vmatprep.subr.bf16.mxu0 %v6091_v9  ;;  %v6142_v9 = vld [vmem:[#allocation28 + $0x4c] ss:$16 sps:$4 sm:$0xff]  }
 0xc26   : > { %3734 = vmatpush2.bf16.msra.mxu0 %v6089_v10  ;;  %v6137_v10 = vld [vmem:[#allocation28 + $0x40] ss:$16 sps:$4 sm:$0xff]  }
 0xc27   : > { %3735 = vmatprep.subr.bf16.mxu0 %v6094_v11  ;;  %v6140_v11 = vld [vmem:[#allocation28 + $0x48] ss:$16 sps:$4 sm:$0xff]  }
 0xc2a   : > { %3736 = vmatpush2.bf16.msra.mxu0 %v6092_v12 }
 0xc2b   : > { %3737 = vmatprep.subr.bf16.mxu0 %v6097_v13 }
 0xc2e   : > { %3738 = vmatpush2.bf16.msra.mxu0 %v6095_v14 }
 0xc2f   : > { %3739 = vmatprep.subr.bf16.mxu0 %v6100_v30 }
 0xc32   : > { %3740 = vmatpush2.bf16.msra.mxu0 %v6098_v15 }
 0xc33   : > { %3741 = vmatprep.subr.bf16.mxu0 %v6103_v18 }
 0xc36   : > { %3742 = vmatpush2.bf16.msra.mxu0 %v6101_v19 }
 0xc37   : > { %3743 = vmatprep.subr.bf16.mxu0 %v6106_v20  ;;  %v6145_v20 = vld [vmem:[#allocation28 + $0x24] ss:$16 sps:$4 sm:$0xff]  }
 0xc3a   : > { %3744 = vmatpush2.bf16.msra.mxu0 %v6104_v21  ;;  %v6148_v21 = vld [vmem:[#allocation28 + $0x2c] ss:$16 sps:$4 sm:$0xff]  }
 0xc3b   : > { %4203 = vmatprep.subr.bf16.mxu0 %v6112_v62  ;;  %v6188_v62 = vld [vmem:[#allocation28 + $0x148] ss:$16 sps:$4 sm:$0xff]  }
 0xc90   : > { %v3437_v22 = vpop.xlane.xlu1 %3436 }
 0xc91   : > { %6319 = vrcp.f32 %v3437_v22  ;;  %v6143_v22 = vld [vmem:[#allocation28 + $0x20] ss:$16 sps:$4 sm:$0xff]  }
 0xc98   : > { %v3440_v23 = vpop.xlane.xlu0 %3439 }
 0xc99   : > { %6321 = vrcp.f32 %v3440_v23  ;;  %v6146_v23 = vld [vmem:[#allocation28 + $0x28] ss:$16 sps:$4 sm:$0xff]  }
 0xc9e   : > { %v6320_v27 = vpop.eup %6319 }
 0xca6   : > { %v6322_v28 = vpop.eup %6321 }
 0xcc8   : > { %v3484_v24 = vpop.f32.mrf.mxu1 }
 0xcc9   : > { %v3538_v29 = vmul.f32 %v6320_v27, %v3484_v24  ;;  %v6151_v24 = vld [vmem:[#allocation28 + $0x4] ss:$16 sps:$4 sm:$0xff]  }
 0xcca   : > { %v5470_v25 = vpop.f32.mrf.mxu1  ;;  %v6157_v27 = vld [vmem:[#allocation28 + $0x1e4] ss:$16 sps:$4 sm:$0xff]  }
 0xccb   : > { %v3540_v35 = vpack.c.bf16 %v3538_v29, %v3538_v29  ;;  %v6154_v25 = vld [vmem:[#allocation28 + $0xc] ss:$16 sps:$4 sm:$0xff]   ;;  %v6155_v29 = vld [vmem:[#allocation28 + $0x1e0] ss:$16 sps:$4 sm:$0xff]  }
 0xccc   : > { %v3487_v44 = vpop.f32.mrf.mxu1 }
 0xccd   : > { %v6149_v44 = vld [vmem:[#allocation28] ss:$16 sps:$4 sm:$0xff]  }
 0xcce   : > { %v5471_v26 = vpop.f32.mrf.mxu1 }
 0xccf   : > { %v6152_v26 = vld [vmem:[#allocation28 + $0x8] ss:$16 sps:$4 sm:$0xff]  }
 0xcd0   : > { %v3530_v33 = vpop.f32.mrf.mxu1 }
 0xcd1   : > { %v3539_v34 = vmul.f32 %v6322_v28, %v3530_v33  ;;  %v6160_v28 = vld [vmem:[#allocation28 + $0x1ec] ss:$16 sps:$4 sm:$0xff]   ;;  %v6158_v33 = vld [vmem:[#allocation28 + $0x1e8] ss:$16 sps:$4 sm:$0xff]  }
 0xcd2   : > { %v5476_v16 = vpop.f32.mrf.mxu1 }
 0xcd3   : > { %v3541_v17 = vpack.c.bf16 %v3539_v34, %v3539_v34  ;;  %v6163_v34 = vld [vmem:[#allocation28 + $0x1c4] ss:$16 sps:$4 sm:$0xff]   ;;  %v6166_v16 = vld [vmem:[#allocation28 + $0x1cc] ss:$16 sps:$4 sm:$0xff]  }
 0xcd4   : > { %v3533_v38 = vpop.f32.mrf.mxu1 }
 0xcd5   : > { %3745 = vmatprep.mubr.bf16.mxu0 %v3541_v17  ;;  %v6161_v17 = vld [vmem:[#allocation28 + $0x1c0] ss:$16 sps:$4 sm:$0xff]   ;;  %v6169_v38 = vld [vmem:[#allocation28 + $0x1a4] ss:$16 sps:$4 sm:$0xff]  }
 0xcd6   : > { %v5477_v39 = vpop.f32.mrf.mxu1  ;;  %3746 = vmatmul.mubr.bf16.vlgmr.msra.gmra.mxu0 %v3540_v35  ;;  %v6164_v35 = vld [vmem:[#allocation28 + $0x1c8] ss:$16 sps:$4 sm:$0xff]  }
 0xcd7   : > { %4204 = vmatpush1.bf16.msra.mxu0 %v6110_v61  ;;  %v6172_v39 = vld [vmem:[#allocation28 + $0x1ac] ss:$16 sps:$4 sm:$0xff]   ;;  %v6185_v61 = vld [vmem:[#allocation28 + $0x140] ss:$16 sps:$4 sm:$0xff]  }
 0xcd8   : > { %4205 = vmatprep.subr.bf16.mxu0 %v6118_v0  ;;  %v6196_v0 = vld [vmem:[#allocation28 + $0x12c] ss:$16 sps:$4 sm:$0xff]  }
 0xd96   : > { %v3747_v45 = vpop.f32.mrf.mxu0 }
 0xd97   : > { %v3748_v49 = vadd.f32 %v3747_v45, %v3546_v42  ;;  %v6170_v42 = vld [vmem:[#allocation28 + $0x1a8] ss:$16 sps:$4 sm:$0xff]   ;;  %v6175_v45 = vld [vmem:[#allocation28 + $0x184] ss:$16 sps:$4 sm:$0xff]  }
 0xd98   : > { %v3749_v51 = vpop.f32.mrf.mxu0 }
 0xd99   : > { %v3750_v52 = vadd.f32 %v3749_v51, %v3550_v43  ;;  %v7535_v55 = vadd.f32 %v3748_v49, %v7474_v57  ;;  %v6116_v57 = vld [vmem:[#allocation28 + $0xc8] ss:$16 sps:$4 sm:$0xff]   ;;  %v6173_v43 = vld [vmem:[#allocation28 + $0x180] ss:$16 sps:$4 sm:$0xff]   ;;  %v6178_v51 = vld [vmem:[#allocation28 + $0x18c] ss:$16 sps:$4 sm:$0xff]  }
 0xd9a   : > { %v3751_v54 = vpop.f32.mrf.mxu0  ;;  %4206 = vmatpush1.bf16.msra.mxu0 %v6116_v57  ;;  %v6176_v49 = vld [vmem:[#allocation28 + $0x188] ss:$16 sps:$4 sm:$0xff]  }
 0xd9b   : > { %v7538_v56 = vadd.f32 %v3750_v52, %v7477_v47  ;;  %v6121_v47 = vld [vmem:[#allocation28 + $0xa4] ss:$16 sps:$4 sm:$0xff]   ;;  %4207 = vmatprep.subr.bf16.mxu0 %v6124_v1  ;;  %v6184_v54 = vld [vmem:[#allocation28 + $0x16c] ss:$16 sps:$4 sm:$0xff]   ;;  %v6194_v57 = vld [vmem:[#allocation28 + $0x128] ss:$16 sps:$4 sm:$0xff]  }
 0xd9c   : > { %v3752_v46 = vpop.f32.mrf.mxu0  ;;  %4166 = vmatprep.subr.bf16.mxu1 %v6121_v47  ;;  %v6181_v52 = vld [vmem:[#allocation28 + $0x164] ss:$16 sps:$4 sm:$0xff]   ;;  %v6202_v1 = vld [vmem:[#allocation28 + $0x10c] ss:$16 sps:$4 sm:$0xff]  }
 0xd9d   : > { %v3756_v58 = vadd.f32 %v7538_v56, %v7535_v55  ;;  %4167 = vmatpush1.bf16.msra.mxu1 %v6119_v2  ;;  %v6179_v46 = vld [vmem:[#allocation28 + $0x160] ss:$16 sps:$4 sm:$0xff]   ;;  %v6199_v47 = vld [vmem:[#allocation28 + $0x104] ss:$16 sps:$4 sm:$0xff]  }
 0xd9e   : > { %4208 = vmatpush1.bf16.msra.mxu0 %v6122_v50  ;;  %4168 = vmatprep.subr.bf16.mxu1 %v6127_v3  ;;  %v6197_v2 = vld [vmem:[#allocation28 + $0x100] ss:$16 sps:$4 sm:$0xff]   ;;  %v6200_v50 = vld [vmem:[#allocation28 + $0x108] ss:$16 sps:$4 sm:$0xff]   ;;  %v6205_v3 = vld [vmem:[#allocation29 + $0x74] ss:$8 sps:$4 sm:$0xff]  }
 0xd9f   : > { %3757 = vadd.xlane.f32.xlu0 %v3756_v58  ;;  %4209 = vmatprep.subr.bf16.mxu0 %v6130_v31  ;;  %v6182_v58 = vld [vmem:[#allocation28 + $0x168] ss:$16 sps:$4 sm:$0xff]   ;;  %v6208_v31 = vld [vmem:[#allocation29 + $0x174] ss:$8 sps:$4 sm:$0xff]  }
 0xda1   : > { %4169 = vmatpush1.bf16.msra.mxu1 %v6125_v4 }
 0xda2   : > { %4210 = vmatpush1.bf16.msra.mxu0 %v6128_v37  ;;  %4170 = vmatprep.subr.bf16.mxu1 %v6133_v53 }
 0xda3   : > { %4211 = vmatprep.subr.bf16.mxu0 %v6136_v5 }
 0xda5   : > { %4171 = vmatpush1.bf16.msra.mxu1 %v6131_v6 }
 0xda6   : > { %4212 = vmatpush1.bf16.msra.mxu0 %v6134_v7  ;;  %4172 = vmatprep.subr.bf16.mxu1 %v6139_v8 }
 0xda7   : > { %4213 = vmatprep.subr.bf16.mxu0 %v6142_v9 }
 0xda9   : > { %4173 = vmatpush1.bf16.msra.mxu1 %v6137_v10  ;;  %v7553_v10 = vsub.s32 2, %v7416_v41 }
 0xdaa   : > { %4214 = vmatpush1.bf16.msra.mxu0 %v6140_v11  ;;  %4174 = vmatprep.subr.bf16.mxu1 %v6145_v20  ;;  %v3781_v11 = vsub.s32 6, %v7416_v41  ;;  %v6330_v20 = vld [vmem:[%s7774_s30] sm:$0x77]  ;;  %s4682_s30 = sadd.s32 %s5368_s12, %s5367_s16 }
 0xdab   : > { %4215 = vmatprep.subr.bf16.mxu0 %v6148_v21  ;;  %s5369_s10 = sshll.u32 %s4682_s30, 7 }
 0xdac   : > { %v3806_v21 = vrot.slane %v6330_v20, %v3781_v11  ;;  %s4684_s18 = scalar_lea.hbm %s7781_s14, %s5369_s10 }
 0xdad   : > { %4175 = vmatpush1.bf16.msra.mxu1 %v6143_v22  ;;  %v3802_v22 = vrot.slane %v6330_v20, %v7553_v10  ;;  %v6269_v20 = vld [vmem:[#allocation29 + $0xc0] ss:$8 sps:$4 sm:$0xff]  }
 0xdae   : > { %4216 = vmatpush1.bf16.msra.mxu0 %v6146_v23  ;;  %4176 = vmatprep.subr.bf16.mxu1 %v6151_v24 }
 0xdaf   : > { %4217 = vmatprep.subr.bf16.mxu0 %v6154_v25  ;;  %v3816_v25 = vrot.slane %v3806_v21, %v7553_v10  ;;  %v6272_v21 = vld [vmem:[#allocation29 + $0x1c0] ss:$8 sps:$4 sm:$0xff]  }
 0xdb1   : > { %4177 = vmatpush1.bf16.msra.mxu1 %v6149_v44  ;;  %v3812_v44 = vrot.slane %v3802_v22, %v7553_v10  ;;  %v6277_v22 = vld [vmem:[#allocation29 + $0xb4] ss:$8 sps:$4 sm:$0xff]  }
 0xdb2   : > { %4218 = vmatpush1.bf16.msra.mxu0 %v6152_v26  ;;  %4178 = vmatprep.subr.bf16.mxu1 %v6157_v27 }
 0xdb3   : > { %4219 = vmatprep.subr.bf16.mxu0 %v6160_v28 }
 0xdb5   : > { %4179 = vmatpush2.bf16.msra.mxu1 %v6155_v29 }
 0xdb6   : > { %4220 = vmatpush2.bf16.msra.mxu0 %v6158_v33  ;;  %4180 = vmatprep.subr.bf16.mxu1 %v6163_v34 }
 0xdb7   : > { %4221 = vmatprep.subr.bf16.mxu0 %v6166_v16 }
 0xdb9   : > { %4181 = vmatpush2.bf16.msra.mxu1 %v6161_v17  ;;  %v6203_v17 = vld [vmem:[#allocation29 + $0x70] ss:$8 sps:$4 sm:$0xff]  }
 0xdba   : > { %4222 = vmatpush2.bf16.msra.mxu0 %v6164_v35  ;;  %4182 = vmatprep.subr.bf16.mxu1 %v6169_v38  ;;  %v6206_v35 = vld [vmem:[#allocation29 + $0x170] ss:$8 sps:$4 sm:$0xff]   ;;  %v6211_v38 = vld [vmem:[#allocation29 + $0x64] ss:$8 sps:$4 sm:$0xff]  }
 0xdbb   : > { %4223 = vmatprep.subr.bf16.mxu0 %v6172_v39  ;;  %v6214_v39 = vld [vmem:[#allocation29 + $0x164] ss:$8 sps:$4 sm:$0xff]  }
 0xdbd   : > { %4183 = vmatpush2.bf16.msra.mxu1 %v6167_v40  ;;  %v6217_v40 = vld [vmem:[#allocation29 + $0x54] ss:$8 sps:$4 sm:$0xff]  }
 0xdbe   : > { %4224 = vmatpush2.bf16.msra.mxu0 %v6170_v42  ;;  %4184 = vmatprep.subr.bf16.mxu1 %v6175_v45  ;;  %v6220_v42 = vld [vmem:[#allocation29 + $0x154] ss:$8 sps:$4 sm:$0xff]   ;;  %v6218_v45 = vld [vmem:[#allocation29 + $0x150] ss:$8 sps:$4 sm:$0xff]  }
 0xdbf   : > { %4225 = vmatprep.subr.bf16.mxu0 %v6178_v51  ;;  %v6226_v51 = vld [vmem:[#allocation29 + $0x144] ss:$8 sps:$4 sm:$0xff]  }
 0xdc1   : > { %4185 = vmatpush2.bf16.msra.mxu1 %v6173_v43  ;;  %v6215_v43 = vld [vmem:[#allocation29 + $0x50] ss:$8 sps:$4 sm:$0xff]  }
 0xdc2   : > { %4226 = vmatpush2.bf16.msra.mxu0 %v6176_v49  ;;  %4186 = vmatprep.subr.bf16.mxu1 %v6181_v52  ;;  %v6223_v49 = vld [vmem:[#allocation29 + $0x44] ss:$8 sps:$4 sm:$0xff]   ;;  %v6221_v52 = vld [vmem:[#allocation29 + $0x40] ss:$8 sps:$4 sm:$0xff]  }
 0xdc3   : > { %4227 = vmatprep.subr.bf16.mxu0 %v6184_v54  ;;  %v6224_v54 = vld [vmem:[#allocation29 + $0x140] ss:$8 sps:$4 sm:$0xff]  }
 0xdc5   : > { %4187 = vmatpush2.bf16.msra.mxu1 %v6179_v46  ;;  %v6229_v46 = vld [vmem:[#allocation29 + $0x34] ss:$8 sps:$4 sm:$0xff]  }
 0xdc6   : > { %4228 = vmatpush2.bf16.msra.mxu0 %v6182_v58  ;;  %4188 = vmatprep.subr.bf16.mxu1 %v6187_v59  ;;  %v6232_v58 = vld [vmem:[#allocation29 + $0x134] ss:$8 sps:$4 sm:$0xff]   ;;  %v6227_v59 = vld [vmem:[#allocation29 + $0x30] ss:$8 sps:$4 sm:$0xff]  }
 0xdc7   : > { %4229 = vmatprep.subr.bf16.mxu0 %v6190_v60  ;;  %v6230_v60 = vld [vmem:[#allocation29 + $0x130] ss:$8 sps:$4 sm:$0xff]  }
 0xdc9   : > { %4189 = vmatpush2.bf16.msra.mxu1 %v6185_v61  ;;  %v6235_v61 = vld [vmem:[#allocation29 + $0x24] ss:$8 sps:$4 sm:$0xff]  }
 0xdca   : > { %4230 = vmatpush2.bf16.msra.mxu0 %v6188_v62  ;;  %4190 = vmatprep.subr.bf16.mxu1 %v6193_v63  ;;  %v6238_v62 = vld [vmem:[#allocation29 + $0x124] ss:$8 sps:$4 sm:$0xff]   ;;  %v6233_v63 = vld [vmem:[#allocation29 + $0x20] ss:$8 sps:$4 sm:$0xff]  }
 0xdcb   : > { %4231 = vmatprep.subr.bf16.mxu0 %v6196_v0  ;;  %v6236_v0 = vld [vmem:[#allocation29 + $0x120] ss:$8 sps:$4 sm:$0xff]  }
 0xdcd   : > { %4191 = vmatpush2.bf16.msra.mxu1 %v6191_v32  ;;  %v6241_v32 = vld [vmem:[#allocation29 + $0x14] ss:$8 sps:$4 sm:$0xff]  }
 0xdce   : > { %4232 = vmatpush2.bf16.msra.mxu0 %v6194_v57  ;;  %4192 = vmatprep.subr.bf16.mxu1 %v6199_v47  ;;  %v6244_v57 = vld [vmem:[#allocation29 + $0x114] ss:$8 sps:$4 sm:$0xff]   ;;  %v6239_v47 = vld [vmem:[#allocation29 + $0x10] ss:$8 sps:$4 sm:$0xff]  }
 0xdcf   : > { %4233 = vmatprep.subr.bf16.mxu0 %v6202_v1  ;;  %v6242_v1 = vld [vmem:[#allocation29 + $0x110] ss:$8 sps:$4 sm:$0xff]  }
 0xdd1   : > { %4193 = vmatpush2.bf16.msra.mxu1 %v6197_v2  ;;  %v6247_v2 = vld [vmem:[#allocation29 + $0x4] ss:$8 sps:$4 sm:$0xff]  }
 0xdd2   : > { %4234 = vmatpush2.bf16.msra.mxu0 %v6200_v50  ;;  %4583 = vmatprep.subr.bf16.mxu1 %v6205_v3  ;;  %v6250_v50 = vld [vmem:[#allocation29 + $0x104] ss:$8 sps:$4 sm:$0xff]   ;;  %v6245_v3 = vld [vmem:[#allocation29] ss:$8 sps:$4 sm:$0xff]  }
 0xdd3   : > { %4624 = vmatprep.subr.bf16.mxu0 %v6208_v31  ;;  %v6248_v31 = vld [vmem:[#allocation29 + $0x100] ss:$8 sps:$4 sm:$0xff]  }
 0xe28   : > { %v3758_v12 = vpop.xlane.xlu0 %3757 }
 0xe29   : > { %v3759_v13 = vmul.f32 0.00390625, %v3758_v12  ;;  %v6329_v12 = vld [vmem:[#allocation14] sm:$0x77] }
 0xe2b   : > { %v7543_v14 = vsub.f32 %v7535_v55, %v3759_v13  ;;  %v7546_v30 = vsub.f32 %v7538_v56, %v3759_v13  ;;  %v3778_v13 = vrot.slane %v6329_v12, %v7553_v10 }
 0xe2d   : > { %v3762_v15 = vmul.f32 %v7543_v14, %v7543_v14  ;;  %v3763_v18 = vmul.f32 %v7546_v30, %v7546_v30 }
 0xe2f   : > { %v3764_v19 = vadd.f32 %v3763_v18, %v3762_v15  ;;  %v3782_v15 = vrot.slane %v6329_v12, %v3781_v11  ;;  %v3788_v18 = vrot.slane %v3778_v13, %v7553_v10  ;;  %v6265_v11 = vld [vmem:[#allocation29 + $0xd4] ss:$8 sps:$4 sm:$0xff]   ;;  %v6263_v13 = vld [vmem:[#allocation29 + $0xd0] ss:$8 sps:$4 sm:$0xff]  }
 0xe30   : > { %v6268_v12 = vld [vmem:[#allocation29 + $0x1d4] ss:$8 sps:$4 sm:$0xff]  }
 0xe31   : > { %3765 = vadd.xlane.f32.xlu1 %v3764_v19  ;;  %v3792_v19 = vrot.slane %v3782_v15, %v7553_v10  ;;  %v3793_v23 = vmul.f32 %v3788_v18, %v7543_v14  ;;  %v6209_v14 = vld [vmem:[#allocation29 + $0x60] ss:$8 sps:$4 sm:$0xff]   ;;  %v6266_v15 = vld [vmem:[#allocation29 + $0x1d0] ss:$8 sps:$4 sm:$0xff]   ;;  %v6271_v18 = vld [vmem:[#allocation29 + $0xc4] ss:$8 sps:$4 sm:$0xff]  }
 0xe33   : > { %v3794_v24 = vmul.f32 %v3792_v19, %v7546_v30  ;;  %v6212_v30 = vld [vmem:[#allocation29 + $0x160] ss:$8 sps:$4 sm:$0xff]   ;;  %v6274_v19 = vld [vmem:[#allocation29 + $0x1c4] ss:$8 sps:$4 sm:$0xff]  }
 0xeba   : > { %v3766_v4 = vpop.xlane.xlu1 %3765 }
 0xebb   : > { %v3767_v37 = vmul.f32 0.003921569, %v3766_v4  ;;  %v6253_v4 = vld [vmem:[#allocation29 + $0xf4] ss:$8 sps:$4 sm:$0xff]  }
 0xebd   : > { %6323 = vrsqrt.f32 %v3767_v37  ;;  %vm3770_vm14 = vcmp.eq.f32.partialorder %v3767_v37, inf  ;;  %v3773_v6 = vand.u32 2147483648, %v3767_v37  ;;  %vm3772_vm15 = vcmp.eq.f32.partialorder %v3767_v37, 0.0 }
 0xeca   : > { %v6324_v53 = vpop.eup %6323 }
 0xecb   : > { %v3769_v5 = vmul.f32 %v6324_v53, %v3767_v37  ;;  %v6251_v53 = vld [vmem:[#allocation29 + $0xf0] ss:$8 sps:$4 sm:$0xff]  }
 0xecd   : > { %v3771_v7 = vsel %vm3770_vm14, %v3767_v37, %v3769_v5  ;;  %v6256_v37 = vld [vmem:[#allocation29 + $0x1f4] ss:$8 sps:$4 sm:$0xff]   ;;  %v6254_v5 = vld [vmem:[#allocation29 + $0x1f0] ss:$8 sps:$4 sm:$0xff]  }
 0xece   : > { %v3774_v8 = vsel %vm3772_vm15, %v3773_v6, %v3771_v7  ;;  %v6259_v6 = vld [vmem:[#allocation29 + $0xe4] ss:$8 sps:$4 sm:$0xff]  }
 0xecf   : > { %v3795_v9 = vadd.f32 1e-06, %v3774_v8  ;;  %v6262_v7 = vld [vmem:[#allocation29 + $0x1e4] ss:$8 sps:$4 sm:$0xff]   ;;  %v6257_v8 = vld [vmem:[#allocation29 + $0xe0] ss:$8 sps:$4 sm:$0xff]  }
 0xed1   : > { %6325 = vrcp.f32 %v3795_v9  ;;  %v6260_v9 = vld [vmem:[#allocation29 + $0x1e0] ss:$8 sps:$4 sm:$0xff]  }
 0xede   : > { %v6326_v26 = vpop.eup %6325 }
 0xedf   : > { %v3798_v27 = vmul.f32 %v6326_v26, %v3794_v24  ;;  %v3797_v28 = vmul.f32 %v6326_v26, %v3793_v23  ;;  %v6280_v23 = vld [vmem:[#allocation29 + $0x1b4] ss:$8 sps:$4 sm:$0xff]   ;;  %v6275_v24 = vld [vmem:[#allocation29 + $0xb0] ss:$8 sps:$4 sm:$0xff]   ;;  %v6286_v26 = vld [vmem:[#allocation29 + $0x1a4] ss:$8 sps:$4 sm:$0xff]  }
 0xee1   : > { %v3818_v29 = vadd.f32 %v3816_v25, %v3798_v27  ;;  %v3817_v33 = vadd.f32 %v3812_v44, %v3797_v28  ;;  %v6278_v25 = vld [vmem:[#allocation29 + $0x1b0] ss:$8 sps:$4 sm:$0xff]   ;;  %v6283_v44 = vld [vmem:[#allocation29 + $0xa4] ss:$8 sps:$4 sm:$0xff]   ;;  %v6281_v27 = vld [vmem:[#allocation29 + $0xa0] ss:$8 sps:$4 sm:$0xff]  }
 0xee2   : > { %v6284_v28 = vld [vmem:[#allocation29 + $0x1a0] ss:$8 sps:$4 sm:$0xff]  }
 0xee3   : > { %v3820_v34 = vpack.c.bf16 %v3818_v29, %v3818_v29  ;;  %v3819_v16 = vpack.c.bf16 %v3817_v33, %v3817_v33  ;;  %v6289_v29 = vld [vmem:[#allocation29 + $0x94] ss:$8 sps:$4 sm:$0xff]  }
 0xee4   : > { %v6292_v33 = vld [vmem:[#allocation29 + $0x194] ss:$8 sps:$4 sm:$0xff]  }
 0xee5   : > { %4194 = vmatprep.mubr.bf16.mxu1 %v3820_v34  ;;  %4235 = vmatprep.mubr.bf16.mxu0 %v3820_v34  ;;  %v6287_v34 = vld [vmem:[#allocation29 + $0x90] ss:$8 sps:$4 sm:$0xff]  }
 0xee6   : > { %4195 = vmatmul.mubr.bf16.vlgmr.msra.gmra.mxu1 %v3819_v16  ;;  %4236 = vmatmul.mubr.bf16.vlgmr.msra.gmra.mxu0 %v3819_v16  ;;  %v6290_v16 = vld [vmem:[#allocation29 + $0x190] ss:$8 sps:$4 sm:$0xff]  }
 0xee7   : > { %4584 = vmatpush1.bf16.msra.mxu1 %v6203_v17  ;;  %4625 = vmatpush1.bf16.msra.mxu0 %v6206_v35  ;;  %v6295_v17 = vld [vmem:[#allocation29 + $0x84] ss:$8 sps:$4 sm:$0xff]  }
 0xee8   : > { %4585 = vmatprep.subr.bf16.mxu1 %v6211_v38  ;;  %4626 = vmatprep.subr.bf16.mxu0 %v6214_v39  ;;  %v6298_v35 = vld [vmem:[#allocation29 + $0x184] ss:$8 sps:$4 sm:$0xff]   ;;  %v6293_v38 = vld [vmem:[#allocation29 + $0x80] ss:$8 sps:$4 sm:$0xff]  }
 0xee9   : > { %v6296_v39 = vld [vmem:[#allocation29 + $0x180] ss:$8 sps:$4 sm:$0xff]  }
 0xeeb   : > { %4586 = vmatpush1.bf16.msra.mxu1 %v6209_v14  ;;  %4627 = vmatpush1.bf16.msra.mxu0 %v6212_v30  ;;  %v2265_v14 = vld [vmem:[%s7779_s5] sm:$0xf]  ;;  %v3836_v30 = vsub.s32 3, %v7416_v41 }
 0xeec   : > { %4587 = vmatprep.subr.bf16.mxu1 %v6217_v40  ;;  %4628 = vmatprep.subr.bf16.mxu0 %v6220_v42  ;;  %v3825_v40 = vrot.slane %v2265_v14, %v7419_v48  ;;  %v3833_v42 = vrot.slane %v2265_v14, %v7553_v10 }
 0xeef   : > { %4588 = vmatpush1.bf16.msra.mxu1 %v6215_v43  ;;  %4629 = vmatpush1.bf16.msra.mxu0 %v6218_v45  ;;  %v3829_v43 = vrot.slane %v2265_v14, %v7445_v36  ;;  %v3837_v45 = vrot.slane %v2265_v14, %v3836_v30 }
 0xef0   : > { %4589 = vmatprep.subr.bf16.mxu1 %v6223_v49  ;;  %4630 = vmatprep.subr.bf16.mxu0 %v6226_v51 }
 0xef3   : > { %4590 = vmatpush1.bf16.msra.mxu1 %v6221_v52  ;;  %4631 = vmatpush1.bf16.msra.mxu0 %v6224_v54 }
 0xef4   : > { %4591 = vmatprep.subr.bf16.mxu1 %v6229_v46  ;;  %4632 = vmatprep.subr.bf16.mxu0 %v6232_v58 }
 0xef7   : > { %4592 = vmatpush1.bf16.msra.mxu1 %v6227_v59  ;;  %4633 = vmatpush1.bf16.msra.mxu0 %v6230_v60 }
 0xef8   : > { %4593 = vmatprep.subr.bf16.mxu1 %v6235_v61  ;;  %4634 = vmatprep.subr.bf16.mxu0 %v6238_v62 }
 0xefb   : > { %4594 = vmatpush1.bf16.msra.mxu1 %v6233_v63  ;;  %4635 = vmatpush1.bf16.msra.mxu0 %v6236_v0 }
 0xefc   : > { %4595 = vmatprep.subr.bf16.mxu1 %v6241_v32  ;;  %4636 = vmatprep.subr.bf16.mxu0 %v6244_v57 }
 0xeff   : > { %4596 = vmatpush1.bf16.msra.mxu1 %v6239_v47  ;;  %4637 = vmatpush1.bf16.msra.mxu0 %v6242_v1 }
 0xf00   : > { %4597 = vmatprep.subr.bf16.mxu1 %v6247_v2  ;;  %4638 = vmatprep.subr.bf16.mxu0 %v6250_v50 }
 0xf03   : > { %4598 = vmatpush1.bf16.msra.mxu1 %v6245_v3  ;;  %4639 = vmatpush1.bf16.msra.mxu0 %v6248_v31  ;;  %v2330_v3 = vld [vmem:[%s7780_s6] sm:$0x3] }
 0xf04   : > { %4599 = vmatprep.subr.bf16.mxu1 %v6253_v4  ;;  %4640 = vmatprep.subr.bf16.mxu0 %v6256_v37  ;;  %v4256_v31 = vrot.slane %v2330_v3, %v7419_v48  ;;  %v4260_v4 = vrot.slane %v2330_v3, %v7445_v36 }
 0xf07   : > { %4600 = vmatpush2.bf16.msra.mxu1 %v6251_v53  ;;  %4641 = vmatpush2.bf16.msra.mxu0 %v6254_v5 }
 0xf08   : > { %4601 = vmatprep.subr.bf16.mxu1 %v6259_v6  ;;  %4642 = vmatprep.subr.bf16.mxu0 %v6262_v7 }
 0xf0b   : > { %4602 = vmatpush2.bf16.msra.mxu1 %v6257_v8  ;;  %4643 = vmatpush2.bf16.msra.mxu0 %v6260_v9 }
 0xf0c   : > { %4603 = vmatprep.subr.bf16.mxu1 %v6265_v11  ;;  %4644 = vmatprep.subr.bf16.mxu0 %v6268_v12 }
 0xf0f   : > { %4604 = vmatpush2.bf16.msra.mxu1 %v6263_v13  ;;  %4645 = vmatpush2.bf16.msra.mxu0 %v6266_v15 }
 0xf10   : > { %4605 = vmatprep.subr.bf16.mxu1 %v6271_v18  ;;  %4646 = vmatprep.subr.bf16.mxu0 %v6274_v19 }
 0xf13   : > { %4606 = vmatpush2.bf16.msra.mxu1 %v6269_v20  ;;  %4647 = vmatpush2.bf16.msra.mxu0 %v6272_v21 }
 0xf14   : > { %4607 = vmatprep.subr.bf16.mxu1 %v6277_v22  ;;  %4648 = vmatprep.subr.bf16.mxu0 %v6280_v23 }
 0xf17   : > { %4608 = vmatpush2.bf16.msra.mxu1 %v6275_v24  ;;  %4649 = vmatpush2.bf16.msra.mxu0 %v6278_v25 }
 0xf18   : > { %4609 = vmatprep.subr.bf16.mxu1 %v6283_v44  ;;  %4650 = vmatprep.subr.bf16.mxu0 %v6286_v26 }
 0xf1b   : > { %4610 = vmatpush2.bf16.msra.mxu1 %v6281_v27  ;;  %4651 = vmatpush2.bf16.msra.mxu0 %v6284_v28 }
 0xf1c   : > { %4611 = vmatprep.subr.bf16.mxu1 %v6289_v29  ;;  %4652 = vmatprep.subr.bf16.mxu0 %v6292_v33 }
 0xf1f   : > { %4612 = vmatpush2.bf16.msra.mxu1 %v6287_v34  ;;  %4653 = vmatpush2.bf16.msra.mxu0 %v6290_v16 }
 0xf20   : > { %4613 = vmatprep.subr.bf16.mxu1 %v6295_v17  ;;  %4654 = vmatprep.subr.bf16.mxu0 %v6298_v35 }
 0xf23   : > { %4614 = vmatpush2.bf16.msra.mxu1 %v6293_v38  ;;  %4655 = vmatpush2.bf16.msra.mxu0 %v6296_v39 }
 0xfa6   : > { %v4196_v49 = vpop.f32.mrf.mxu1  ;;  %v4237_v51 = vpop.f32.mrf.mxu0 }
 0xfa7   : > { %v4197_v52 = vadd.f32 %v4196_v49, %v3825_v40  ;;  %v4238_v54 = vadd.f32 %v4237_v51, %v3833_v42 }
 0xfa8   : > { %v4198_v46 = vpop.f32.mrf.mxu1  ;;  %v4239_v58 = vpop.f32.mrf.mxu0 }
 0xfa9   : > { %v4199_v59 = vadd.f32 %v4198_v46, %v3829_v43  ;;  %v4240_v60 = vadd.f32 %v4239_v58, %v3837_v45  ;;  %v4244_v61 = vmax.f32 %v4197_v52, 0.0  ;;  %v4246_v62 = vmax.f32 %v4238_v54, 0.0 }
 0xfaa   : > { %v4200_v63 = vpop.f32.mrf.mxu1  ;;  %v4241_v41 = vpop.f32.mrf.mxu0 }
 0xfab   : > { %v4245_v0 = vmax.f32 %v4199_v59, 0.0  ;;  %v4247_v32 = vmax.f32 %v4240_v60, 0.0  ;;  %v4248_v2 = vpack.c.bf16 %v4244_v61, %v4244_v61  ;;  %v4250_v50 = vpack.c.bf16 %v4246_v62, %v4246_v62 }
 0xfac   : > { %v4201_v10 = vpop.f32.mrf.mxu1  ;;  %v4242_v57 = vpop.f32.mrf.mxu0 }
 0xfad   : > { %v4249_v47 = vpack.c.bf16 %v4245_v0, %v4245_v0  ;;  %v4251_v1 = vpack.c.bf16 %v4247_v32, %v4247_v32 }
 0xfaf   : > { %4615 = vmatprep.mubr.bf16.mxu1 %v4249_v47  ;;  %4656 = vmatprep.mubr.bf16.mxu0 %v4251_v1 }
 0xfb0   : > { %4616 = vmatmul.mubr.bf16.vlgmr.msra.gmra.mxu1 %v4248_v2  ;;  %4657 = vmatmul.mubr.bf16.vlgmr.msra.gmra.mxu0 %v4250_v50 }
0x1070   : > { %v4617_v37 = vpop.f32.mrf.mxu1  ;;  %v4658_v53 = vpop.f32.mrf.mxu0 }
0x1071   : > { %v4618_v5 = vadd.f32 %v4617_v37, %v4256_v31 }
0x1072   : > { %v4619_v6 = vpop.f32.mrf.mxu1  ;;  %v4660_v7 = vpop.f32.mrf.mxu0 }
0x1073   : > { %v4659_v8 = vadd.f32 %v4658_v53, %v4618_v5  ;;  %v4620_v9 = vadd.f32 %v4619_v6, %v4260_v4 }
0x1074   : > { %v4621_v11 = vpop.f32.mrf.mxu1  ;;  %v4662_v12 = vpop.f32.mrf.mxu0 }
0x1075   : > { %v4665_v48 = vadd.f32 %v4659_v8, %v7535_v55  ;;  %v4661_v13 = vadd.f32 %v4660_v7, %v4620_v9 }
0x1076   : > { %v4622_v36 = vpop.f32.mrf.mxu1  ;;  %v4663_v15 = vpop.f32.mrf.mxu0 }
0x1077   : > { %4667 = vst [vmem:[%s7346_s3] sm:$0xff] %v4665_v48  ;;  %v4666_v18 = vadd.f32 %v4661_v13, %v7538_v56 }
0x1079   : > { %4668 = vst [vmem:[%s7346_s3 + $0x8] sm:$0xff] %v4666_v18 }
0x107a   : > { %6722 = shalt.err (!%p6719_p7)
}
0x107b   : > { %s6723_s22 = scalar_lea.hbm %s4684_s18, 256  ;;  %s6727_s15 = scalar_lea.hbm %s7781_s14, 1024 }
0x107c   : > { %p6724_p12 = scmp.ne.s32.totalorder %s4684_s18, %s6723_s22  ;;  %p6728_p10 = scmp.lt.s32.totalorder %s4684_s18, %s7781_s14 }
0x107d   : > { %p6729_p4 = scmp.lt.s32.totalorder %s6727_s15, %s6723_s22 }
0x107e   : > { %p6725_p2 = pnand %p6724_p12, %p7252_p9 }
0x107f   : > { %p6730_p3 = por %p6729_p4, %p6728_p10 }
0x1080   : > { %p6726_p8 = pneg %p6725_p2 }
0x1082   : > { %p6731_p6 = pnand %p6730_p3, %p6726_p8 }
0x1084   : > { %6734 = shalt.err (!%p6731_p6)
}
0x1085   : > { %5528 = dma.vmem_to_hbm [thread:$0]  (%p7252_p9), %s4687_s28, 256, %s4684_s18, %s4670_s0  }
0x1086 PF: > { %s7782_s8 = sld [smem:[#allocation43_spill]]  ;;  %p5601_p13 = scmp.ge.s32.totalorder %s6859_s26, 2 }
0x1088   : > { %p5575_p11 = pnand %p5601_p13, %p7256_p0 }
0x108a   : > { %p5576_p5 = pneg %p5575_p11 }
0x108c   : > { %s4698_s6 = sand.u32 1, %s7782_s8  }
0x108d   : > { %s4699_s16 = scalar_lea.sflag [#allocation10], %s4698_s6 }
0x108e   : > { %6814 = dma.done.wait (%p5576_p5), %s4699_s16, 256  }
0x108f   : > { %6816 = vsyncadd (%p5576_p5), %s4699_s16, 4294967040  ;;  %s51_s26 = sadd.s32 1, %s6859_s26   ;;  %s7784_s30 = sld [smem:[#allocation42_spill]] }
0x1090   : > { %p48_p1 = scmp.ge.s32.totalorder %s51_s26, 6   ;;  %s7785_s12 = smov %s7266_s4 }
0x1091   : > { %s7786_s5 = sld [smem:[#allocation46_spill]]  ;;  %s7789_s4 = smov %s6827_s13 }
0x1092   : > { %s7787_s6 = sld [smem:[#allocation48_spill]]  ;;  %s7790_s13 = smov %s7785_s12 }
0x1093   : > { %s7788_s9 = sld [smem:[#allocation49_spill]]  ;;  %s7791_s0 = smov %s6835_s23 }
0x1094   : > { %s7792_s23 = smov %s6839_s1  ;;  %s7793_s1 = smov %s7269_s29 }
0x1095   : > { %s7794_s24 = smov %s6855_s25  ;;  %50 = sbr.rel (!%p48_p1) target bundleno = 51 (0x33), region = 221 }
0x1099   : > { %s7795_s25 = smov %s7788_s9 }
0x109a   :  { %4704 = vsyncpa [#allocation9], 1 }
0x109b   :  { %4706 = vsyncpa [#allocation9 + $0x1], 1 }
0x109c   :  { %4707 = vsyncpa [#allocation12], 1 }
0x109d   :  { %4709 = vsyncpa [#allocation12 + $0x1], 1 }
0x109e   :  { %4710 = vsyncpa [#allocation15], 1 }
0x109f   :  { %4711 = vsyncpa [#allocation18], 1 }
0x10a0   :  { %4712 = vsyncpa [#allocation21], 1 }
0x10a1   :  { %4713 = vsyncpa [#allocation24], 1 }
0x10a2   :  { %4714 = vsyncpa [#allocation27], 1 }
0x10a3   :  { %4715 = vsyncpa [#allocation30], 1 }
0x10a4   :  { %4716 = vsyncpa [#allocation10], 1 }
0x10a5   :  { %4718 = vsyncpa [#allocation10 + $0x1], 1 }

</bundles_post_ra>
